<compile_context>
chip_gen: v7x
topology: tpu7x:2x2x1
jax: 0.10.0
libtpu: 0.0.40
codegen_flags: <defaults>
</compile_context>

<pallas_src>
import functools

import jax
import jax.numpy as jnp
from jax.experimental import pallas as pl
from jax.experimental.pallas import tpu as pltpu


def _bn_kernel(x_ref, gamma_ref, beta_ref, o_ref, *, inv_count, eps):
    # x_ref: (N, tile_c, HW) f32 in VMEM
    # gamma_ref / beta_ref: (tile_c, 1) f32

    # Pass 1: per-channel mean (lane + batch reduce).
    s = jnp.sum(x_ref[...], axis=(0, 2), keepdims=True)        # (1, tile_c, 1)
    mean = s * inv_count

    # Pass 2: centered variance (re-read x_ref; tile is VMEM-resident so this
    # pass is free VPU/XLU work under the DMA).
    xc = x_ref[...] - mean
    var = jnp.sum(xc * xc, axis=(0, 2), keepdims=True) * inv_count

    a = gamma_ref[...] * jax.lax.rsqrt(var + eps)               # (1, tile_c, 1)
    b = beta_ref[...] - mean * a                                # (1, tile_c, 1)

    # Pass 3: apply (re-read x_ref again; 2 VPU ops / element).
    o_ref[...] = x_ref[...] * a + b


def _pick_tile_c(C):
    # Prefer 512 => grid=(2,): one block per v7x TensorCore, 2-step pipeline
    # on v6e/v5e, minimal per-step overhead.
    for t in (512, 256, 128):
        if C % t == 0:
            return t
    return C  # fall back to one block over the full channel axis


def batchnorm2d_pallas(x_nchw, gamma, beta, eps=1e-5):
    """BatchNorm2d forward (training-mode batch statistics).

    x_nchw: (N, C, H, W) float32
    gamma, beta: (C,) float32
    returns: (N, C, H, W) float32
    """
    N, C, H, W = x_nchw.shape
    HW = H * W
    count = N * HW

    # Free reshapes of the contiguous NCHW buffer — no transposes.
    x3d = x_nchw.reshape(N, C, HW)
    gamma2d = gamma.reshape(C, 1)
    beta2d = beta.reshape(C, 1)

    tile_c = _pick_tile_c(C)
    grid = (C // tile_c,)

    kernel = functools.partial(_bn_kernel, inv_count=1.0 / float(count), eps=eps)

    # NOTE: input_output_aliases={0: 0} would let callers donate x (cheap
    # allocator win); omitted here because this script reuses x for the
    # reference check after the call.
    out3d = pl.pallas_call(
        kernel,
        out_shape=jax.ShapeDtypeStruct((N, C, HW), x3d.dtype),
        grid=grid,
        in_specs=[
            pl.BlockSpec((N, tile_c, HW), lambda i: (0, i, 0)),
            pl.BlockSpec((tile_c, 1), lambda i: (i, 0)),
            pl.BlockSpec((tile_c, 1), lambda i: (i, 0)),
        ],
        out_specs=pl.BlockSpec((N, tile_c, HW), lambda i: (0, i, 0)),
        compiler_params=pltpu.CompilerParams(
            dimension_semantics=("parallel",),
        ),
    )(x3d, gamma2d, beta2d)

    return out3d.reshape(N, C, H, W)


def _reference(x_nchw, gamma, beta, eps=1e-5):
    mean = jnp.mean(x_nchw, axis=(0, 2, 3), keepdims=True)
    var = jnp.mean((x_nchw - mean) ** 2, axis=(0, 2, 3), keepdims=True)
    g = gamma.reshape(1, -1, 1, 1)
    b = beta.reshape(1, -1, 1, 1)
    return (x_nchw - mean) * jax.lax.rsqrt(var + eps) * g + b


if __name__ == "__main__":
    key = jax.random.PRNGKey(0)
    kx, kg, kb = jax.random.split(key, 3)

    # Shape implied by the module's forward: (1, 1024, 14, 14), NCHW.
    N, C, H, W = 1, 1024, 14, 14
    x = jax.random.normal(kx, (N, C, H, W), dtype=jnp.float32)

    # Non-trivial affine parameters to exercise the affine path.
    gamma = 1.0 + 0.1 * jax.random.normal(kg, (C,), dtype=jnp.float32)
    beta = 0.1 * jax.random.normal(kb, (C,), dtype=jnp.float32)

    y = batchnorm2d_pallas(x, gamma, beta)
    jax.block_until_ready(y)

    y_ref = _reference(x, gamma, beta)
    assert y.shape == (N, C, H, W)
    assert jnp.allclose(y, y_ref, atol=2e-4, rtol=2e-4)

    print("KERNEL_OK")
</pallas_src>

<mosaic_0001>
module attributes {stable_mosaic.version = 11 : i64} {
  func.func @_bn_kernel(%arg0: i32, %arg1: memref<1x512x196xf32, #tpu.memory_space<vmem>>, %arg2: memref<512x1xf32, #tpu.memory_space<vmem>>, %arg3: memref<512x1xf32, #tpu.memory_space<vmem>>, %arg4: memref<1x512x196xf32, #tpu.memory_space<vmem>>) attributes {dimension_semantics = [#tpu.dimension_semantics<parallel>], iteration_bounds = array<i64: 2>, scalar_prefetch = 0 : i64, scratch_operands = 0 : i64, tpu.core_type = #tpu.core_type<tc>, window_params = [{transform_indices = @transform_0, window_bounds = array<i64: 1, 512, 196>}, {transform_indices = @transform_1, window_bounds = array<i64: 512, 1>}, {transform_indices = @transform_2, window_bounds = array<i64: 512, 1>}, {transform_indices = @transform_3, window_bounds = array<i64: 1, 512, 196>}]} {
    %c0 = arith.constant 0 : index
    %c0_0 = arith.constant 0 : index
    %c0_1 = arith.constant 0 : index
    %0 = vector.load %arg1[%c0, %c0_0, %c0_1] : memref<1x512x196xf32, #tpu.memory_space<vmem>>, vector<1x512x196xf32>
    %cst = arith.constant dense<0.000000e+00> : vector<512xf32>
    %1 = vector.multi_reduction <add>, %0, %cst [0, 2] : vector<1x512x196xf32> to vector<512xf32>
    %2 = vector.shape_cast %1 : vector<512xf32> to vector<1x512x1xf32>
    %cst_2 = arith.constant 0.00510204071 : f32
    %3 = vector.broadcast %cst_2 : f32 to vector<1x512x1xf32>
    %4 = arith.mulf %2, %3 : vector<1x512x1xf32>
    %c0_3 = arith.constant 0 : index
    %c0_4 = arith.constant 0 : index
    %c0_5 = arith.constant 0 : index
    %5 = vector.load %arg1[%c0_3, %c0_4, %c0_5] : memref<1x512x196xf32, #tpu.memory_space<vmem>>, vector<1x512x196xf32>
    %6 = vector.broadcast %4 : vector<1x512x1xf32> to vector<1x512x196xf32>
    %7 = arith.subf %5, %6 : vector<1x512x196xf32>
    %8 = arith.mulf %7, %7 : vector<1x512x196xf32>
    %cst_6 = arith.constant dense<0.000000e+00> : vector<512xf32>
    %9 = vector.multi_reduction <add>, %8, %cst_6 [0, 2] : vector<1x512x196xf32> to vector<512xf32>
    %10 = vector.shape_cast %9 : vector<512xf32> to vector<1x512x1xf32>
    %cst_7 = arith.constant 0.00510204071 : f32
    %11 = vector.broadcast %cst_7 : f32 to vector<1x512x1xf32>
    %12 = arith.mulf %10, %11 : vector<1x512x1xf32>
    %c0_8 = arith.constant 0 : index
    %c0_9 = arith.constant 0 : index
    %13 = vector.load %arg2[%c0_8, %c0_9] : memref<512x1xf32, #tpu.memory_space<vmem>>, vector<512x1xf32>
    %cst_10 = arith.constant 9.99999974E-6 : f32
    %14 = vector.broadcast %cst_10 : f32 to vector<1x512x1xf32>
    %15 = arith.addf %12, %14 : vector<1x512x1xf32>
    %16 = math.rsqrt %15 : vector<1x512x1xf32>
    %17 = vector.shape_cast %13 : vector<512x1xf32> to vector<1x512x1xf32>
    %18 = arith.mulf %17, %16 : vector<1x512x1xf32>
    %c0_11 = arith.constant 0 : index
    %c0_12 = arith.constant 0 : index
    %19 = vector.load %arg3[%c0_11, %c0_12] : memref<512x1xf32, #tpu.memory_space<vmem>>, vector<512x1xf32>
    %20 = arith.mulf %4, %18 : vector<1x512x1xf32>
    %21 = vector.shape_cast %19 : vector<512x1xf32> to vector<1x512x1xf32>
    %22 = arith.subf %21, %20 : vector<1x512x1xf32>
    %c0_13 = arith.constant 0 : index
    %c0_14 = arith.constant 0 : index
    %c0_15 = arith.constant 0 : index
    %23 = vector.load %arg1[%c0_13, %c0_14, %c0_15] : memref<1x512x196xf32, #tpu.memory_space<vmem>>, vector<1x512x196xf32>
    %24 = vector.broadcast %18 : vector<1x512x1xf32> to vector<1x512x196xf32>
    %25 = arith.mulf %23, %24 : vector<1x512x196xf32>
    %26 = vector.broadcast %22 : vector<1x512x1xf32> to vector<1x512x196xf32>
    %27 = arith.addf %25, %26 : vector<1x512x196xf32>
    %c0_16 = arith.constant 0 : index
    %c0_17 = arith.constant 0 : index
    %c0_18 = arith.constant 0 : index
    %28 = vector.load %arg4[%c0_16, %c0_17, %c0_18] : memref<1x512x196xf32, #tpu.memory_space<vmem>>, vector<1x512x196xf32>
    tpu.vector_store %arg4[%c0_16, %c0_17, %c0_18], %27 {strides = array<i32>} : memref<1x512x196xf32, #tpu.memory_space<vmem>>, vector<1x512x196xf32>,
    return
  }
  func.func @transform_0(%arg0: i32) -> (i32, i32, i32) {
    %c0_i32 = arith.constant 0 : i32
    %c0_i32_0 = arith.constant 0 : i32
    %c0_i32_1 = arith.constant 0 : i32
    return %c0_i32, %arg0, %c0_i32_0 : i32, i32, i32
  }
  func.func @transform_1(%arg0: i32) -> (i32, i32) {
    %c0_i32 = arith.constant 0 : i32
    %c0_i32_0 = arith.constant 0 : i32
    return %arg0, %c0_i32 : i32, i32
  }
  func.func @transform_2(%arg0: i32) -> (i32, i32) {
    %c0_i32 = arith.constant 0 : i32
    %c0_i32_0 = arith.constant 0 : i32
    return %arg0, %c0_i32 : i32, i32
  }
  func.func @transform_3(%arg0: i32) -> (i32, i32, i32) {
    %c0_i32 = arith.constant 0 : i32
    %c0_i32_0 = arith.constant 0 : i32
    %c0_i32_1 = arith.constant 0 : i32
    return %c0_i32, %arg0, %c0_i32_0 : i32, i32, i32
  }
}

</mosaic_0001>

<bundles_post_ra>
// kernel: tpu_custom_call.1
= control target key start
LH: loop header
LB: loop body
LE: loop exit
PB: predicated region body
PF: predicated region fallthrough
CT: control target
= control target key end

     0   :  { %s3150_s12 = smov 0   ;;  %s5142_s0 = inlined_call_operand.vmem [shape: f32[1,1024,196], index: 0, kind: input, shape index: {}]   ;;  %s5143_s1 = inlined_call_operand.vmem [shape: f32[1024,1], index: 1, kind: input, shape index: {}]   ;;  %s5144_s2 = inlined_call_operand.vmem [shape: f32[1024,1], index: 2, kind: input, shape index: {}]   ;;  %s5145_s3 = inlined_call_operand.vmem [shape: f32[1,1024,196], index: 3, kind: output, shape index: {}]  }
   0x1 LB: > { %s2802_s13 = sadd.s32 4294967295, %s3127_s12   ;;  %p2806_p0 = scmp.ge.s32.totalorder %s3127_s12, 1  ;;  %s3127_s12 = sphi %s3150_s12, %s13_s12  }
   0x2   : > { %p161_p1 = scmp.lt.s32.totalorder %s3127_s12, 3 }
   0x4   : > { %p162_p2 = pnand %p2806_p0, %p161_p1 }
   0x6   : > { %165 = sbr.rel (%p162_p2) target bundleno = 732 (0x2dc), region = 32 }
   0xd   : > { %s2807_s14 = sshll.u32 %s2802_s13, 6  ;;  %vm351_vm0 = vcmask 556032  }
   0xe   : > { %p198_p3 = scmp.lt.s32.totalorder %s2807_s14, 127 }
  0x10   : > { %s5561_s14 = smov (!%p198_p3, %s2807_s14), 127 }
  0x11   : > { %s2819_s15 = sshll.u32 %s5561_s14, 4  ;;  %s2811_s19 = sshll.u32 %s5561_s14, 3 }
  0x12   : > { %s3166_s18 = scalar_lea.vmem %s5142_s0, %s2819_s15  ;;  %s4099_s22 = scalar_lea.vmem %s5143_s1, %s2811_s19 }
  0x13   : > { %v3169_v0 = vld [vmem:[%s3166_s18] sm:$0xff]  ;;  %v3172_v1 = vld [vmem:[%s3166_s18 + $0x8] sm:$0xff]  ;;  %v3183_v5 = vld [vmem:[%s3166_s18 + $0x10] sm:$0xff]  ;;  %s4348_s25 = scalar_lea.vmem %s5144_s2, %s2811_s19  ;;  %s4683_s28 = scalar_lea.vmem %s5145_s3, %s2819_s15 }
  0x14   : > { %v3175_v2 = vld [vmem:[%s3166_s18 + $0x20] sm:$0xff]  ;;  %v352_v3 = vsel %vm351_vm0, %v3172_v1, 0.0  ;;  %v3180_v4 = vld [vmem:[%s3166_s18 + $0x28] sm:$0xff]  ;;  %v3186_v6 = vld [vmem:[%s3166_s18 + $0x18] sm:$0xff] }
  0x15   : > { %v353_v7 = vadd.f32 %v352_v3, %v3169_v0  ;;  %v360_v8 = vsel %vm351_vm0, %v3180_v4, 0.0  ;;  %v356_v9 = vsel %vm351_vm0, %v3186_v6, 0.0  ;;  %v3194_v10 = vld [vmem:[%s3166_s18 + $0x30] sm:$0xff]  ;;  %v3197_v11 = vld [vmem:[%s3166_s18 + $0x38] sm:$0xff]  ;;  %v3203_v14 = vld [vmem:[%s3166_s18 + $0x48] sm:$0xff] }
  0x16   : > { %v361_v12 = vadd.f32 %v360_v8, %v3175_v2  ;;  %v364_v13 = vsel %vm351_vm0, %v3197_v11, 0.0  ;;  %v3206_v15 = vld [vmem:[%s3166_s18 + $0x58] sm:$0xff]  ;;  %v357_v16 = vadd.f32 %v356_v9, %v3183_v5  ;;  %v3211_v18 = vld [vmem:[%s3166_s18 + $0x40] sm:$0xff]  ;;  %v368_v19 = vsel %vm351_vm0, %v3203_v14, 0.0  ;;  %v3216_v20 = vld [vmem:[%s3166_s18 + $0x50] sm:$0xff] }
  0x17   : > { %354 = vadd.xlane.f32.xlu0 %v353_v7  ;;  %v365_v17 = vadd.f32 %v364_v13, %v3194_v10  ;;  %v372_v21 = vsel %vm351_vm0, %v3206_v15, 0.0  ;;  %v3221_v22 = vld [vmem:[%s3166_s18 + $0x68] sm:$0xff]  ;;  %v3224_v23 = vld [vmem:[%s3166_s18 + $0x78] sm:$0xff]  ;;  %v369_v24 = vadd.f32 %v368_v19, %v3211_v18  ;;  %v3229_v26 = vld [vmem:[%s3166_s18 + $0x60] sm:$0xff] }
  0x18   : > { %362 = vadd.xlane.f32.xlu1 %v361_v12  ;;  %v373_v25 = vadd.f32 %v372_v21, %v3216_v20  ;;  %v376_v27 = vsel %vm351_vm0, %v3221_v22, 0.0  ;;  %v3234_v28 = vld [vmem:[%s3166_s18 + $0x70] sm:$0xff]  ;;  %v380_v29 = vsel %vm351_vm0, %v3224_v23, 0.0  ;;  %v3239_v30 = vld [vmem:[%s3166_s18 + $0x88] sm:$0xff]  ;;  %v3242_v31 = vld [vmem:[%s3166_s18 + $0x98] sm:$0xff] }
  0x19   : > { %v377_v32 = vadd.f32 %v376_v27, %v3229_v26  ;;  %v381_v33 = vadd.f32 %v380_v29, %v3234_v28  ;;  %v3247_v34 = vld [vmem:[%s3166_s18 + $0x80] sm:$0xff]  ;;  %v384_v35 = vsel %vm351_vm0, %v3239_v30, 0.0  ;;  %v3252_v36 = vld [vmem:[%s3166_s18 + $0x90] sm:$0xff]  ;;  %v388_v37 = vsel %vm351_vm0, %v3242_v31, 0.0  ;;  %v3257_v38 = vld [vmem:[%s3166_s18 + $0xa8] sm:$0xff] }
  0x1a   : > { %v3260_v39 = vld [vmem:[%s3166_s18 + $0xb8] sm:$0xff]  ;;  %v385_v40 = vadd.f32 %v384_v35, %v3247_v34  ;;  %v389_v41 = vadd.f32 %v388_v37, %v3252_v36  ;;  %v3265_v42 = vld [vmem:[%s3166_s18 + $0xa0] sm:$0xff]  ;;  %v392_v43 = vsel %vm351_vm0, %v3257_v38, 0.0  ;;  %v3270_v44 = vld [vmem:[%s3166_s18 + $0xb0] sm:$0xff] }
  0x1b   : > { %358 = vadd.xlane.f32.xlu0 %v357_v16  ;;  %v396_v45 = vsel %vm351_vm0, %v3260_v39, 0.0  ;;  %v3275_v46 = vld [vmem:[%s3166_s18 + $0xc8] sm:$0xff]  ;;  %v3278_v47 = vld [vmem:[%s3166_s18 + $0xd8] sm:$0xff]  ;;  %v393_v48 = vadd.f32 %v392_v43, %v3265_v42  ;;  %v3283_v50 = vld [vmem:[%s3166_s18 + $0xc0] sm:$0xff] }
  0x1c   : > { %366 = vadd.xlane.f32.xlu1 %v365_v17  ;;  %v397_v49 = vadd.f32 %v396_v45, %v3270_v44  ;;  %v400_v51 = vsel %vm351_vm0, %v3275_v46, 0.0  ;;  %v3288_v52 = vld [vmem:[%s3166_s18 + $0xd0] sm:$0xff]  ;;  %v404_v53 = vsel %vm351_vm0, %v3278_v47, 0.0  ;;  %v3293_v54 = vld [vmem:[%s3166_s18 + $0xe8] sm:$0xff]  ;;  %v3296_v55 = vld [vmem:[%s3166_s18 + $0xf8] sm:$0xff] }
  0x1d   : > { %v401_v56 = vadd.f32 %v400_v51, %v3283_v50  ;;  %v405_v57 = vadd.f32 %v404_v53, %v3288_v52  ;;  %v3301_v58 = vld [vmem:[%s3166_s18 + $0xe0] sm:$0xff]  ;;  %v408_v59 = vsel %vm351_vm0, %v3293_v54, 0.0  ;;  %v3306_v60 = vld [vmem:[%s3166_s18 + $0xf0] sm:$0xff]  ;;  %v412_v61 = vsel %vm351_vm0, %v3296_v55, 0.0  ;;  %v3311_v62 = vld [vmem:[%s3166_s18 + $0x108] sm:$0xff] }
  0x1e   : > { %v3314_v63 = vld [vmem:[%s3166_s18 + $0x118] sm:$0xff]  ;;  %v409_v3 = vadd.f32 %v408_v59, %v3301_v58  ;;  %v413_v7 = vadd.f32 %v412_v61, %v3306_v60  ;;  %v3319_v8 = vld [vmem:[%s3166_s18 + $0x100] sm:$0xff]  ;;  %v416_v9 = vsel %vm351_vm0, %v3311_v62, 0.0  ;;  %v3324_v12 = vld [vmem:[%s3166_s18 + $0x110] sm:$0xff] }
  0x1f   : > { %370 = vadd.xlane.f32.xlu0 %v369_v24  ;;  %v420_v13 = vsel %vm351_vm0, %v3314_v63, 0.0  ;;  %v3329_v16 = vld [vmem:[%s3166_s18 + $0x128] sm:$0xff]  ;;  %v3332_v17 = vld [vmem:[%s3166_s18 + $0x138] sm:$0xff]  ;;  %v417_v19 = vadd.f32 %v416_v9, %v3319_v8  ;;  %v3337_v24 = vld [vmem:[%s3166_s18 + $0x120] sm:$0xff] }
  0x20   : > { %374 = vadd.xlane.f32.xlu1 %v373_v25  ;;  %v421_v21 = vadd.f32 %v420_v13, %v3324_v12  ;;  %v424_v25 = vsel %vm351_vm0, %v3329_v16, 0.0  ;;  %v3342_v27 = vld [vmem:[%s3166_s18 + $0x130] sm:$0xff]  ;;  %v428_v29 = vsel %vm351_vm0, %v3332_v17, 0.0 }
  0x21   : > { %v425_v35 = vadd.f32 %v424_v25, %v3337_v24  ;;  %v429_v37 = vadd.f32 %v428_v29, %v3342_v27  ;;  %v3360_v43 = vld [vmem:[%s3166_s18 + $0x150] sm:$0xff] }
  0x22   : > { %v3378_v59 = vld [vmem:[%s3166_s18 + $0x170] sm:$0xff] }
  0x23   : > { %378 = vadd.xlane.f32.xlu0 %v377_v32  ;;  %v3347_v32 = vld [vmem:[%s3166_s18 + $0x148] sm:$0xff]  ;;  %5287 = vst [vmem:[#allocation5_spill] sm:$0xff] %v3378_v59  ;;  %v3396_v25 = vld [vmem:[%s3166_s18 + $0x190] sm:$0xff] }
  0x24   : > { %382 = vadd.xlane.f32.xlu1 %v381_v33  ;;  %v3350_v33 = vld [vmem:[%s3166_s18 + $0x158] sm:$0xff]  ;;  %5291 = vst [vmem:[#allocation9_spill] sm:$0xff] %v3396_v25 }
  0x25   : > { %v436_v45 = vsel %vm351_vm0, %v3350_v33, 0.0 }
  0x26   : > { %v437_v53 = vadd.f32 %v436_v45, %v3360_v43 }
  0x27   : > { %386 = vadd.xlane.f32.xlu0 %v385_v40  ;;  %v3355_v40 = vld [vmem:[%s3166_s18 + $0x140] sm:$0xff] }
  0x28   : > { %390 = vadd.xlane.f32.xlu1 %v389_v41  ;;  %v432_v41 = vsel %vm351_vm0, %v3347_v32, 0.0 }
  0x29   : > { %v433_v51 = vadd.f32 %v432_v41, %v3355_v40 }
  0x2b   : > { %394 = vadd.xlane.f32.xlu0 %v393_v48  ;;  %v3365_v48 = vld [vmem:[%s3166_s18 + $0x168] sm:$0xff] }
  0x2c   : > { %398 = vadd.xlane.f32.xlu1 %v397_v49  ;;  %5284 = vst [vmem:[#allocation2_spill] sm:$0xff] %v3365_v48  ;;  %v3368_v49 = vld [vmem:[%s3166_s18 + $0x178] sm:$0xff] }
  0x2d   : > { %5285 = vst [vmem:[#allocation3_spill] sm:$0xff] %v3368_v49  ;;  %v444_v61 = vsel %vm351_vm0, %v3368_v49, 0.0  ;;  %v330_v49 = vld [vmem:[%s3166_s18 + $0x358] sm:$0xff] }
  0x2e   : > { %v445_v13 = vadd.f32 %v444_v61, %v3378_v59  ;;  %v343_v59 = vld [vmem:[%s3166_s18 + $0x3c0] sm:$0xff] }
  0x2f   : > { %402 = vadd.xlane.f32.xlu0 %v401_v56  ;;  %v3373_v56 = vld [vmem:[%s3166_s18 + $0x160] sm:$0xff] }
  0x30   : > { %406 = vadd.xlane.f32.xlu1 %v405_v57  ;;  %5286 = vst [vmem:[#allocation4_spill] sm:$0xff] %v3373_v56  ;;  %v440_v57 = vsel %vm351_vm0, %v3365_v48, 0.0  ;;  %v347_v48 = vld [vmem:[%s3166_s18 + $0x3e0] sm:$0xff] }
  0x31   : > { %v441_v9 = vadd.f32 %v440_v57, %v3373_v56  ;;  %v3414_v57 = vld [vmem:[%s3166_s18 + $0x1b0] sm:$0xff] }
  0x32   : > { %5295 = vst [vmem:[#allocation13_spill] sm:$0xff] %v3414_v57 }
  0x33   : > { %410 = vadd.xlane.f32.xlu0 %v409_v3  ;;  %v3383_v3 = vld [vmem:[%s3166_s18 + $0x188] sm:$0xff] }
  0x34   : > { %414 = vadd.xlane.f32.xlu1 %v413_v7  ;;  %5288 = vst [vmem:[#allocation6_spill] sm:$0xff] %v3383_v3  ;;  %v3386_v7 = vld [vmem:[%s3166_s18 + $0x198] sm:$0xff] }
  0x35   : > { %5289 = vst [vmem:[#allocation7_spill] sm:$0xff] %v3386_v7  ;;  %v452_v29 = vsel %vm351_vm0, %v3386_v7, 0.0  ;;  %v3419_v7 = vld [vmem:[%s3166_s18 + $0x1c8] sm:$0xff] }
  0x36   : > { %v453_v45 = vadd.f32 %v452_v29, %v3396_v25  ;;  %5296 = vst [vmem:[#allocation14_spill] sm:$0xff] %v3419_v7  ;;  %v3427_v29 = vld [vmem:[%s3166_s18 + $0x1c0] sm:$0xff] }
  0x37   : > { %418 = vadd.xlane.f32.xlu0 %v417_v19  ;;  %v3391_v19 = vld [vmem:[%s3166_s18 + $0x180] sm:$0xff]  ;;  %5298 = vst [vmem:[#allocation16_spill] sm:$0xff] %v3427_v29 }
  0x38   : > { %422 = vadd.xlane.f32.xlu1 %v421_v21  ;;  %5290 = vst [vmem:[#allocation8_spill] sm:$0xff] %v3391_v19  ;;  %v448_v21 = vsel %vm351_vm0, %v3383_v3, 0.0  ;;  %v3437_v3 = vld [vmem:[%s3166_s18 + $0x1e8] sm:$0xff] }
  0x39   : > { %v449_v41 = vadd.f32 %v448_v21, %v3391_v19  ;;  %5300 = vst [vmem:[#allocation18_spill] sm:$0xff] %v3437_v3  ;;  %v324_v19 = vld [vmem:[%s3166_s18 + $0x328] sm:$0xff] }
  0x3b   : > { %426 = vadd.xlane.f32.xlu0 %v425_v35  ;;  %v3401_v35 = vld [vmem:[%s3166_s18 + $0x1a8] sm:$0xff] }
  0x3c   : > { %430 = vadd.xlane.f32.xlu1 %v429_v37  ;;  %5292 = vst [vmem:[#allocation10_spill] sm:$0xff] %v3401_v35  ;;  %v3404_v37 = vld [vmem:[%s3166_s18 + $0x1b8] sm:$0xff] }
  0x3d   : > { %5293 = vst [vmem:[#allocation11_spill] sm:$0xff] %v3404_v37  ;;  %v460_v61 = vsel %vm351_vm0, %v3404_v37, 0.0  ;;  %v3432_v37 = vld [vmem:[%s3166_s18 + $0x1d0] sm:$0xff] }
  0x3e   : > { %v461_v21 = vadd.f32 %v460_v61, %v3414_v57  ;;  %5299 = vst [vmem:[#allocation17_spill] sm:$0xff] %v3432_v37  ;;  %v3445_v61 = vld [vmem:[%s3166_s18 + $0x1e0] sm:$0xff] }
  0x3f   : > { %434 = vadd.xlane.f32.xlu0 %v433_v51  ;;  %v3409_v51 = vld [vmem:[%s3166_s18 + $0x1a0] sm:$0xff]  ;;  %5302 = vst [vmem:[#allocation20_spill] sm:$0xff] %v3445_v61 }
  0x40   : > { %438 = vadd.xlane.f32.xlu1 %v437_v53  ;;  %5294 = vst [vmem:[#allocation12_spill] sm:$0xff] %v3409_v51  ;;  %v456_v53 = vsel %vm351_vm0, %v3401_v35, 0.0  ;;  %v464_v35 = vsel %vm351_vm0, %v3419_v7, 0.0  ;;  %v472_v7 = vsel %vm351_vm0, %v3437_v3, 0.0 }
  0x43   : > { %442 = vadd.xlane.f32.xlu0 %v441_v9  ;;  %v3422_v9 = vld [vmem:[%s3166_s18 + $0x1d8] sm:$0xff] }
  0x44   : > { %446 = vadd.xlane.f32.xlu1 %v445_v13  ;;  %5297 = vst [vmem:[#allocation15_spill] sm:$0xff] %v3422_v9  ;;  %v457_v13 = vadd.f32 %v456_v53, %v3409_v51  ;;  %v468_v25 = vsel %vm351_vm0, %v3422_v9, 0.0  ;;  %v3450_v9 = vld [vmem:[%s3166_s18 + $0x1f0] sm:$0xff]  ;;  %v3455_v51 = vld [vmem:[%s3166_s18 + $0x208] sm:$0xff] }
  0x45   : > { %v469_v53 = vadd.f32 %v468_v25, %v3432_v37  ;;  %5303 = vst [vmem:[#allocation21_spill] sm:$0xff] %v3450_v9  ;;  %5304 = vst [vmem:[#allocation22_spill] sm:$0xff] %v3455_v51  ;;  %v473_v25 = vadd.f32 %v472_v7, %v3445_v61  ;;  %v480_v3 = vsel %vm351_vm0, %v3455_v51, 0.0  ;;  %v3491_v61 = vld [vmem:[%s3166_s18 + $0x248] sm:$0xff] }
  0x46   : > { %5312 = vst [vmem:[#allocation30_spill] sm:$0xff] %v3491_v61 }
  0x47   : > { %450 = vadd.xlane.f32.xlu0 %v449_v41  ;;  %v3440_v41 = vld [vmem:[%s3166_s18 + $0x1f8] sm:$0xff] }
  0x48   : > { %454 = vadd.xlane.f32.xlu1 %v453_v45  ;;  %5301 = vst [vmem:[#allocation19_spill] sm:$0xff] %v3440_v41  ;;  %v465_v45 = vadd.f32 %v464_v35, %v3427_v29  ;;  %v476_v57 = vsel %vm351_vm0, %v3440_v41, 0.0  ;;  %v3468_v41 = vld [vmem:[%s3166_s18 + $0x210] sm:$0xff]  ;;  %v3473_v29 = vld [vmem:[%s3166_s18 + $0x228] sm:$0xff] }
  0x49   : > { %v477_v35 = vadd.f32 %v476_v57, %v3450_v9  ;;  %5307 = vst [vmem:[#allocation25_spill] sm:$0xff] %v3468_v41  ;;  %5308 = vst [vmem:[#allocation26_spill] sm:$0xff] %v3473_v29  ;;  %v488_v51 = vsel %vm351_vm0, %v3473_v29, 0.0  ;;  %v496_v29 = vsel %vm351_vm0, %v3491_v61, 0.0 }
  0x4b   : > { %458 = vadd.xlane.f32.xlu0 %v457_v13  ;;  %v3458_v13 = vld [vmem:[%s3166_s18 + $0x218] sm:$0xff] }
  0x4c   : > { %462 = vadd.xlane.f32.xlu1 %v461_v21  ;;  %5305 = vst [vmem:[#allocation23_spill] sm:$0xff] %v3458_v13  ;;  %v3463_v21 = vld [vmem:[%s3166_s18 + $0x200] sm:$0xff]  ;;  %v484_v37 = vsel %vm351_vm0, %v3458_v13, 0.0  ;;  %v3486_v13 = vld [vmem:[%s3166_s18 + $0x230] sm:$0xff] }
  0x4d   : > { %5306 = vst [vmem:[#allocation24_spill] sm:$0xff] %v3463_v21  ;;  %v481_v7 = vadd.f32 %v480_v3, %v3463_v21  ;;  %v485_v57 = vadd.f32 %v484_v37, %v3468_v41  ;;  %5311 = vst [vmem:[#allocation29_spill] sm:$0xff] %v3486_v13  ;;  %v3509_v21 = vld [vmem:[%s3166_s18 + $0x268] sm:$0xff] }
  0x4e   : > { %5316 = vst [vmem:[#allocation34_spill] sm:$0xff] %v3509_v21  ;;  %v504_v61 = vsel %vm351_vm0, %v3509_v21, 0.0 }
  0x4f   : > { %466 = vadd.xlane.f32.xlu0 %v465_v45  ;;  %v3476_v45 = vld [vmem:[%s3166_s18 + $0x238] sm:$0xff] }
  0x50   : > { %470 = vadd.xlane.f32.xlu1 %v469_v53  ;;  %5309 = vst [vmem:[#allocation27_spill] sm:$0xff] %v3476_v45  ;;  %v3481_v53 = vld [vmem:[%s3166_s18 + $0x220] sm:$0xff]  ;;  %v492_v9 = vsel %vm351_vm0, %v3476_v45, 0.0  ;;  %v3504_v45 = vld [vmem:[%s3166_s18 + $0x250] sm:$0xff] }
  0x51   : > { %5310 = vst [vmem:[#allocation28_spill] sm:$0xff] %v3481_v53  ;;  %v489_v3 = vadd.f32 %v488_v51, %v3481_v53  ;;  %v493_v37 = vadd.f32 %v492_v9, %v3486_v13  ;;  %5315 = vst [vmem:[#allocation33_spill] sm:$0xff] %v3504_v45  ;;  %v3527_v53 = vld [vmem:[%s3166_s18 + $0x288] sm:$0xff] }
  0x52   : > { %5320 = vst [vmem:[#allocation38_spill] sm:$0xff] %v3527_v53  ;;  %v512_v21 = vsel %vm351_vm0, %v3527_v53, 0.0 }
  0x53   : > { %474 = vadd.xlane.f32.xlu0 %v473_v25  ;;  %v3494_v25 = vld [vmem:[%s3166_s18 + $0x258] sm:$0xff] }
  0x54   : > { %478 = vadd.xlane.f32.xlu1 %v477_v35  ;;  %5313 = vst [vmem:[#allocation31_spill] sm:$0xff] %v3494_v25  ;;  %v3499_v35 = vld [vmem:[%s3166_s18 + $0x240] sm:$0xff]  ;;  %v500_v41 = vsel %vm351_vm0, %v3494_v25, 0.0  ;;  %v3522_v25 = vld [vmem:[%s3166_s18 + $0x270] sm:$0xff] }
  0x55   : > { %5314 = vst [vmem:[#allocation32_spill] sm:$0xff] %v3499_v35  ;;  %v497_v51 = vadd.f32 %v496_v29, %v3499_v35  ;;  %v501_v9 = vadd.f32 %v500_v41, %v3504_v45  ;;  %5319 = vst [vmem:[#allocation37_spill] sm:$0xff] %v3522_v25  ;;  %v3545_v35 = vld [vmem:[%s3166_s18 + $0x2a8] sm:$0xff] }
  0x56   : > { %5324 = vst [vmem:[#allocation42_spill] sm:$0xff] %v3545_v35  ;;  %v520_v53 = vsel %vm351_vm0, %v3545_v35, 0.0 }
  0x57   : > { %482 = vadd.xlane.f32.xlu0 %v481_v7  ;;  %v3512_v7 = vld [vmem:[%s3166_s18 + $0x278] sm:$0xff] }
  0x58   : > { %486 = vadd.xlane.f32.xlu1 %v485_v57  ;;  %5317 = vst [vmem:[#allocation35_spill] sm:$0xff] %v3512_v7  ;;  %v3517_v57 = vld [vmem:[%s3166_s18 + $0x260] sm:$0xff]  ;;  %v508_v13 = vsel %vm351_vm0, %v3512_v7, 0.0  ;;  %v3540_v7 = vld [vmem:[%s3166_s18 + $0x290] sm:$0xff] }
  0x59   : > { %5318 = vst [vmem:[#allocation36_spill] sm:$0xff] %v3517_v57  ;;  %v505_v29 = vadd.f32 %v504_v61, %v3517_v57  ;;  %v509_v41 = vadd.f32 %v508_v13, %v3522_v25  ;;  %5323 = vst [vmem:[#allocation41_spill] sm:$0xff] %v3540_v7  ;;  %v3563_v57 = vld [vmem:[%s3166_s18 + $0x2c8] sm:$0xff] }
  0x5a   : > { %5328 = vst [vmem:[#allocation46_spill] sm:$0xff] %v3563_v57  ;;  %v528_v35 = vsel %vm351_vm0, %v3563_v57, 0.0 }
  0x5b   : > { %490 = vadd.xlane.f32.xlu0 %v489_v3  ;;  %v3530_v3 = vld [vmem:[%s3166_s18 + $0x298] sm:$0xff] }
  0x5c   : > { %494 = vadd.xlane.f32.xlu1 %v493_v37  ;;  %5321 = vst [vmem:[#allocation39_spill] sm:$0xff] %v3530_v3  ;;  %v3535_v37 = vld [vmem:[%s3166_s18 + $0x280] sm:$0xff]  ;;  %v516_v45 = vsel %vm351_vm0, %v3530_v3, 0.0  ;;  %v3558_v3 = vld [vmem:[%s3166_s18 + $0x2b0] sm:$0xff] }
  0x5d   : > { %5322 = vst [vmem:[#allocation40_spill] sm:$0xff] %v3535_v37  ;;  %v513_v61 = vadd.f32 %v512_v21, %v3535_v37  ;;  %v517_v13 = vadd.f32 %v516_v45, %v3540_v7  ;;  %5327 = vst [vmem:[#allocation45_spill] sm:$0xff] %v3558_v3  ;;  %v3581_v37 = vld [vmem:[%s3166_s18 + $0x2e8] sm:$0xff] }
  0x5e   : > { %5332 = vst [vmem:[#allocation50_spill] sm:$0xff] %v3581_v37  ;;  %v536_v57 = vsel %vm351_vm0, %v3581_v37, 0.0  ;;  %v321_v37 = vld [vmem:[%s3166_s18 + $0x310] sm:$0xff] }
  0x5f   : > { %498 = vadd.xlane.f32.xlu0 %v497_v51  ;;  %v3548_v51 = vld [vmem:[%s3166_s18 + $0x2b8] sm:$0xff] }
  0x60   : > { %502 = vadd.xlane.f32.xlu1 %v501_v9  ;;  %5325 = vst [vmem:[#allocation43_spill] sm:$0xff] %v3548_v51  ;;  %v3553_v9 = vld [vmem:[%s3166_s18 + $0x2a0] sm:$0xff]  ;;  %v524_v25 = vsel %vm351_vm0, %v3548_v51, 0.0  ;;  %v3576_v51 = vld [vmem:[%s3166_s18 + $0x2d0] sm:$0xff] }
  0x61   : > { %5326 = vst [vmem:[#allocation44_spill] sm:$0xff] %v3553_v9  ;;  %v521_v21 = vadd.f32 %v520_v53, %v3553_v9  ;;  %v525_v45 = vadd.f32 %v524_v25, %v3558_v3  ;;  %5331 = vst [vmem:[#allocation49_spill] sm:$0xff] %v3576_v51  ;;  %v3592_v3 = vld [vmem:[%s3166_s18 + $0x2f0] sm:$0xff]  ;;  %v320_v9 = vld [vmem:[%s3166_s18 + $0x308] sm:$0xff] }
  0x62   : > { %5334 = vst [vmem:[#allocation52_spill] sm:$0xff] %v3592_v3 }
  0x63   : > { %506 = vadd.xlane.f32.xlu0 %v505_v29  ;;  %v3566_v29 = vld [vmem:[%s3166_s18 + $0x2d8] sm:$0xff] }
  0x64   : > { %510 = vadd.xlane.f32.xlu1 %v509_v41  ;;  %5329 = vst [vmem:[#allocation47_spill] sm:$0xff] %v3566_v29  ;;  %v3571_v41 = vld [vmem:[%s3166_s18 + $0x2c0] sm:$0xff]  ;;  %v532_v7 = vsel %vm351_vm0, %v3566_v29, 0.0 }
  0x65   : > { %5330 = vst [vmem:[#allocation48_spill] sm:$0xff] %v3571_v41  ;;  %v529_v53 = vadd.f32 %v528_v35, %v3571_v41  ;;  %v533_v25 = vadd.f32 %v532_v7, %v3576_v51  ;;  %v544_v51 = vsel %vm351_vm0, %v320_v9, 0.0  ;;  %v328_v9 = vld [vmem:[%s3166_s18 + $0x348] sm:$0xff] }
  0x67   : > { %514 = vadd.xlane.f32.xlu0 %v513_v61  ;;  %v318_v61 = vld [vmem:[%s3166_s18 + $0x2f8] sm:$0xff] }
  0x68   : > { %518 = vadd.xlane.f32.xlu1 %v517_v13  ;;  %v3587_v13 = vld [vmem:[%s3166_s18 + $0x2e0] sm:$0xff]  ;;  %v540_v29 = vsel %vm351_vm0, %v318_v61, 0.0  ;;  %v326_v61 = vld [vmem:[%s3166_s18 + $0x338] sm:$0xff] }
  0x69   : > { %5333 = vst [vmem:[#allocation51_spill] sm:$0xff] %v3587_v13  ;;  %v537_v35 = vadd.f32 %v536_v57, %v3587_v13  ;;  %v541_v7 = vadd.f32 %v540_v29, %v3592_v3  ;;  %v552_v29 = vsel %vm351_vm0, %v324_v19, 0.0  ;;  %v325_v3 = vld [vmem:[%s3166_s18 + $0x330] sm:$0xff]  ;;  %v556_v13 = vsel %vm351_vm0, %v326_v61, 0.0  ;;  %v332_v19 = vld [vmem:[%s3166_s18 + $0x368] sm:$0xff] }
  0x6b   : > { %522 = vadd.xlane.f32.xlu0 %v521_v21  ;;  %v322_v21 = vld [vmem:[%s3166_s18 + $0x318] sm:$0xff] }
  0x6c   : > { %526 = vadd.xlane.f32.xlu1 %v525_v45  ;;  %v319_v45 = vld [vmem:[%s3166_s18 + $0x300] sm:$0xff]  ;;  %v548_v41 = vsel %vm351_vm0, %v322_v21, 0.0 }
  0x6d   : > { %v549_v57 = vadd.f32 %v548_v41, %v321_v37  ;;  %v560_v37 = vsel %vm351_vm0, %v328_v9, 0.0  ;;  %v329_v41 = vld [vmem:[%s3166_s18 + $0x350] sm:$0xff]  ;;  %v338_v9 = vld [vmem:[%s3166_s18 + $0x398] sm:$0xff] }
  0x6f   : > { %530 = vadd.xlane.f32.xlu0 %v529_v53  ;;  %v545_v53 = vadd.f32 %v544_v51, %v319_v45  ;;  %v327_v51 = vld [vmem:[%s3166_s18 + $0x340] sm:$0xff]  ;;  %v334_v45 = vld [vmem:[%s3166_s18 + $0x378] sm:$0xff] }
  0x70   : > { %534 = vadd.xlane.f32.xlu1 %v533_v25  ;;  %v323_v25 = vld [vmem:[%s3166_s18 + $0x320] sm:$0xff]  ;;  %v561_v61 = vadd.f32 %v560_v37, %v327_v51  ;;  %v337_v37 = vld [vmem:[%s3166_s18 + $0x390] sm:$0xff] }
  0x71   : > { %v553_v21 = vadd.f32 %v552_v29, %v323_v25  ;;  %v572_v25 = vsel %vm351_vm0, %v334_v45, 0.0  ;;  %v336_v29 = vld [vmem:[%s3166_s18 + $0x388] sm:$0xff] }
  0x72   : > { %v576_v51 = vsel %vm351_vm0, %v336_v29, 0.0  ;;  %v346_v29 = vld [vmem:[%s3166_s18 + $0x3d8] sm:$0xff] }
  0x73   : > { %538 = vadd.xlane.f32.xlu0 %v537_v35  ;;  %v557_v35 = vadd.f32 %v556_v13, %v325_v3  ;;  %v568_v3 = vsel %vm351_vm0, %v332_v19, 0.0  ;;  %v333_v13 = vld [vmem:[%s3166_s18 + $0x370] sm:$0xff]  ;;  %v342_v19 = vld [vmem:[%s3166_s18 + $0x3b8] sm:$0xff] }
  0x74   : > { %542 = vadd.xlane.f32.xlu1 %v541_v7  ;;  %v564_v7 = vsel %vm351_vm0, %v330_v49, 0.0 }
  0x77   : > { %546 = vadd.xlane.f32.xlu0 %v545_v53  ;;  %v565_v53 = vadd.f32 %v564_v7, %v329_v41  ;;  %v580_v41 = vsel %vm351_vm0, %v338_v9, 0.0  ;;  %v340_v7 = vld [vmem:[%s3166_s18 + $0x3a8] sm:$0xff] }
  0x78   : > { %550 = vadd.xlane.f32.xlu1 %v549_v57  ;;  %v331_v57 = vld [vmem:[%s3166_s18 + $0x360] sm:$0xff] }
  0x79   : > { %v569_v49 = vadd.f32 %v568_v3, %v331_v57  ;;  %v584_v57 = vsel %vm351_vm0, %v340_v7, 0.0  ;;  %v341_v3 = vld [vmem:[%s3166_s18 + $0x3b0] sm:$0xff] }
  0x7b   : > { %554 = vadd.xlane.f32.xlu0 %v553_v21  ;;  %v573_v21 = vadd.f32 %v572_v25, %v333_v13  ;;  %v588_v13 = vsel %vm351_vm0, %v342_v19, 0.0  ;;  %v344_v25 = vld [vmem:[%s3166_s18 + $0x3c8] sm:$0xff] }
  0x7c   : > { %558 = vadd.xlane.f32.xlu1 %v557_v35  ;;  %v335_v35 = vld [vmem:[%s3166_s18 + $0x380] sm:$0xff] }
  0x7d   : > { %v577_v45 = vadd.f32 %v576_v51, %v335_v35  ;;  %v345_v35 = vld [vmem:[%s3166_s18 + $0x3d0] sm:$0xff]  ;;  %v596_v51 = vsel %vm351_vm0, %v346_v29, 0.0 }
  0x7e   : > { %v597_v19 = vadd.f32 %v596_v51, %v345_v35 }
  0x7f   : > { %562 = vadd.xlane.f32.xlu0 %v561_v61  ;;  %v581_v61 = vadd.f32 %v580_v41, %v337_v37  ;;  %v348_v37 = vld [vmem:[%s3166_s18 + $0x3e8] sm:$0xff]  ;;  %v350_v41 = vld [vmem:[%s3166_s18 + $0x3f8] sm:$0xff] }
  0x80   : > { %566 = vadd.xlane.f32.xlu1 %v565_v53  ;;  %v339_v53 = vld [vmem:[%s3166_s18 + $0x3a0] sm:$0xff]  ;;  %v600_v56 = vsel %vm351_vm0, %v348_v37, 0.0 }
  0x81   : > { %v585_v9 = vadd.f32 %v584_v57, %v339_v53  ;;  %v604_v53 = vsel %vm351_vm0, %v350_v41, 0.0 }
  0x83   : > { %570 = vadd.xlane.f32.xlu0 %v569_v49  ;;  %v589_v49 = vadd.f32 %v588_v13, %v341_v3 }
  0x84   : > { %574 = vadd.xlane.f32.xlu1 %v573_v21  ;;  %v592_v21 = vsel %vm351_vm0, %v344_v25, 0.0 }
  0x85   : > { %v593_v7 = vadd.f32 %v592_v21, %v343_v59 }
  0x87   : > { %578 = vadd.xlane.f32.xlu0 %v577_v45  ;;  %v349_v45 = vld [vmem:[%s3166_s18 + $0x3f0] sm:$0xff] }
  0x88   : > { %582 = vadd.xlane.f32.xlu1 %v581_v61  ;;  %v601_v61 = vadd.f32 %v600_v56, %v347_v48  ;;  %v605_v57 = vadd.f32 %v604_v53, %v349_v45 }
  0x8b   : > { %586 = vadd.xlane.f32.xlu0 %v585_v9 }
  0x8c   : > { %590 = vadd.xlane.f32.xlu1 %v589_v49 }
  0x8f   : > { %594 = vadd.xlane.f32.xlu0 %v593_v7 }
  0x90   : > { %598 = vadd.xlane.f32.xlu1 %v597_v19 }
  0x93   : > { %602 = vadd.xlane.f32.xlu0 %v601_v61 }
  0x94   : > { %606 = vadd.xlane.f32.xlu1 %v605_v57 }
  0xa4   : > { %v355_v3 = vpop.xlane.xlu0 %354 }
  0xa5   : > { %v3645_v13 = vmul.f32 0.0051020407, %v355_v3  ;;  %v363_v25 = vpop.xlane.xlu1 %362 }
  0xa6   : > { %v3647_v29 = vmul.f32 0.0051020407, %v363_v25 }
  0xa7   : > { %v672_v59 = vsub.f32 %v3169_v0, %v3645_v13  ;;  %v673_v9 = vsub.f32 %v3172_v1, %v3645_v13 }
  0xa8   : > { %v359_v49 = vpop.xlane.xlu0 %358  ;;  %v676_v48 = vsub.f32 %v3175_v2, %v3647_v29  ;;  %v677_v56 = vsub.f32 %v3180_v4, %v3647_v29 }
  0xa9   : > { %v3657_v21 = vmul.f32 0.0051020407, %v359_v49  ;;  %v367_v35 = vpop.xlane.xlu1 %366  ;;  %v800_v51 = vmul.f32 %v672_v59, %v672_v59  ;;  %v801_v37 = vmul.f32 %v673_v9, %v673_v9 }
  0xaa   : > { %v3659_v41 = vmul.f32 0.0051020407, %v367_v35  ;;  %v804_v7 = vmul.f32 %v676_v48, %v676_v48  ;;  %v805_v19 = vmul.f32 %v677_v56, %v677_v56 }
  0xab   : > { %v928_v0 = vsel %vm351_vm0, %v801_v37, 0.0  ;;  %v674_v1 = vsub.f32 %v3183_v5, %v3657_v21  ;;  %v675_v2 = vsub.f32 %v3186_v6, %v3657_v21 }
  0xac   : > { %v371_v45 = vpop.xlane.xlu0 %370  ;;  %v929_v53 = vadd.f32 %v928_v0, %v800_v51  ;;  %v936_v4 = vsel %vm351_vm0, %v805_v19, 0.0  ;;  %v678_v61 = vsub.f32 %v3194_v10, %v3659_v41  ;;  %v679_v57 = vsub.f32 %v3197_v11, %v3659_v41 }
  0xad   : > { %v3671_v3 = vmul.f32 0.0051020407, %v371_v45  ;;  %v375_v25 = vpop.xlane.xlu1 %374  ;;  %v802_v59 = vmul.f32 %v674_v1, %v674_v1  ;;  %v803_v9 = vmul.f32 %v675_v2, %v675_v2  ;;  %v937_v49 = vadd.f32 %v936_v4, %v804_v7 }
  0xae   : > { %930 = vadd.xlane.f32.xlu0 %v929_v53  ;;  %v3673_v5 = vmul.f32 0.0051020407, %v375_v25  ;;  %v806_v6 = vmul.f32 %v678_v61, %v678_v61  ;;  %v807_v48 = vmul.f32 %v679_v57, %v679_v57 }
  0xaf   : > { %v932_v56 = vsel %vm351_vm0, %v803_v9, 0.0  ;;  %v680_v35 = vsub.f32 %v3211_v18, %v3671_v3  ;;  %v681_v10 = vsub.f32 %v3203_v14, %v3671_v3 }
  0xb0   : > { %v379_v11 = vpop.xlane.xlu0 %378  ;;  %v933_v51 = vadd.f32 %v932_v56, %v802_v59  ;;  %v940_v37 = vsel %vm351_vm0, %v807_v48, 0.0  ;;  %v682_v19 = vsub.f32 %v3216_v20, %v3673_v5  ;;  %v683_v7 = vsub.f32 %v3206_v15, %v3673_v5 }
  0xb1   : > { %v3685_v0 = vmul.f32 0.0051020407, %v379_v11  ;;  %v383_v1 = vpop.xlane.xlu1 %382  ;;  %v808_v2 = vmul.f32 %v680_v35, %v680_v35  ;;  %v809_v45 = vmul.f32 %v681_v10, %v681_v10  ;;  %v941_v14 = vadd.f32 %v940_v37, %v806_v6 }
  0xb2   : > { %938 = vadd.xlane.f32.xlu0 %v937_v49  ;;  %934 = vadd.xlane.f32.xlu1 %v933_v51  ;;  %v3687_v18 = vmul.f32 0.0051020407, %v383_v1  ;;  %v810_v53 = vmul.f32 %v682_v19, %v682_v19  ;;  %v811_v4 = vmul.f32 %v683_v7, %v683_v7 }
  0xb3   : > { %v944_v61 = vsel %vm351_vm0, %v809_v45, 0.0  ;;  %v684_v20 = vsub.f32 %v3229_v26, %v3685_v0  ;;  %v685_v15 = vsub.f32 %v3221_v22, %v3685_v0 }
  0xb4   : > { %v387_v57 = vpop.xlane.xlu0 %386  ;;  %v945_v25 = vadd.f32 %v944_v61, %v808_v2  ;;  %v948_v59 = vsel %vm351_vm0, %v811_v4, 0.0  ;;  %v686_v9 = vsub.f32 %v3234_v28, %v3687_v18  ;;  %v687_v49 = vsub.f32 %v3224_v23, %v3687_v18 }
  0xb5   : > { %v3699_v6 = vmul.f32 0.0051020407, %v387_v57  ;;  %v391_v48 = vpop.xlane.xlu1 %390  ;;  %v812_v56 = vmul.f32 %v684_v20, %v684_v20  ;;  %v813_v35 = vmul.f32 %v685_v15, %v685_v15  ;;  %v949_v22 = vadd.f32 %v948_v59, %v810_v53 }
  0xb6   : > { %942 = vadd.xlane.f32.xlu1 %v941_v14  ;;  %946 = vadd.xlane.f32.xlu0 %v945_v25  ;;  %v3701_v26 = vmul.f32 0.0051020407, %v391_v48  ;;  %v814_v10 = vmul.f32 %v686_v9, %v686_v9  ;;  %v815_v11 = vmul.f32 %v687_v49, %v687_v49 }
  0xb7   : > { %v952_v51 = vsel %vm351_vm0, %v813_v35, 0.0  ;;  %v688_v28 = vsub.f32 %v3247_v34, %v3699_v6  ;;  %v689_v23 = vsub.f32 %v3239_v30, %v3699_v6 }
  0xb8   : > { %v395_v37 = vpop.xlane.xlu0 %394  ;;  %v953_v19 = vadd.f32 %v952_v51, %v812_v56  ;;  %v956_v7 = vsel %vm351_vm0, %v815_v11, 0.0  ;;  %v690_v1 = vsub.f32 %v3252_v36, %v3701_v26  ;;  %v691_v2 = vsub.f32 %v3242_v31, %v3701_v26 }
  0xb9   : > { %v3713_v45 = vmul.f32 0.0051020407, %v395_v37  ;;  %v399_v14 = vpop.xlane.xlu1 %398  ;;  %v816_v53 = vmul.f32 %v688_v28, %v688_v28  ;;  %v817_v4 = vmul.f32 %v689_v23, %v689_v23  ;;  %v957_v30 = vadd.f32 %v956_v7, %v814_v10 }
  0xba   : > { %950 = vadd.xlane.f32.xlu1 %v949_v22  ;;  %954 = vadd.xlane.f32.xlu0 %v953_v19  ;;  %v3715_v34 = vmul.f32 0.0051020407, %v399_v14  ;;  %v818_v61 = vmul.f32 %v690_v1, %v690_v1  ;;  %v819_v20 = vmul.f32 %v691_v2, %v691_v2 }
  0xbb   : > { %v960_v15 = vsel %vm351_vm0, %v817_v4, 0.0  ;;  %v692_v36 = vsub.f32 %v3265_v42, %v3713_v45  ;;  %v693_v31 = vsub.f32 %v3257_v38, %v3713_v45 }
  0xbc   : > { %v403_v57 = vpop.xlane.xlu0 %402  ;;  %v961_v25 = vadd.f32 %v960_v15, %v816_v53  ;;  %v964_v59 = vsel %vm351_vm0, %v819_v20, 0.0  ;;  %v694_v9 = vsub.f32 %v3270_v44, %v3715_v34  ;;  %v695_v49 = vsub.f32 %v3260_v39, %v3715_v34 }
  0xbd   : > { %v3727_v48 = vmul.f32 0.0051020407, %v403_v57  ;;  %v407_v56 = vpop.xlane.xlu1 %406  ;;  %v820_v35 = vmul.f32 %v692_v36, %v692_v36  ;;  %v821_v22 = vmul.f32 %v693_v31, %v693_v31  ;;  %v965_v38 = vadd.f32 %v964_v59, %v818_v61 }
  0xbe   : > { %958 = vadd.xlane.f32.xlu1 %v957_v30  ;;  %962 = vadd.xlane.f32.xlu0 %v961_v25  ;;  %v3729_v42 = vmul.f32 0.0051020407, %v407_v56  ;;  %v822_v10 = vmul.f32 %v694_v9, %v694_v9  ;;  %v823_v11 = vmul.f32 %v695_v49, %v695_v49 }
  0xbf   : > { %v968_v51 = vsel %vm351_vm0, %v821_v22, 0.0  ;;  %v696_v44 = vsub.f32 %v3283_v50, %v3727_v48  ;;  %v697_v39 = vsub.f32 %v3275_v46, %v3727_v48 }
  0xc0   : > { %v411_v28 = vpop.xlane.xlu0 %410  ;;  %v969_v23 = vadd.f32 %v968_v51, %v820_v35  ;;  %v972_v37 = vsel %vm351_vm0, %v823_v11, 0.0  ;;  %v698_v19 = vsub.f32 %v3288_v52, %v3729_v42  ;;  %v699_v7 = vsub.f32 %v3278_v47, %v3729_v42 }
  0xc1   : > { %v3741_v1 = vmul.f32 0.0051020407, %v411_v28  ;;  %v415_v2 = vpop.xlane.xlu1 %414  ;;  %v824_v14 = vmul.f32 %v696_v44, %v696_v44  ;;  %v825_v53 = vmul.f32 %v697_v39, %v697_v39  ;;  %v973_v46 = vadd.f32 %v972_v37, %v822_v10 }
  0xc2   : > { %966 = vadd.xlane.f32.xlu1 %v965_v38  ;;  %970 = vadd.xlane.f32.xlu0 %v969_v23  ;;  %v3743_v50 = vmul.f32 0.0051020407, %v415_v2  ;;  %v826_v4 = vmul.f32 %v698_v19, %v698_v19  ;;  %v827_v30 = vmul.f32 %v699_v7, %v699_v7 }
  0xc3   : > { %v976_v61 = vsel %vm351_vm0, %v825_v53, 0.0  ;;  %v700_v52 = vsub.f32 %v3301_v58, %v3741_v1  ;;  %v701_v47 = vsub.f32 %v3293_v54, %v3741_v1 }
  0xc4   : > { %v419_v20 = vpop.xlane.xlu0 %418  ;;  %v977_v15 = vadd.f32 %v976_v61, %v824_v14  ;;  %v980_v36 = vsel %vm351_vm0, %v827_v30, 0.0  ;;  %v702_v31 = vsub.f32 %v3306_v60, %v3743_v50  ;;  %v703_v57 = vsub.f32 %v3296_v55, %v3743_v50 }
  0xc5   : > { %v3755_v25 = vmul.f32 0.0051020407, %v419_v20  ;;  %v423_v59 = vpop.xlane.xlu1 %422  ;;  %v828_v9 = vmul.f32 %v700_v52, %v700_v52  ;;  %v829_v49 = vmul.f32 %v701_v47, %v701_v47  ;;  %v981_v54 = vadd.f32 %v980_v36, %v826_v4 }
  0xc6   : > { %974 = vadd.xlane.f32.xlu1 %v973_v46  ;;  %978 = vadd.xlane.f32.xlu0 %v977_v15  ;;  %v3757_v58 = vmul.f32 0.0051020407, %v423_v59  ;;  %v830_v56 = vmul.f32 %v702_v31, %v702_v31  ;;  %v831_v35 = vmul.f32 %v703_v57, %v703_v57  ;;  %v3129_v57 = vmov 0  }
  0xc7   : > { %v984_v22 = vsel %vm351_vm0, %v829_v49, 0.0  ;;  %v704_v60 = vsub.f32 %v3319_v8, %v3755_v25  ;;  %v705_v55 = vsub.f32 %v3311_v62, %v3755_v25  ;;  %2830 = vset.pattern.permute.xlu0 %v3129_v57  ;;  %2831 = vset.pattern.permute.xlu1 %v3129_v57  ;;  %v5346_v57 = vld [vmem:[#allocation9_spill] sm:$0xff] }
  0xc8   : > { %v427_v38 = vpop.xlane.xlu0 %426  ;;  %v985_v10 = vadd.f32 %v984_v22, %v828_v9  ;;  %v988_v11 = vsel %vm351_vm0, %v831_v35, 0.0  ;;  %v706_v51 = vsub.f32 %v3324_v12, %v3757_v58  ;;  %v707_v44 = vsub.f32 %v3314_v63, %v3757_v58 }
  0xc9   : > { %v3769_v39 = vmul.f32 0.0051020407, %v427_v38  ;;  %v431_v28 = vpop.xlane.xlu1 %430  ;;  %v832_v23 = vmul.f32 %v704_v60, %v704_v60  ;;  %v833_v37 = vmul.f32 %v705_v55, %v705_v55  ;;  %v989_v62 = vadd.f32 %v988_v11, %v830_v56 }
  0xca   : > { %982 = vadd.xlane.f32.xlu1 %v981_v54  ;;  %986 = vadd.xlane.f32.xlu0 %v985_v10  ;;  %v3771_v8 = vmul.f32 0.0051020407, %v431_v28  ;;  %v834_v19 = vmul.f32 %v706_v51, %v706_v51  ;;  %v835_v7 = vmul.f32 %v707_v44, %v707_v44  ;;  %v5338_v51 = vld [vmem:[#allocation4_spill] sm:$0xff]  ;;  %v5339_v44 = vld [vmem:[#allocation2_spill] sm:$0xff] }
  0xcb   : > { %5335 = vst [vmem:[#allocation53_spill] sm:$0xff] %v3769_v39  ;;  %v992_v2 = vsel %vm351_vm0, %v833_v37, 0.0  ;;  %v708_v12 = vsub.f32 %v3337_v24, %v3769_v39  ;;  %v709_v63 = vsub.f32 %v3329_v16, %v3769_v39  ;;  %v1268_v39 = vld [vmem:[%s4099_s22 + $0xa0] sm:$0xff] }
  0xcc   : > { %v435_v14 = vpop.xlane.xlu0 %434  ;;  %v993_v53 = vadd.f32 %v992_v2, %v832_v23  ;;  %v996_v46 = vsel %vm351_vm0, %v835_v7, 0.0  ;;  %v710_v4 = vsub.f32 %v3342_v27, %v3771_v8  ;;  %v711_v30 = vsub.f32 %v3332_v17, %v3771_v8  ;;  %v5341_v7 = vld [vmem:[#allocation3_spill] sm:$0xff] }
  0xcd   : > { %v3783_v61 = vmul.f32 0.0051020407, %v435_v14  ;;  %v439_v52 = vpop.xlane.xlu1 %438  ;;  %v997_v47 = vadd.f32 %v996_v46, %v834_v19  ;;  %v836_v20 = vmul.f32 %v708_v12, %v708_v12  ;;  %v837_v15 = vmul.f32 %v709_v63, %v709_v63 }
  0xce   : > { %990 = vadd.xlane.f32.xlu1 %v989_v62  ;;  %994 = vadd.xlane.f32.xlu0 %v993_v53  ;;  %v3785_v24 = vmul.f32 0.0051020407, %v439_v52  ;;  %v838_v16 = vmul.f32 %v710_v4, %v710_v4  ;;  %v839_v36 = vmul.f32 %v711_v30, %v711_v30  ;;  %v5340_v62 = vld [vmem:[#allocation5_spill] sm:$0xff] }
  0xcf   : > { %5336 = vst [vmem:[#allocation54_spill] sm:$0xff] %v3783_v61  ;;  %v1000_v31 = vsel %vm351_vm0, %v837_v15, 0.0  ;;  %v712_v27 = vsub.f32 %v3355_v40, %v3783_v61  ;;  %v713_v17 = vsub.f32 %v3347_v32, %v3783_v61  ;;  %v1266_v61 = vld [vmem:[%s4099_s22 + $0x90] sm:$0xff] }
  0xd0   : > { %v443_v59 = vpop.xlane.xlu0 %442  ;;  %v1001_v9 = vadd.f32 %v1000_v31, %v836_v20  ;;  %v1004_v49 = vsel %vm351_vm0, %v839_v36, 0.0  ;;  %v714_v54 = vsub.f32 %v3360_v43, %v3785_v24  ;;  %v715_v56 = vsub.f32 %v3350_v33, %v3785_v24  ;;  %v5344_v20 = vld [vmem:[#allocation8_spill] sm:$0xff] }
  0xd1   : > { %v3797_v35 = vmul.f32 0.0051020407, %v443_v59  ;;  %v447_v22 = vpop.xlane.xlu1 %446  ;;  %v840_v40 = vmul.f32 %v712_v27, %v712_v27  ;;  %v841_v60 = vmul.f32 %v713_v17, %v713_v17  ;;  %v1005_v55 = vadd.f32 %v1004_v49, %v838_v16  ;;  %v5345_v16 = vld [vmem:[#allocation6_spill] sm:$0xff] }
  0xd2   : > { %998 = vadd.xlane.f32.xlu1 %v997_v47  ;;  %1002 = vadd.xlane.f32.xlu0 %v1001_v9  ;;  %v3799_v32 = vmul.f32 0.0051020407, %v447_v22  ;;  %v842_v38 = vmul.f32 %v714_v54, %v714_v54  ;;  %v843_v10 = vmul.f32 %v715_v56, %v715_v56  ;;  %v5347_v9 = vld [vmem:[#allocation7_spill] sm:$0xff] }
  0xd3   : > { %5337 = vst [vmem:[#allocation55_spill] sm:$0xff] %v3797_v35  ;;  %v1008_v11 = vsel %vm351_vm0, %v841_v60, 0.0  ;;  %v716_v43 = vsub.f32 %v5338_v51, %v3797_v35  ;;  %v717_v33 = vsub.f32 %v5339_v44, %v3797_v35  ;;  %v5350_v51 = vld [vmem:[#allocation12_spill] sm:$0xff]  ;;  %v5351_v44 = vld [vmem:[#allocation10_spill] sm:$0xff] }
  0xd4   : > { %v451_v28 = vpop.xlane.xlu0 %450  ;;  %v1009_v23 = vadd.f32 %v1008_v11, %v840_v40  ;;  %v1012_v37 = vsel %vm351_vm0, %v843_v10, 0.0  ;;  %v718_v19 = vsub.f32 %v5340_v62, %v3799_v32  ;;  %v719_v2 = vsub.f32 %v5341_v7, %v3799_v32  ;;  %v5352_v62 = vld [vmem:[#allocation13_spill] sm:$0xff]  ;;  %v5353_v7 = vld [vmem:[#allocation11_spill] sm:$0xff]  ;;  %v1264_v35 = vld [vmem:[%s4099_s22 + $0x80] sm:$0xff] }
  0xd5   : > { %v3811_v12 = vmul.f32 0.0051020407, %v451_v28  ;;  %v455_v63 = vpop.xlane.xlu1 %454  ;;  %v844_v14 = vmul.f32 %v716_v43, %v716_v43  ;;  %v845_v53 = vmul.f32 %v717_v33, %v717_v33  ;;  %v1013_v4 = vadd.f32 %v1012_v37, %v842_v38 }
  0xd6   : > { %1006 = vadd.xlane.f32.xlu1 %v1005_v55  ;;  %1010 = vadd.xlane.f32.xlu0 %v1009_v23  ;;  %v3813_v46 = vmul.f32 0.0051020407, %v455_v63  ;;  %v846_v30 = vmul.f32 %v718_v19, %v718_v19  ;;  %v847_v52 = vmul.f32 %v719_v2, %v719_v2 }
  0xd7   : > { %5342 = vst [vmem:[#allocation4_spill] sm:$0xff] %v3811_v12  ;;  %v1016_v47 = vsel %vm351_vm0, %v845_v53, 0.0  ;;  %v720_v15 = vsub.f32 %v5344_v20, %v3811_v12  ;;  %v721_v36 = vsub.f32 %v5345_v16, %v3811_v12  ;;  %v5356_v16 = vld [vmem:[#allocation16_spill] sm:$0xff] }
  0xd8   : > { %5343 = vst [vmem:[#allocation2_spill] sm:$0xff] %v3813_v46  ;;  %v459_v31 = vpop.xlane.xlu0 %458  ;;  %v1017_v27 = vadd.f32 %v1016_v47, %v844_v14  ;;  %v1020_v17 = vsel %vm351_vm0, %v847_v52, 0.0  ;;  %v722_v59 = vsub.f32 %v5346_v57, %v3813_v46  ;;  %v723_v49 = vsub.f32 %v5347_v9, %v3813_v46  ;;  %v5358_v9 = vld [vmem:[#allocation17_spill] sm:$0xff]  ;;  %v1262_v12 = vld [vmem:[%s4099_s22 + $0x70] sm:$0xff]  ;;  %v1277_v46 = vld [vmem:[%s4099_s22 + $0xe8] sm:$0xff] }
  0xd9   : > { %v3825_v54 = vmul.f32 0.0051020407, %v459_v31  ;;  %v463_v56 = vpop.xlane.xlu1 %462  ;;  %v848_v22 = vmul.f32 %v720_v15, %v720_v15  ;;  %v849_v40 = vmul.f32 %v721_v36, %v721_v36  ;;  %v1021_v55 = vadd.f32 %v1020_v17, %v846_v30  ;;  %v5357_v31 = vld [vmem:[#allocation14_spill] sm:$0xff] }
  0xda   : > { %1014 = vadd.xlane.f32.xlu1 %v1013_v4  ;;  %1018 = vadd.xlane.f32.xlu0 %v1017_v27  ;;  %v3827_v60 = vmul.f32 0.0051020407, %v463_v56  ;;  %v850_v38 = vmul.f32 %v722_v59, %v722_v59  ;;  %v851_v10 = vmul.f32 %v723_v49, %v723_v49  ;;  %v5359_v56 = vld [vmem:[#allocation15_spill] sm:$0xff] }
  0xdb   : > { %5348 = vst [vmem:[#allocation5_spill] sm:$0xff] %v3825_v54  ;;  %v1024_v11 = vsel %vm351_vm0, %v849_v40, 0.0  ;;  %v724_v43 = vsub.f32 %v5350_v51, %v3825_v54  ;;  %v725_v33 = vsub.f32 %v5351_v44, %v3825_v54  ;;  %v1260_v54 = vld [vmem:[%s4099_s22 + $0x60] sm:$0xff] }
  0xdc   : > { %5349 = vst [vmem:[#allocation3_spill] sm:$0xff] %v3827_v60  ;;  %v467_v28 = vpop.xlane.xlu0 %466  ;;  %v1025_v23 = vadd.f32 %v1024_v11, %v848_v22  ;;  %v1028_v37 = vsel %vm351_vm0, %v851_v10, 0.0  ;;  %v726_v19 = vsub.f32 %v5352_v62, %v3827_v60  ;;  %v727_v2 = vsub.f32 %v5353_v7, %v3827_v60  ;;  %v1275_v60 = vld [vmem:[%s4099_s22 + $0xd8] sm:$0xff] }
  0xdd   : > { %v3839_v63 = vmul.f32 0.0051020407, %v467_v28  ;;  %v471_v14 = vpop.xlane.xlu1 %470  ;;  %v852_v53 = vmul.f32 %v724_v43, %v724_v43  ;;  %v853_v4 = vmul.f32 %v725_v33, %v725_v33  ;;  %v1029_v52 = vadd.f32 %v1028_v37, %v850_v38  ;;  %v5362_v28 = vld [vmem:[#allocation20_spill] sm:$0xff]  ;;  %v5363_v37 = vld [vmem:[#allocation18_spill] sm:$0xff] }
  0xde   : > { %1022 = vadd.xlane.f32.xlu1 %v1021_v55  ;;  %1026 = vadd.xlane.f32.xlu0 %v1025_v23  ;;  %v3841_v30 = vmul.f32 0.0051020407, %v471_v14  ;;  %v854_v47 = vmul.f32 %v726_v19, %v726_v19  ;;  %v855_v20 = vmul.f32 %v727_v2, %v727_v2  ;;  %v5364_v14 = vld [vmem:[#allocation21_spill] sm:$0xff] }
  0xdf   : > { %5354 = vst [vmem:[#allocation8_spill] sm:$0xff] %v3839_v63  ;;  %v1032_v15 = vsel %vm351_vm0, %v853_v4, 0.0  ;;  %v728_v36 = vsub.f32 %v5356_v16, %v3839_v63  ;;  %v729_v27 = vsub.f32 %v5357_v31, %v3839_v63  ;;  %v5365_v4 = vld [vmem:[#allocation19_spill] sm:$0xff]  ;;  %v1258_v63 = vld [vmem:[%s4099_s22 + $0x50] sm:$0xff] }
  0xe0   : > { %5355 = vst [vmem:[#allocation6_spill] sm:$0xff] %v3841_v30  ;;  %v475_v17 = vpop.xlane.xlu0 %474  ;;  %v1033_v57 = vadd.f32 %v1032_v15, %v852_v53  ;;  %v1036_v59 = vsel %vm351_vm0, %v855_v20, 0.0  ;;  %v730_v49 = vsub.f32 %v5358_v9, %v3841_v30  ;;  %v731_v22 = vsub.f32 %v5359_v56, %v3841_v30  ;;  %v1273_v30 = vld [vmem:[%s4099_s22 + $0xc8] sm:$0xff] }
  0xe1   : > { %v3853_v40 = vmul.f32 0.0051020407, %v475_v17  ;;  %v479_v55 = vpop.xlane.xlu1 %478  ;;  %v856_v38 = vmul.f32 %v728_v36, %v728_v36  ;;  %v857_v10 = vmul.f32 %v729_v27, %v729_v27  ;;  %v1037_v51 = vadd.f32 %v1036_v59, %v854_v47  ;;  %v5368_v59 = vld [vmem:[#allocation24_spill] sm:$0xff] }
  0xe2   : > { %1030 = vadd.xlane.f32.xlu1 %v1029_v52  ;;  %1034 = vadd.xlane.f32.xlu0 %v1033_v57  ;;  %v3855_v11 = vmul.f32 0.0051020407, %v479_v55  ;;  %v858_v43 = vmul.f32 %v730_v49, %v730_v49  ;;  %v859_v44 = vmul.f32 %v731_v22, %v731_v22  ;;  %v5369_v49 = vld [vmem:[#allocation22_spill] sm:$0xff] }
  0xe3   : > { %5360 = vst [vmem:[#allocation9_spill] sm:$0xff] %v3853_v40  ;;  %v1040_v33 = vsel %vm351_vm0, %v857_v10, 0.0  ;;  %v732_v23 = vsub.f32 %v5362_v28, %v3853_v40  ;;  %v733_v62 = vsub.f32 %v5363_v37, %v3853_v40  ;;  %v5370_v10 = vld [vmem:[#allocation25_spill] sm:$0xff]  ;;  %v1256_v40 = vld [vmem:[%s4099_s22 + $0x40] sm:$0xff] }
  0xe4   : > { %5361 = vst [vmem:[#allocation7_spill] sm:$0xff] %v3855_v11  ;;  %v483_v19 = vpop.xlane.xlu0 %482  ;;  %v1041_v7 = vadd.f32 %v1040_v33, %v856_v38  ;;  %v1044_v2 = vsel %vm351_vm0, %v859_v44, 0.0  ;;  %v734_v53 = vsub.f32 %v5364_v14, %v3855_v11  ;;  %v735_v52 = vsub.f32 %v5365_v4, %v3855_v11  ;;  %v5371_v44 = vld [vmem:[#allocation23_spill] sm:$0xff]  ;;  %v5374_v14 = vld [vmem:[#allocation28_spill] sm:$0xff]  ;;  %v5375_v4 = vld [vmem:[#allocation26_spill] sm:$0xff] }
  0xe5   : > { %v3867_v47 = vmul.f32 0.0051020407, %v483_v19  ;;  %v487_v20 = vpop.xlane.xlu1 %486  ;;  %v860_v15 = vmul.f32 %v732_v23, %v732_v23  ;;  %v861_v16 = vmul.f32 %v733_v62, %v733_v62  ;;  %v1045_v31 = vadd.f32 %v1044_v2, %v858_v43  ;;  %v1271_v11 = vld [vmem:[%s4099_s22 + $0xb8] sm:$0xff] }
  0xe6   : > { %1038 = vadd.xlane.f32.xlu1 %v1037_v51  ;;  %1042 = vadd.xlane.f32.xlu0 %v1041_v7  ;;  %v3869_v36 = vmul.f32 0.0051020407, %v487_v20  ;;  %v862_v27 = vmul.f32 %v734_v53, %v734_v53  ;;  %v863_v17 = vmul.f32 %v735_v52, %v735_v52 }
  0xe7   : > { %5366 = vst [vmem:[#allocation12_spill] sm:$0xff] %v3867_v47  ;;  %v1048_v57 = vsel %vm351_vm0, %v861_v16, 0.0  ;;  %v736_v9 = vsub.f32 %v5368_v59, %v3867_v47  ;;  %v737_v56 = vsub.f32 %v5369_v49, %v3867_v47  ;;  %v1255_v47 = vld [vmem:[%s4099_s22 + $0x38] sm:$0xff] }
  0xe8   : > { %5367 = vst [vmem:[#allocation10_spill] sm:$0xff] %v3869_v36  ;;  %v491_v22 = vpop.xlane.xlu0 %490  ;;  %v1049_v55 = vadd.f32 %v1048_v57, %v860_v15  ;;  %v1052_v38 = vsel %vm351_vm0, %v863_v17, 0.0  ;;  %v738_v51 = vsub.f32 %v5370_v10, %v3869_v36  ;;  %v739_v43 = vsub.f32 %v5371_v44, %v3869_v36  ;;  %v5376_v15 = vld [vmem:[#allocation29_spill] sm:$0xff]  ;;  %v5377_v17 = vld [vmem:[#allocation27_spill] sm:$0xff]  ;;  %v5380_v44 = vld [vmem:[#allocation32_spill] sm:$0xff] }
  0xe9   : > { %v3881_v33 = vmul.f32 0.0051020407, %v491_v22  ;;  %v495_v28 = vpop.xlane.xlu1 %494  ;;  %v864_v23 = vmul.f32 %v736_v9, %v736_v9  ;;  %v865_v37 = vmul.f32 %v737_v56, %v737_v56  ;;  %v1053_v19 = vadd.f32 %v1052_v38, %v862_v27  ;;  %v1269_v36 = vld [vmem:[%s4099_s22 + $0xa8] sm:$0xff] }
  0xea   : > { %1046 = vadd.xlane.f32.xlu1 %v1045_v31  ;;  %1050 = vadd.xlane.f32.xlu0 %v1049_v55  ;;  %v3883_v62 = vmul.f32 0.0051020407, %v495_v28  ;;  %v866_v7 = vmul.f32 %v738_v51, %v738_v51  ;;  %v867_v2 = vmul.f32 %v739_v43, %v739_v43  ;;  %v5381_v28 = vld [vmem:[#allocation30_spill] sm:$0xff] }
  0xeb   : > { %5372 = vst [vmem:[#allocation13_spill] sm:$0xff] %v3881_v33  ;;  %v740_v53 = vsub.f32 %v5374_v14, %v3881_v33  ;;  %v741_v52 = vsub.f32 %v5375_v4, %v3881_v33  ;;  %v1056_v20 = vsel %vm351_vm0, %v865_v37, 0.0  ;;  %v1254_v33 = vld [vmem:[%s4099_s22 + $0x30] sm:$0xff] }
  0xec   : > { %5373 = vst [vmem:[#allocation11_spill] sm:$0xff] %v3883_v62  ;;  %v742_v16 = vsub.f32 %v5376_v15, %v3883_v62  ;;  %v743_v31 = vsub.f32 %v5377_v17, %v3883_v62  ;;  %v499_v57 = vpop.xlane.xlu0 %498  ;;  %v1057_v59 = vadd.f32 %v1056_v20, %v864_v23  ;;  %v1060_v27 = vsel %vm351_vm0, %v867_v2, 0.0  ;;  %v5382_v2 = vld [vmem:[#allocation33_spill] sm:$0xff] }
  0xed   : > { %v869_v9 = vmul.f32 %v741_v52, %v741_v52  ;;  %v3895_v49 = vmul.f32 0.0051020407, %v499_v57  ;;  %v503_v56 = vpop.xlane.xlu1 %502  ;;  %v868_v22 = vmul.f32 %v740_v53, %v740_v53  ;;  %v1061_v10 = vadd.f32 %v1060_v27, %v866_v7  ;;  %v5383_v53 = vld [vmem:[#allocation31_spill] sm:$0xff]  ;;  %v1267_v62 = vld [vmem:[%s4099_s22 + $0x98] sm:$0xff] }
  0xee   : > { %v871_v55 = vmul.f32 %v743_v31, %v743_v31  ;;  %1054 = vadd.xlane.f32.xlu1 %v1053_v19  ;;  %1058 = vadd.xlane.f32.xlu0 %v1057_v59  ;;  %v3897_v38 = vmul.f32 0.0051020407, %v503_v56  ;;  %v870_v51 = vmul.f32 %v742_v16, %v742_v16 }
  0xef   : > { %5378 = vst [vmem:[#allocation16_spill] sm:$0xff] %v3895_v49  ;;  %v744_v43 = vsub.f32 %v5380_v44, %v3895_v49  ;;  %v745_v23 = vsub.f32 %v5381_v28, %v3895_v49  ;;  %v1064_v37 = vsel %vm351_vm0, %v869_v9, 0.0  ;;  %v5386_v9 = vld [vmem:[#allocation36_spill] sm:$0xff]  ;;  %v5387_v44 = vld [vmem:[#allocation34_spill] sm:$0xff]  ;;  %v5388_v28 = vld [vmem:[#allocation37_spill] sm:$0xff] }
  0xf0   : > { %5379 = vst [vmem:[#allocation14_spill] sm:$0xff] %v3897_v38  ;;  %v746_v14 = vsub.f32 %v5382_v2, %v3897_v38  ;;  %v747_v4 = vsub.f32 %v5383_v53, %v3897_v38  ;;  %v507_v19 = vpop.xlane.xlu0 %506  ;;  %v1065_v52 = vadd.f32 %v1064_v37, %v868_v22  ;;  %v1068_v20 = vsel %vm351_vm0, %v871_v55, 0.0  ;;  %v1253_v49 = vld [vmem:[%s4099_s22 + $0x28] sm:$0xff] }
  0xf1   : > { %v873_v7 = vmul.f32 %v745_v23, %v745_v23  ;;  %v3909_v15 = vmul.f32 0.0051020407, %v507_v19  ;;  %v511_v16 = vpop.xlane.xlu1 %510  ;;  %v872_v17 = vmul.f32 %v744_v43, %v744_v43  ;;  %v1069_v59 = vadd.f32 %v1068_v20, %v870_v51  ;;  %v5389_v43 = vld [vmem:[#allocation35_spill] sm:$0xff] }
  0xf2   : > { %v875_v31 = vmul.f32 %v747_v4, %v747_v4  ;;  %1062 = vadd.xlane.f32.xlu1 %v1061_v10  ;;  %1066 = vadd.xlane.f32.xlu0 %v1065_v52  ;;  %v3911_v57 = vmul.f32 0.0051020407, %v511_v16  ;;  %v874_v27 = vmul.f32 %v746_v14, %v746_v14  ;;  %v1265_v38 = vld [vmem:[%s4099_s22 + $0x88] sm:$0xff] }
  0xf3   : > { %5384 = vst [vmem:[#allocation17_spill] sm:$0xff] %v3909_v15  ;;  %v748_v56 = vsub.f32 %v5386_v9, %v3909_v15  ;;  %v749_v22 = vsub.f32 %v5387_v44, %v3909_v15  ;;  %v1072_v55 = vsel %vm351_vm0, %v873_v7, 0.0  ;;  %v5392_v9 = vld [vmem:[#allocation40_spill] sm:$0xff] }
  0xf4   : > { %5385 = vst [vmem:[#allocation15_spill] sm:$0xff] %v3911_v57  ;;  %v750_v23 = vsub.f32 %v5388_v28, %v3911_v57  ;;  %v751_v37 = vsub.f32 %v5389_v43, %v3911_v57  ;;  %v515_v10 = vpop.xlane.xlu0 %514  ;;  %v1073_v2 = vadd.f32 %v1072_v55, %v872_v17  ;;  %v1076_v53 = vsel %vm351_vm0, %v875_v31, 0.0  ;;  %v5393_v28 = vld [vmem:[#allocation38_spill] sm:$0xff]  ;;  %v1263_v57 = vld [vmem:[%s4099_s22 + $0x78] sm:$0xff] }
  0xf5   : > { %v877_v51 = vmul.f32 %v749_v22, %v749_v22  ;;  %v3923_v14 = vmul.f32 0.0051020407, %v515_v10  ;;  %v519_v4 = vpop.xlane.xlu1 %518  ;;  %v876_v19 = vmul.f32 %v748_v56, %v748_v56  ;;  %v1077_v7 = vadd.f32 %v1076_v53, %v874_v27  ;;  %v5394_v22 = vld [vmem:[#allocation41_spill] sm:$0xff]  ;;  %v5395_v56 = vld [vmem:[#allocation39_spill] sm:$0xff] }
  0xf6   : > { %v879_v52 = vmul.f32 %v751_v37, %v751_v37  ;;  %1070 = vadd.xlane.f32.xlu1 %v1069_v59  ;;  %1074 = vadd.xlane.f32.xlu0 %v1073_v2  ;;  %v3925_v20 = vmul.f32 0.0051020407, %v519_v4  ;;  %v878_v16 = vmul.f32 %v750_v23, %v750_v23 }
  0xf7   : > { %5390 = vst [vmem:[#allocation20_spill] sm:$0xff] %v3923_v14  ;;  %v752_v44 = vsub.f32 %v5392_v9, %v3923_v14  ;;  %v753_v17 = vsub.f32 %v5393_v28, %v3923_v14  ;;  %v1080_v31 = vsel %vm351_vm0, %v877_v51, 0.0 }
  0xf8   : > { %5391 = vst [vmem:[#allocation18_spill] sm:$0xff] %v3925_v20  ;;  %v754_v55 = vsub.f32 %v5394_v22, %v3925_v20  ;;  %v755_v43 = vsub.f32 %v5395_v56, %v3925_v20  ;;  %v523_v59 = vpop.xlane.xlu0 %522  ;;  %v1081_v37 = vadd.f32 %v1080_v31, %v876_v19  ;;  %v1084_v10 = vsel %vm351_vm0, %v879_v52, 0.0  ;;  %v5398_v22 = vld [vmem:[#allocation44_spill] sm:$0xff]  ;;  %v5399_v56 = vld [vmem:[#allocation42_spill] sm:$0xff]  ;;  %v1261_v20 = vld [vmem:[%s4099_s22 + $0x68] sm:$0xff] }
  0xf9   : > { %v881_v27 = vmul.f32 %v753_v17, %v753_v17  ;;  %v3937_v23 = vmul.f32 0.0051020407, %v523_v59  ;;  %v527_v2 = vpop.xlane.xlu1 %526  ;;  %v880_v53 = vmul.f32 %v752_v44, %v752_v44  ;;  %v1085_v51 = vadd.f32 %v1084_v10, %v878_v16  ;;  %v5400_v17 = vld [vmem:[#allocation45_spill] sm:$0xff]  ;;  %v5401_v44 = vld [vmem:[#allocation43_spill] sm:$0xff] }
  0xfa   : > { %v883_v4 = vmul.f32 %v755_v43, %v755_v43  ;;  %1078 = vadd.xlane.f32.xlu1 %v1077_v7  ;;  %1082 = vadd.xlane.f32.xlu0 %v1081_v37  ;;  %v3939_v9 = vmul.f32 0.0051020407, %v527_v2  ;;  %v882_v28 = vmul.f32 %v754_v55, %v754_v55 }
  0xfb   : > { %5396 = vst [vmem:[#allocation21_spill] sm:$0xff] %v3937_v23  ;;  %v756_v14 = vsub.f32 %v5398_v22, %v3937_v23  ;;  %v757_v19 = vsub.f32 %v5399_v56, %v3937_v23  ;;  %v1088_v52 = vsel %vm351_vm0, %v881_v27, 0.0 }
  0xfc   : > { %5397 = vst [vmem:[#allocation19_spill] sm:$0xff] %v3939_v9  ;;  %v758_v31 = vsub.f32 %v5400_v17, %v3939_v9  ;;  %v759_v43 = vsub.f32 %v5401_v44, %v3939_v9  ;;  %v531_v7 = vpop.xlane.xlu0 %530  ;;  %v1089_v59 = vadd.f32 %v1088_v52, %v880_v53  ;;  %v1092_v37 = vsel %vm351_vm0, %v883_v4, 0.0  ;;  %v5404_v17 = vld [vmem:[#allocation48_spill] sm:$0xff]  ;;  %v5405_v44 = vld [vmem:[#allocation46_spill] sm:$0xff] }
  0xfd   : > { %v885_v16 = vmul.f32 %v757_v19, %v757_v19  ;;  %v3951_v55 = vmul.f32 0.0051020407, %v531_v7  ;;  %v535_v10 = vpop.xlane.xlu1 %534  ;;  %v884_v2 = vmul.f32 %v756_v14, %v756_v14  ;;  %v1093_v27 = vadd.f32 %v1092_v37, %v882_v28  ;;  %v5406_v19 = vld [vmem:[#allocation49_spill] sm:$0xff]  ;;  %v5407_v14 = vld [vmem:[#allocation47_spill] sm:$0xff] }
  0xfe   : > { %v887_v22 = vmul.f32 %v759_v43, %v759_v43  ;;  %1086 = vadd.xlane.f32.xlu1 %v1085_v51  ;;  %1090 = vadd.xlane.f32.xlu0 %v1089_v59  ;;  %v3953_v56 = vmul.f32 0.0051020407, %v535_v10  ;;  %v886_v23 = vmul.f32 %v758_v31, %v758_v31 }
  0xff   : > { %5402 = vst [vmem:[#allocation24_spill] sm:$0xff] %v3951_v55  ;;  %v760_v15 = vsub.f32 %v5404_v17, %v3951_v55  ;;  %v761_v53 = vsub.f32 %v5405_v44, %v3951_v55  ;;  %v1096_v4 = vsel %vm351_vm0, %v885_v16, 0.0  ;;  %v5410_v55 = vld [vmem:[#allocation51_spill] sm:$0xff] }
 0x100   : > { %5403 = vst [vmem:[#allocation22_spill] sm:$0xff] %v3953_v56  ;;  %v762_v52 = vsub.f32 %v5406_v19, %v3953_v56  ;;  %v763_v43 = vsub.f32 %v5407_v14, %v3953_v56  ;;  %v539_v51 = vpop.xlane.xlu0 %538  ;;  %v1097_v7 = vadd.f32 %v1096_v4, %v884_v2  ;;  %v1100_v28 = vsel %vm351_vm0, %v887_v22, 0.0  ;;  %v5411_v2 = vld [vmem:[#allocation50_spill] sm:$0xff]  ;;  %v2992_v56 = vld [vmem:[%s3166_s18 + $0x3f8] sm:$0xff] }
 0x101   : > { %v889_v31 = vmul.f32 %v761_v53, %v761_v53  ;;  %v3965_v59 = vmul.f32 0.0051020407, %v539_v51  ;;  %v543_v37 = vpop.xlane.xlu1 %542  ;;  %v888_v10 = vmul.f32 %v760_v15, %v760_v15  ;;  %v1101_v44 = vadd.f32 %v1100_v28, %v886_v23  ;;  %v5412_v53 = vld [vmem:[#allocation52_spill] sm:$0xff]  ;;  %v2960_v15 = vld [vmem:[%s3166_s18 + $0x2f8] sm:$0xff] }
 0x102   : > { %v891_v17 = vmul.f32 %v763_v43, %v763_v43  ;;  %1094 = vadd.xlane.f32.xlu1 %v1093_v27  ;;  %1098 = vadd.xlane.f32.xlu0 %v1097_v7  ;;  %v3967_v16 = vmul.f32 0.0051020407, %v543_v37  ;;  %v890_v19 = vmul.f32 %v762_v52, %v762_v52 }
 0x103   : > { %5408 = vst [vmem:[#allocation25_spill] sm:$0xff] %v3965_v59  ;;  %v764_v14 = vsub.f32 %v5410_v55, %v3965_v59  ;;  %v765_v4 = vsub.f32 %v5411_v2, %v3965_v59  ;;  %v1104_v22 = vsel %vm351_vm0, %v889_v31, 0.0 }
 0x104   : > { %5409 = vst [vmem:[#allocation23_spill] sm:$0xff] %v3967_v16  ;;  %v766_v51 = vsub.f32 %v5412_v53, %v3967_v16  ;;  %v767_v27 = vsub.f32 %v2960_v15, %v3967_v16  ;;  %v547_v43 = vpop.xlane.xlu0 %546  ;;  %v1105_v7 = vadd.f32 %v1104_v22, %v888_v10  ;;  %v1108_v23 = vsel %vm351_vm0, %v891_v17, 0.0  ;;  %v2961_v15 = vld [vmem:[%s3166_s18 + $0x300] sm:$0xff]  ;;  %v2962_v10 = vld [vmem:[%s3166_s18 + $0x308] sm:$0xff]  ;;  %v2963_v22 = vld [vmem:[%s3166_s18 + $0x310] sm:$0xff] }
 0x105   : > { %v893_v52 = vmul.f32 %v765_v4, %v765_v4  ;;  %v3979_v55 = vmul.f32 0.0051020407, %v547_v43  ;;  %v551_v28 = vpop.xlane.xlu1 %550  ;;  %v892_v37 = vmul.f32 %v764_v14, %v764_v14  ;;  %v1109_v53 = vadd.f32 %v1108_v23, %v890_v19  ;;  %v2964_v14 = vld [vmem:[%s3166_s18 + $0x318] sm:$0xff] }
 0x106   : > { %v895_v31 = vmul.f32 %v767_v27, %v767_v27  ;;  %1102 = vadd.xlane.f32.xlu1 %v1101_v44  ;;  %1106 = vadd.xlane.f32.xlu0 %v1105_v7  ;;  %v3981_v2 = vmul.f32 0.0051020407, %v551_v28  ;;  %v894_v59 = vmul.f32 %v766_v51, %v766_v51 }
 0x107   : > { %5413 = vst [vmem:[#allocation28_spill] sm:$0xff] %v3979_v55  ;;  %v768_v16 = vsub.f32 %v2961_v15, %v3979_v55  ;;  %v769_v17 = vsub.f32 %v2962_v10, %v3979_v55  ;;  %v1112_v4 = vsel %vm351_vm0, %v893_v52, 0.0 }
 0x108   : > { %5414 = vst [vmem:[#allocation26_spill] sm:$0xff] %v3981_v2  ;;  %v770_v43 = vsub.f32 %v2963_v22, %v3981_v2  ;;  %v771_v44 = vsub.f32 %v2964_v14, %v3981_v2  ;;  %v555_v27 = vpop.xlane.xlu0 %554  ;;  %v1113_v7 = vadd.f32 %v1112_v4, %v892_v37  ;;  %v1116_v19 = vsel %vm351_vm0, %v895_v31, 0.0  ;;  %v2965_v14 = vld [vmem:[%s3166_s18 + $0x320] sm:$0xff]  ;;  %v2966_v37 = vld [vmem:[%s3166_s18 + $0x328] sm:$0xff]  ;;  %v2967_v4 = vld [vmem:[%s3166_s18 + $0x330] sm:$0xff] }
 0x109   : > { %v897_v51 = vmul.f32 %v769_v17, %v769_v17  ;;  %v3993_v23 = vmul.f32 0.0051020407, %v555_v27  ;;  %v559_v28 = vpop.xlane.xlu1 %558  ;;  %v896_v15 = vmul.f32 %v768_v16, %v768_v16  ;;  %v1117_v22 = vadd.f32 %v1116_v19, %v894_v59  ;;  %v2968_v16 = vld [vmem:[%s3166_s18 + $0x338] sm:$0xff] }
 0x10a   : > { %v899_v52 = vmul.f32 %v771_v44, %v771_v44  ;;  %1110 = vadd.xlane.f32.xlu1 %v1109_v53  ;;  %1114 = vadd.xlane.f32.xlu0 %v1113_v7  ;;  %v3995_v10 = vmul.f32 0.0051020407, %v559_v28  ;;  %v898_v55 = vmul.f32 %v770_v43, %v770_v43 }
 0x10b   : > { %5415 = vst [vmem:[#allocation29_spill] sm:$0xff] %v3993_v23  ;;  %v772_v2 = vsub.f32 %v2965_v14, %v3993_v23  ;;  %v773_v31 = vsub.f32 %v2966_v37, %v3993_v23  ;;  %v1120_v17 = vsel %vm351_vm0, %v897_v51, 0.0 }
 0x10c   : > { %5416 = vst [vmem:[#allocation27_spill] sm:$0xff] %v3995_v10  ;;  %v774_v27 = vsub.f32 %v2967_v4, %v3995_v10  ;;  %v775_v53 = vsub.f32 %v2968_v16, %v3995_v10  ;;  %v563_v44 = vpop.xlane.xlu0 %562  ;;  %v1121_v7 = vadd.f32 %v1120_v17, %v896_v15  ;;  %v1124_v59 = vsel %vm351_vm0, %v899_v52, 0.0  ;;  %v2969_v16 = vld [vmem:[%s3166_s18 + $0x340] sm:$0xff]  ;;  %v2970_v15 = vld [vmem:[%s3166_s18 + $0x348] sm:$0xff]  ;;  %v2971_v17 = vld [vmem:[%s3166_s18 + $0x350] sm:$0xff] }
 0x10d   : > { %v901_v43 = vmul.f32 %v773_v31, %v773_v31  ;;  %v4007_v19 = vmul.f32 0.0051020407, %v563_v44  ;;  %v567_v28 = vpop.xlane.xlu1 %566  ;;  %v900_v14 = vmul.f32 %v772_v2, %v772_v2  ;;  %v1125_v4 = vadd.f32 %v1124_v59, %v898_v55  ;;  %v2972_v2 = vld [vmem:[%s3166_s18 + $0x358] sm:$0xff] }
 0x10e   : > { %v903_v51 = vmul.f32 %v775_v53, %v775_v53  ;;  %1118 = vadd.xlane.f32.xlu1 %v1117_v22  ;;  %1122 = vadd.xlane.f32.xlu0 %v1121_v7  ;;  %v4009_v37 = vmul.f32 0.0051020407, %v567_v28  ;;  %v902_v23 = vmul.f32 %v774_v27, %v774_v27 }
 0x10f   : > { %5417 = vst [vmem:[#allocation32_spill] sm:$0xff] %v4007_v19  ;;  %v776_v10 = vsub.f32 %v2969_v16, %v4007_v19  ;;  %v777_v52 = vsub.f32 %v2970_v15, %v4007_v19  ;;  %v1128_v31 = vsel %vm351_vm0, %v901_v43, 0.0 }
 0x110   : > { %5418 = vst [vmem:[#allocation30_spill] sm:$0xff] %v4009_v37  ;;  %v778_v44 = vsub.f32 %v2971_v17, %v4009_v37  ;;  %v779_v22 = vsub.f32 %v2972_v2, %v4009_v37  ;;  %v571_v53 = vpop.xlane.xlu0 %570  ;;  %v1129_v7 = vadd.f32 %v1128_v31, %v900_v14  ;;  %v1132_v55 = vsel %vm351_vm0, %v903_v51, 0.0  ;;  %v2973_v2 = vld [vmem:[%s3166_s18 + $0x360] sm:$0xff]  ;;  %v2974_v14 = vld [vmem:[%s3166_s18 + $0x368] sm:$0xff]  ;;  %v2975_v31 = vld [vmem:[%s3166_s18 + $0x370] sm:$0xff] }
 0x111   : > { %v905_v27 = vmul.f32 %v777_v52, %v777_v52  ;;  %v4021_v59 = vmul.f32 0.0051020407, %v571_v53  ;;  %v575_v28 = vpop.xlane.xlu1 %574  ;;  %v904_v16 = vmul.f32 %v776_v10, %v776_v10  ;;  %v1133_v17 = vadd.f32 %v1132_v55, %v902_v23  ;;  %v2976_v10 = vld [vmem:[%s3166_s18 + $0x378] sm:$0xff] }
 0x112   : > { %v907_v43 = vmul.f32 %v779_v22, %v779_v22  ;;  %1126 = vadd.xlane.f32.xlu1 %v1125_v4  ;;  %1130 = vadd.xlane.f32.xlu0 %v1129_v7  ;;  %v4023_v15 = vmul.f32 0.0051020407, %v575_v28  ;;  %v906_v19 = vmul.f32 %v778_v44, %v778_v44 }
 0x113   : > { %5419 = vst [vmem:[#allocation33_spill] sm:$0xff] %v4021_v59  ;;  %v780_v37 = vsub.f32 %v2973_v2, %v4021_v59  ;;  %v781_v51 = vsub.f32 %v2974_v14, %v4021_v59  ;;  %v1136_v52 = vsel %vm351_vm0, %v905_v27, 0.0 }
 0x114   : > { %5420 = vst [vmem:[#allocation31_spill] sm:$0xff] %v4023_v15  ;;  %v782_v53 = vsub.f32 %v2975_v31, %v4023_v15  ;;  %v783_v4 = vsub.f32 %v2976_v10, %v4023_v15  ;;  %v579_v22 = vpop.xlane.xlu0 %578  ;;  %v1137_v7 = vadd.f32 %v1136_v52, %v904_v16  ;;  %v1140_v23 = vsel %vm351_vm0, %v907_v43, 0.0  ;;  %v2977_v10 = vld [vmem:[%s3166_s18 + $0x380] sm:$0xff]  ;;  %v2978_v16 = vld [vmem:[%s3166_s18 + $0x388] sm:$0xff]  ;;  %v2979_v52 = vld [vmem:[%s3166_s18 + $0x390] sm:$0xff] }
 0x115   : > { %v909_v44 = vmul.f32 %v781_v51, %v781_v51  ;;  %v4035_v55 = vmul.f32 0.0051020407, %v579_v22  ;;  %v583_v28 = vpop.xlane.xlu1 %582  ;;  %v908_v2 = vmul.f32 %v780_v37, %v780_v37  ;;  %v1141_v31 = vadd.f32 %v1140_v23, %v906_v19  ;;  %v2980_v37 = vld [vmem:[%s3166_s18 + $0x398] sm:$0xff] }
 0x116   : > { %v911_v27 = vmul.f32 %v783_v4, %v783_v4  ;;  %1134 = vadd.xlane.f32.xlu1 %v1133_v17  ;;  %1138 = vadd.xlane.f32.xlu0 %v1137_v7  ;;  %v4037_v14 = vmul.f32 0.0051020407, %v583_v28  ;;  %v910_v59 = vmul.f32 %v782_v53, %v782_v53 }
 0x117   : > { %5421 = vst [vmem:[#allocation36_spill] sm:$0xff] %v4035_v55  ;;  %v784_v15 = vsub.f32 %v2977_v10, %v4035_v55  ;;  %v785_v43 = vsub.f32 %v2978_v16, %v4035_v55  ;;  %v1144_v51 = vsel %vm351_vm0, %v909_v44, 0.0 }
 0x118   : > { %5422 = vst [vmem:[#allocation34_spill] sm:$0xff] %v4037_v14  ;;  %v786_v22 = vsub.f32 %v2979_v52, %v4037_v14  ;;  %v787_v17 = vsub.f32 %v2980_v37, %v4037_v14  ;;  %v587_v4 = vpop.xlane.xlu0 %586  ;;  %v1145_v7 = vadd.f32 %v1144_v51, %v908_v2  ;;  %v1148_v19 = vsel %vm351_vm0, %v911_v27, 0.0  ;;  %v2981_v37 = vld [vmem:[%s3166_s18 + $0x3a0] sm:$0xff]  ;;  %v2982_v2 = vld [vmem:[%s3166_s18 + $0x3a8] sm:$0xff]  ;;  %v2983_v51 = vld [vmem:[%s3166_s18 + $0x3b0] sm:$0xff] }
 0x119   : > { %v913_v53 = vmul.f32 %v785_v43, %v785_v43  ;;  %v4049_v23 = vmul.f32 0.0051020407, %v587_v4  ;;  %v591_v28 = vpop.xlane.xlu1 %590  ;;  %v912_v10 = vmul.f32 %v784_v15, %v784_v15  ;;  %v1149_v52 = vadd.f32 %v1148_v19, %v910_v59  ;;  %v2984_v15 = vld [vmem:[%s3166_s18 + $0x3b8] sm:$0xff] }
 0x11a   : > { %v915_v44 = vmul.f32 %v787_v17, %v787_v17  ;;  %1142 = vadd.xlane.f32.xlu1 %v1141_v31  ;;  %1146 = vadd.xlane.f32.xlu0 %v1145_v7  ;;  %v4051_v16 = vmul.f32 0.0051020407, %v591_v28  ;;  %v914_v55 = vmul.f32 %v786_v22, %v786_v22 }
 0x11b   : > { %5423 = vst [vmem:[#allocation37_spill] sm:$0xff] %v4049_v23  ;;  %v788_v14 = vsub.f32 %v2981_v37, %v4049_v23  ;;  %v789_v27 = vsub.f32 %v2982_v2, %v4049_v23  ;;  %v1152_v43 = vsel %vm351_vm0, %v913_v53, 0.0 }
 0x11c   : > { %5424 = vst [vmem:[#allocation35_spill] sm:$0xff] %v4051_v16  ;;  %v790_v4 = vsub.f32 %v2983_v51, %v4051_v16  ;;  %v791_v31 = vsub.f32 %v2984_v15, %v4051_v16  ;;  %v595_v17 = vpop.xlane.xlu0 %594  ;;  %v1153_v7 = vadd.f32 %v1152_v43, %v912_v10  ;;  %v1156_v59 = vsel %vm351_vm0, %v915_v44, 0.0  ;;  %v2985_v15 = vld [vmem:[%s3166_s18 + $0x3c0] sm:$0xff]  ;;  %v2986_v10 = vld [vmem:[%s3166_s18 + $0x3c8] sm:$0xff]  ;;  %v2987_v43 = vld [vmem:[%s3166_s18 + $0x3d0] sm:$0xff] }
 0x11d   : > { %v917_v22 = vmul.f32 %v789_v27, %v789_v27  ;;  %v4063_v19 = vmul.f32 0.0051020407, %v595_v17  ;;  %v599_v28 = vpop.xlane.xlu1 %598  ;;  %v916_v37 = vmul.f32 %v788_v14, %v788_v14  ;;  %v1157_v51 = vadd.f32 %v1156_v59, %v914_v55  ;;  %v2988_v14 = vld [vmem:[%s3166_s18 + $0x3d8] sm:$0xff] }
 0x11e   : > { %v919_v53 = vmul.f32 %v791_v31, %v791_v31  ;;  %1150 = vadd.xlane.f32.xlu1 %v1149_v52  ;;  %1154 = vadd.xlane.f32.xlu0 %v1153_v7  ;;  %v4065_v2 = vmul.f32 0.0051020407, %v599_v28  ;;  %v918_v23 = vmul.f32 %v790_v4, %v790_v4 }
 0x11f   : > { %5425 = vst [vmem:[#allocation40_spill] sm:$0xff] %v4063_v19  ;;  %v792_v16 = vsub.f32 %v2985_v15, %v4063_v19  ;;  %v793_v44 = vsub.f32 %v2986_v10, %v4063_v19  ;;  %v1160_v27 = vsel %vm351_vm0, %v917_v22, 0.0 }
 0x120   : > { %5426 = vst [vmem:[#allocation38_spill] sm:$0xff] %v4065_v2  ;;  %v794_v17 = vsub.f32 %v2987_v43, %v4065_v2  ;;  %v795_v52 = vsub.f32 %v2988_v14, %v4065_v2  ;;  %v603_v31 = vpop.xlane.xlu0 %602  ;;  %v1161_v7 = vadd.f32 %v1160_v27, %v916_v37  ;;  %v1164_v55 = vsel %vm351_vm0, %v919_v53, 0.0  ;;  %v2989_v14 = vld [vmem:[%s3166_s18 + $0x3e0] sm:$0xff]  ;;  %v2990_v37 = vld [vmem:[%s3166_s18 + $0x3e8] sm:$0xff]  ;;  %v2991_v27 = vld [vmem:[%s3166_s18 + $0x3f0] sm:$0xff] }
 0x121   : > { %v921_v4 = vmul.f32 %v793_v44, %v793_v44  ;;  %v4077_v59 = vmul.f32 0.0051020407, %v603_v31  ;;  %v607_v28 = vpop.xlane.xlu1 %606  ;;  %v920_v15 = vmul.f32 %v792_v16, %v792_v16  ;;  %v1165_v43 = vadd.f32 %v1164_v55, %v918_v23 }
 0x122   : > { %v923_v22 = vmul.f32 %v795_v52, %v795_v52  ;;  %1158 = vadd.xlane.f32.xlu1 %v1157_v51  ;;  %1162 = vadd.xlane.f32.xlu0 %v1161_v7  ;;  %v4079_v10 = vmul.f32 0.0051020407, %v607_v28  ;;  %v922_v19 = vmul.f32 %v794_v17, %v794_v17 }
 0x123   : > { %5427 = vst [vmem:[#allocation41_spill] sm:$0xff] %v4077_v59  ;;  %v796_v2 = vsub.f32 %v2989_v14, %v4077_v59  ;;  %v797_v53 = vsub.f32 %v2990_v37, %v4077_v59  ;;  %v1168_v44 = vsel %vm351_vm0, %v921_v4, 0.0 }
 0x124   : > { %5428 = vst [vmem:[#allocation39_spill] sm:$0xff] %v4079_v10  ;;  %v798_v31 = vsub.f32 %v2991_v27, %v4079_v10  ;;  %v799_v16 = vsub.f32 %v2992_v56, %v4079_v10  ;;  %v1169_v51 = vadd.f32 %v1168_v44, %v920_v15  ;;  %v1172_v52 = vsel %vm351_vm0, %v923_v22, 0.0 }
 0x125   : > { %v925_v7 = vmul.f32 %v797_v53, %v797_v53  ;;  %v924_v23 = vmul.f32 %v796_v2, %v796_v2  ;;  %v1173_v55 = vadd.f32 %v1172_v52, %v922_v19 }
 0x126   : > { %v927_v17 = vmul.f32 %v799_v16, %v799_v16  ;;  %1166 = vadd.xlane.f32.xlu1 %v1165_v43  ;;  %1170 = vadd.xlane.f32.xlu0 %v1169_v51  ;;  %v926_v28 = vmul.f32 %v798_v31, %v798_v31 }
 0x127   : > { %v1176_v14 = vsel %vm351_vm0, %v925_v7, 0.0 }
 0x128   : > { %v1177_v37 = vadd.f32 %v1176_v14, %v924_v23  ;;  %v1180_v4 = vsel %vm351_vm0, %v927_v17, 0.0 }
 0x129   : > { %v1181_v27 = vadd.f32 %v1180_v4, %v926_v28  ;;  %v1248_v28 = vld [vmem:[%s4099_s22] sm:$0xff] }
 0x12a   : > { %1174 = vadd.xlane.f32.xlu1 %v1173_v55  ;;  %1178 = vadd.xlane.f32.xlu0 %v1177_v37 }
 0x12e   : > { %1182 = vadd.xlane.f32.xlu1 %v1181_v27 }
 0x13b   : > { %v931_v56 = vpop.xlane.xlu0 %930 }
 0x13c   : > { %v1184_v15 = vmul.f32 0.0051020407, %v931_v56 }
 0x13e   : > { %v1312_v22 = vadd.f32 1e-05, %v1184_v15 }
 0x13f   : > { %v935_v2 = vpop.xlane.xlu1 %934  ;;  %v939_v53 = vpop.xlane.xlu0 %938 }
 0x140   : > { %2832 = vrsqrt.f32 %v1312_v22  ;;  %v1185_v43 = vmul.f32 0.0051020407, %v935_v2  ;;  %v1186_v19 = vmul.f32 0.0051020407, %v939_v53  ;;  %v1249_v22 = vld [vmem:[%s4099_s22 + $0x8] sm:$0xff] }
 0x142   : > { %v1313_v44 = vadd.f32 1e-05, %v1185_v43  ;;  %v1314_v31 = vadd.f32 1e-05, %v1186_v19 }
 0x143   : > { %v943_v16 = vpop.xlane.xlu1 %942  ;;  %v947_v51 = vpop.xlane.xlu0 %946 }
 0x144   : > { %2834 = vrsqrt.f32 %v1313_v44  ;;  %v1187_v52 = vmul.f32 0.0051020407, %v943_v16  ;;  %v1188_v23 = vmul.f32 0.0051020407, %v947_v51 }
 0x145   : > { %2836 = vrsqrt.f32 %v1314_v31 }
 0x146   : > { %v1315_v7 = vadd.f32 1e-05, %v1187_v52  ;;  %v1316_v37 = vadd.f32 1e-05, %v1188_v23  ;;  %v1250_v52 = vld [vmem:[%s4099_s22 + $0x10] sm:$0xff] }
 0x147   : > { %v951_v17 = vpop.xlane.xlu1 %950  ;;  %v955_v55 = vpop.xlane.xlu0 %954 }
 0x148   : > { %2838 = vrsqrt.f32 %v1315_v7  ;;  %v1189_v4 = vmul.f32 0.0051020407, %v951_v17  ;;  %v1190_v43 = vmul.f32 0.0051020407, %v955_v55 }
 0x149   : > { %2840 = vrsqrt.f32 %v1316_v37 }
 0x14a   : > { %v2833_v14 = vpop.eup %2832  ;;  %v1317_v53 = vadd.f32 1e-05, %v1189_v4  ;;  %v1318_v7 = vadd.f32 1e-05, %v1190_v43  ;;  %v1251_v4 = vld [vmem:[%s4099_s22 + $0x18] sm:$0xff] }
 0x14b   : > { %v959_v27 = vpop.xlane.xlu1 %958  ;;  %v963_v56 = vpop.xlane.xlu0 %962  ;;  %v4102_v15 = vmul.f32 %v2833_v14, %v1248_v28 }
 0x14c   : > { %2842 = vrsqrt.f32 %v1317_v53  ;;  %v1191_v23 = vmul.f32 0.0051020407, %v959_v27 }
 0x14d   : > { %1698 = vperm.xlu0 %2830, %v4102_v15  }
 0x14e   : > { %v2835_v2 = vpop.eup %2834 }
 0x14f   : > { %v967_v19 = vpop.xlane.xlu1 %966  ;;  %v971_v44 = vpop.xlane.xlu0 %970  ;;  %v4106_v31 = vmul.f32 %v2835_v2, %v1249_v22  ;;  %v1319_v22 = vadd.f32 1e-05, %v1191_v23  ;;  %v1192_v2 = vmul.f32 0.0051020407, %v963_v56 }
 0x150   : > { %v2837_v16 = vpop.eup %2836  ;;  %v1193_v51 = vmul.f32 0.0051020407, %v967_v19 }
 0x151   : > { %1703 = vperm.xlu1 %2831, %v4106_v31   ;;  %v4110_v59 = vmul.f32 %v2837_v16, %v1250_v52  ;;  %v1320_v52 = vadd.f32 1e-05, %v1192_v2 }
 0x152   : > { %v1321_v17 = vadd.f32 1e-05, %v1193_v51  ;;  %v2839_v55 = vpop.eup %2838  ;;  %v1252_v51 = vld [vmem:[%s4099_s22 + $0x20] sm:$0xff] }
 0x153   : > { %v975_v28 = vpop.xlane.xlu1 %974  ;;  %v979_v14 = vpop.xlane.xlu0 %978  ;;  %v4114_v43 = vmul.f32 %v2839_v55, %v1251_v4  ;;  %v1257_v4 = vld [vmem:[%s4099_s22 + $0x48] sm:$0xff] }
 0x154   : > { %2844 = vrsqrt.f32 %v1321_v17  ;;  %v1195_v37 = vmul.f32 0.0051020407, %v975_v28  ;;  %v2841_v27 = vpop.eup %2840  ;;  %v1194_v17 = vmul.f32 0.0051020407, %v971_v44 }
 0x155   : > { %1708 = vperm.xlu1 %2831, %v4110_v59   ;;  %2846 = vrsqrt.f32 %v1318_v7  ;;  %v4118_v56 = vmul.f32 %v2841_v27, %v1252_v51 }
 0x156   : > { %v1323_v19 = vadd.f32 1e-05, %v1195_v37  ;;  %v2843_v37 = vpop.eup %2842 }
 0x157   : > { %v983_v10 = vpop.xlane.xlu1 %982  ;;  %v987_v53 = vpop.xlane.xlu0 %986  ;;  %v4125_v27 = vmul.f32 %v2843_v37, %v1253_v49 }
 0x158   : > { %2848 = vrsqrt.f32 %v1323_v19  ;;  %v1197_v16 = vmul.f32 0.0051020407, %v983_v10  ;;  %v1322_v19 = vadd.f32 1e-05, %v1194_v17  ;;  %v1198_v17 = vmul.f32 0.0051020407, %v987_v53 }
 0x159   : > { %1713 = vperm.xlu1 %2831, %v4114_v43   ;;  %2850 = vrsqrt.f32 %v1319_v22  ;;  %v1196_v22 = vmul.f32 0.0051020407, %v979_v14 }
 0x15a   : > { %v1325_v28 = vadd.f32 1e-05, %v1197_v16  ;;  %v1326_v53 = vadd.f32 1e-05, %v1198_v17 }
 0x15b   : > { %v991_v7 = vpop.xlane.xlu1 %990  ;;  %v995_v23 = vpop.xlane.xlu0 %994  ;;  %v1324_v14 = vadd.f32 1e-05, %v1196_v22 }
 0x15c   : > { %2852 = vrsqrt.f32 %v1325_v28  ;;  %v1199_v55 = vmul.f32 0.0051020407, %v991_v7  ;;  %v1259_v7 = vld [vmem:[%s4099_s22 + $0x58] sm:$0xff]  ;;  %v1200_v22 = vmul.f32 0.0051020407, %v995_v23 }
 0x15d   : > { %1718 = vperm.xlu1 %2831, %v4118_v56   ;;  %2854 = vrsqrt.f32 %v1320_v52 }
 0x15e   : > { %v2845_v10 = vpop.eup %2844  ;;  %v1327_v2 = vadd.f32 1e-05, %v1199_v55  ;;  %v1328_v23 = vadd.f32 1e-05, %v1200_v22 }
 0x15f   : > { %v999_v44 = vpop.xlane.xlu1 %998  ;;  %v1003_v16 = vpop.xlane.xlu0 %1002  ;;  %v4123_v9 = vmul.f32 %v2845_v10, %v1257_v4 }
 0x160   : > { %v2847_v51 = vpop.eup %2846  ;;  %2856 = vrsqrt.f32 %v1327_v2  ;;  %v1201_v28 = vmul.f32 0.0051020407, %v999_v44  ;;  %v1202_v17 = vmul.f32 0.0051020407, %v1003_v16 }
 0x161   : > { %1743 = vperm.xlu0 %2830, %v4123_v9   ;;  %1723 = vperm.xlu1 %2831, %v4125_v27   ;;  %2858 = vrsqrt.f32 %v1322_v19  ;;  %v4133_v37 = vmul.f32 %v2847_v51, %v1254_v33 }
 0x162   : > { %v2849_v52 = vpop.eup %2848  ;;  %v1329_v55 = vadd.f32 1e-05, %v1201_v28  ;;  %v1330_v16 = vadd.f32 1e-05, %v1202_v17 }
 0x163   : > { %v1007_v4 = vpop.xlane.xlu1 %1006  ;;  %v1011_v10 = vpop.xlane.xlu0 %1010  ;;  %v4131_v49 = vmul.f32 %v2849_v52, %v1259_v7 }
 0x164   : > { %v2851_v2 = vpop.eup %2850  ;;  %2860 = vrsqrt.f32 %v1329_v55  ;;  %v1203_v44 = vmul.f32 0.0051020407, %v1007_v4  ;;  %v1204_v22 = vmul.f32 0.0051020407, %v1011_v10 }
 0x165   : > { %1753 = vperm.xlu0 %2830, %v4131_v49   ;;  %1728 = vperm.xlu1 %2831, %v4133_v37   ;;  %2862 = vrsqrt.f32 %v1324_v14  ;;  %v4141_v51 = vmul.f32 %v2851_v2, %v1255_v47 }
 0x166   : > { %v2853_v19 = vpop.eup %2852  ;;  %v1331_v28 = vadd.f32 1e-05, %v1203_v44  ;;  %v1332_v10 = vadd.f32 1e-05, %v1204_v22 }
 0x167   : > { %v1015_v7 = vpop.xlane.xlu1 %1014  ;;  %v1019_v52 = vpop.xlane.xlu0 %1018  ;;  %v4139_v33 = vmul.f32 %v2853_v19, %v1261_v20 }
 0x168   : > { %v2855_v55 = vpop.eup %2854  ;;  %2864 = vrsqrt.f32 %v1331_v28  ;;  %v1205_v4 = vmul.f32 0.0051020407, %v1015_v7  ;;  %v1206_v17 = vmul.f32 0.0051020407, %v1019_v52 }
 0x169   : > { %1763 = vperm.xlu0 %2830, %v4139_v33   ;;  %1733 = vperm.xlu1 %2831, %v4141_v51   ;;  %2866 = vrsqrt.f32 %v1326_v53  ;;  %v4149_v2 = vmul.f32 %v2855_v55, %v1256_v40 }
 0x16a   : > { %v2857_v14 = vpop.eup %2856  ;;  %v1333_v44 = vadd.f32 1e-05, %v1205_v4  ;;  %v1334_v52 = vadd.f32 1e-05, %v1206_v17 }
 0x16b   : > { %v1023_v20 = vpop.xlane.xlu1 %1022  ;;  %v1027_v19 = vpop.xlane.xlu0 %1026  ;;  %v4147_v47 = vmul.f32 %v2857_v14, %v1263_v57 }
 0x16c   : > { %v2859_v28 = vpop.eup %2858  ;;  %2868 = vrsqrt.f32 %v1333_v44  ;;  %v1207_v7 = vmul.f32 0.0051020407, %v1023_v20  ;;  %v1208_v22 = vmul.f32 0.0051020407, %v1027_v19 }
 0x16d   : > { %1773 = vperm.xlu0 %2830, %v4147_v47   ;;  %1738 = vperm.xlu1 %2831, %v4149_v2   ;;  %2870 = vrsqrt.f32 %v1328_v23  ;;  %v4157_v55 = vmul.f32 %v2859_v28, %v1258_v63 }
 0x16e   : > { %v2861_v53 = vpop.eup %2860  ;;  %v1335_v4 = vadd.f32 1e-05, %v1207_v7  ;;  %v1336_v19 = vadd.f32 1e-05, %v1208_v22 }
 0x16f   : > { %v1031_v57 = vpop.xlane.xlu1 %1030  ;;  %v1035_v14 = vpop.xlane.xlu0 %1034  ;;  %v4155_v40 = vmul.f32 %v2861_v53, %v1265_v38 }
 0x170   : > { %v2863_v44 = vpop.eup %2862  ;;  %2872 = vrsqrt.f32 %v1335_v4  ;;  %v1209_v20 = vmul.f32 0.0051020407, %v1031_v57  ;;  %v1210_v17 = vmul.f32 0.0051020407, %v1035_v14 }
 0x171   : > { %1783 = vperm.xlu0 %2830, %v4155_v40   ;;  %1748 = vperm.xlu1 %2831, %v4157_v55   ;;  %2874 = vrsqrt.f32 %v1330_v16  ;;  %v4165_v28 = vmul.f32 %v2863_v44, %v1260_v54 }
 0x172   : > { %v2865_v23 = vpop.eup %2864  ;;  %v1337_v7 = vadd.f32 1e-05, %v1209_v20  ;;  %v1338_v14 = vadd.f32 1e-05, %v1210_v17 }
 0x173   : > { %v1039_v38 = vpop.xlane.xlu1 %1038  ;;  %v1043_v53 = vpop.xlane.xlu0 %1042  ;;  %v4163_v63 = vmul.f32 %v2865_v23, %v1267_v62 }
 0x174   : > { %v2867_v4 = vpop.eup %2866  ;;  %2876 = vrsqrt.f32 %v1337_v7  ;;  %v1211_v57 = vmul.f32 0.0051020407, %v1039_v38  ;;  %v1212_v22 = vmul.f32 0.0051020407, %v1043_v53 }
 0x175   : > { %1793 = vperm.xlu0 %2830, %v4163_v63   ;;  %1758 = vperm.xlu1 %2831, %v4165_v28   ;;  %2878 = vrsqrt.f32 %v1332_v10  ;;  %v4173_v44 = vmul.f32 %v2867_v4, %v1262_v12 }
 0x176   : > { %v2869_v16 = vpop.eup %2868  ;;  %v1339_v20 = vadd.f32 1e-05, %v1211_v57  ;;  %v1340_v53 = vadd.f32 1e-05, %v1212_v22 }
 0x177   : > { %v1047_v62 = vpop.xlane.xlu1 %1046  ;;  %v1051_v23 = vpop.xlane.xlu0 %1050  ;;  %v4171_v54 = vmul.f32 %v2869_v16, %v1269_v36 }
 0x178   : > { %v2871_v7 = vpop.eup %2870  ;;  %2880 = vrsqrt.f32 %v1339_v20  ;;  %v1213_v38 = vmul.f32 0.0051020407, %v1047_v62  ;;  %v1214_v17 = vmul.f32 0.0051020407, %v1051_v23 }
 0x179   : > { %1803 = vperm.xlu0 %2830, %v4171_v54   ;;  %1768 = vperm.xlu1 %2831, %v4173_v44   ;;  %2882 = vrsqrt.f32 %v1334_v52  ;;  %v4181_v4 = vmul.f32 %v2871_v7, %v1264_v35 }
 0x17a   : > { %v2873_v10 = vpop.eup %2872  ;;  %v1341_v57 = vadd.f32 1e-05, %v1213_v38  ;;  %v1342_v23 = vadd.f32 1e-05, %v1214_v17 }
 0x17b   : > { %v1055_v36 = vpop.xlane.xlu1 %1054  ;;  %v1059_v16 = vpop.xlane.xlu0 %1058  ;;  %v4179_v12 = vmul.f32 %v2873_v10, %v1271_v11  ;;  %5429 = vst [vmem:[#allocation44_spill] sm:$0xff] %v4181_v4 }
 0x17c   : > { %v2875_v20 = vpop.eup %2874  ;;  %2884 = vrsqrt.f32 %v1341_v57  ;;  %v1215_v62 = vmul.f32 0.0051020407, %v1055_v36  ;;  %v1216_v22 = vmul.f32 0.0051020407, %v1059_v16 }
 0x17d   : > { %1813 = vperm.xlu0 %2830, %v4179_v12   ;;  %1778 = vperm.xlu1 %2831, %v4181_v4   ;;  %2886 = vrsqrt.f32 %v1336_v19  ;;  %v4189_v7 = vmul.f32 %v2875_v20, %v1266_v61  ;;  %v1270_v4 = vld [vmem:[%s4099_s22 + $0xb0] sm:$0xff] }
 0x17e   : > { %v2877_v52 = vpop.eup %2876  ;;  %v1343_v38 = vadd.f32 1e-05, %v1215_v62  ;;  %v1344_v16 = vadd.f32 1e-05, %v1216_v22 }
 0x17f   : > { %v1063_v11 = vpop.xlane.xlu1 %1062  ;;  %v1067_v10 = vpop.xlane.xlu0 %1066  ;;  %v4187_v35 = vmul.f32 %v2877_v52, %v1273_v30  ;;  %5431 = vst [vmem:[#allocation45_spill] sm:$0xff] %v4189_v7 }
 0x180   : > { %v2879_v57 = vpop.eup %2878  ;;  %2888 = vrsqrt.f32 %v1343_v38  ;;  %v1217_v36 = vmul.f32 0.0051020407, %v1063_v11  ;;  %v1218_v17 = vmul.f32 0.0051020407, %v1067_v10 }
 0x181   : > { %5430 = vst [vmem:[#allocation42_spill] sm:$0xff] %v4187_v35  ;;  %1823 = vperm.xlu0 %2830, %v4187_v35   ;;  %1788 = vperm.xlu1 %2831, %v4189_v7   ;;  %2890 = vrsqrt.f32 %v1338_v14  ;;  %v4197_v20 = vmul.f32 %v2879_v57, %v1268_v39  ;;  %v1279_v7 = vld [vmem:[%s4099_s22 + $0xf8] sm:$0xff]  ;;  %v1272_v35 = vld [vmem:[%s4099_s22 + $0xc0] sm:$0xff] }
 0x182   : > { %v2881_v19 = vpop.eup %2880  ;;  %v1345_v62 = vadd.f32 1e-05, %v1217_v36  ;;  %v1346_v10 = vadd.f32 1e-05, %v1218_v17 }
 0x183   : > { %v1071_v30 = vpop.xlane.xlu1 %1070  ;;  %v1075_v52 = vpop.xlane.xlu0 %1074  ;;  %v4195_v61 = vmul.f32 %v2881_v19, %v1275_v60  ;;  %5433 = vst [vmem:[#allocation48_spill] sm:$0xff] %v4197_v20 }
 0x184   : > { %v2883_v38 = vpop.eup %2882  ;;  %2892 = vrsqrt.f32 %v1345_v62  ;;  %v1219_v11 = vmul.f32 0.0051020407, %v1071_v30  ;;  %v1220_v22 = vmul.f32 0.0051020407, %v1075_v52 }
 0x185   : > { %5432 = vst [vmem:[#allocation43_spill] sm:$0xff] %v4195_v61  ;;  %1833 = vperm.xlu0 %2830, %v4195_v61   ;;  %1798 = vperm.xlu1 %2831, %v4197_v20   ;;  %2894 = vrsqrt.f32 %v1340_v53  ;;  %v4205_v57 = vmul.f32 %v2883_v38, %v1270_v4  ;;  %v1281_v20 = vld [vmem:[%s4099_s22 + $0x108] sm:$0xff]  ;;  %v1274_v61 = vld [vmem:[%s4099_s22 + $0xd0] sm:$0xff] }
 0x186   : > { %v2885_v14 = vpop.eup %2884  ;;  %v1347_v36 = vadd.f32 1e-05, %v1219_v11  ;;  %v1348_v52 = vadd.f32 1e-05, %v1220_v22 }
 0x187   : > { %v1079_v60 = vpop.xlane.xlu1 %1078  ;;  %v1083_v19 = vpop.xlane.xlu0 %1082  ;;  %v4203_v39 = vmul.f32 %v2885_v14, %v1277_v46  ;;  %5435 = vst [vmem:[#allocation49_spill] sm:$0xff] %v4205_v57 }
 0x188   : > { %v2887_v62 = vpop.eup %2886  ;;  %2896 = vrsqrt.f32 %v1347_v36  ;;  %v1221_v30 = vmul.f32 0.0051020407, %v1079_v60  ;;  %v1222_v17 = vmul.f32 0.0051020407, %v1083_v19 }
 0x189   : > { %5434 = vst [vmem:[#allocation46_spill] sm:$0xff] %v4203_v39  ;;  %1843 = vperm.xlu0 %2830, %v4203_v39   ;;  %1808 = vperm.xlu1 %2831, %v4205_v57   ;;  %2898 = vrsqrt.f32 %v1342_v23  ;;  %v4213_v38 = vmul.f32 %v2887_v62, %v1272_v35  ;;  %v1283_v57 = vld [vmem:[%s4099_s22 + $0x118] sm:$0xff]  ;;  %v1276_v39 = vld [vmem:[%s4099_s22 + $0xe0] sm:$0xff] }
 0x18a   : > { %v2889_v53 = vpop.eup %2888  ;;  %v1349_v11 = vadd.f32 1e-05, %v1221_v30  ;;  %v1350_v19 = vadd.f32 1e-05, %v1222_v17 }
 0x18b   : > { %v1087_v46 = vpop.xlane.xlu1 %1086  ;;  %v1091_v14 = vpop.xlane.xlu0 %1090  ;;  %v4211_v4 = vmul.f32 %v2889_v53, %v1279_v7  ;;  %5437 = vst [vmem:[#allocation51_spill] sm:$0xff] %v4213_v38 }
 0x18c   : > { %v2891_v36 = vpop.eup %2890  ;;  %2900 = vrsqrt.f32 %v1349_v11  ;;  %v1223_v60 = vmul.f32 0.0051020407, %v1087_v46  ;;  %v1224_v22 = vmul.f32 0.0051020407, %v1091_v14 }
 0x18d   : > { %5436 = vst [vmem:[#allocation47_spill] sm:$0xff] %v4211_v4  ;;  %1853 = vperm.xlu0 %2830, %v4211_v4   ;;  %1818 = vperm.xlu1 %2831, %v4213_v38   ;;  %2902 = vrsqrt.f32 %v1344_v16  ;;  %v4221_v62 = vmul.f32 %v2891_v36, %v1274_v61  ;;  %v1285_v38 = vld [vmem:[%s4099_s22 + $0x128] sm:$0xff]  ;;  %v1278_v4 = vld [vmem:[%s4099_s22 + $0xf0] sm:$0xff] }
 0x18e   : > { %v2893_v23 = vpop.eup %2892  ;;  %v1351_v30 = vadd.f32 1e-05, %v1223_v60  ;;  %v1352_v14 = vadd.f32 1e-05, %v1224_v22 }
 0x18f   : > { %v1095_v7 = vpop.xlane.xlu1 %1094  ;;  %v1099_v53 = vpop.xlane.xlu0 %1098  ;;  %v4219_v35 = vmul.f32 %v2893_v23, %v1281_v20  ;;  %5439 = vst [vmem:[#allocation52_spill] sm:$0xff] %v4221_v62 }
 0x190   : > { %v2895_v11 = vpop.eup %2894  ;;  %2904 = vrsqrt.f32 %v1351_v30  ;;  %v1225_v46 = vmul.f32 0.0051020407, %v1095_v7  ;;  %v1226_v17 = vmul.f32 0.0051020407, %v1099_v53 }
 0x191   : > { %5438 = vst [vmem:[#allocation50_spill] sm:$0xff] %v4219_v35  ;;  %1863 = vperm.xlu0 %2830, %v4219_v35   ;;  %1828 = vperm.xlu1 %2831, %v4221_v62   ;;  %2906 = vrsqrt.f32 %v1346_v10  ;;  %v4229_v36 = vmul.f32 %v2895_v11, %v1276_v39  ;;  %v1287_v62 = vld [vmem:[%s4099_s22 + $0x138] sm:$0xff]  ;;  %v1280_v35 = vld [vmem:[%s4099_s22 + $0x100] sm:$0xff] }
 0x192   : > { %v2897_v16 = vpop.eup %2896  ;;  %v1353_v60 = vadd.f32 1e-05, %v1225_v46  ;;  %v1354_v53 = vadd.f32 1e-05, %v1226_v17 }
 0x193   : > { %v1103_v20 = vpop.xlane.xlu1 %1102  ;;  %v1107_v23 = vpop.xlane.xlu0 %1106  ;;  %v4227_v61 = vmul.f32 %v2897_v16, %v1283_v57  ;;  %5441 = vst [vmem:[#allocation57_spill] sm:$0xff] %v4229_v36 }
 0x194   : > { %v2899_v30 = vpop.eup %2898  ;;  %2908 = vrsqrt.f32 %v1353_v60  ;;  %v1227_v7 = vmul.f32 0.0051020407, %v1103_v20  ;;  %v1228_v22 = vmul.f32 0.0051020407, %v1107_v23 }
 0x195   : > { %5440 = vst [vmem:[#allocation56_spill] sm:$0xff] %v4227_v61  ;;  %1873 = vperm.xlu0 %2830, %v4227_v61   ;;  %1838 = vperm.xlu1 %2831, %v4229_v36   ;;  %2910 = vrsqrt.f32 %v1348_v52  ;;  %v4237_v11 = vmul.f32 %v2899_v30, %v1278_v4  ;;  %v1289_v36 = vld [vmem:[%s4099_s22 + $0x148] sm:$0xff]  ;;  %v1282_v61 = vld [vmem:[%s4099_s22 + $0x110] sm:$0xff] }
 0x196   : > { %v2901_v10 = vpop.eup %2900  ;;  %v1355_v46 = vadd.f32 1e-05, %v1227_v7  ;;  %v1356_v23 = vadd.f32 1e-05, %v1228_v22 }
 0x197   : > { %v1111_v57 = vpop.xlane.xlu1 %1110  ;;  %v1115_v16 = vpop.xlane.xlu0 %1114  ;;  %v4235_v39 = vmul.f32 %v2901_v10, %v1285_v38  ;;  %5443 = vst [vmem:[#allocation59_spill] sm:$0xff] %v4237_v11 }
 0x198   : > { %v2903_v60 = vpop.eup %2902  ;;  %2912 = vrsqrt.f32 %v1355_v46  ;;  %v1229_v20 = vmul.f32 0.0051020407, %v1111_v57  ;;  %v1230_v17 = vmul.f32 0.0051020407, %v1115_v16 }
 0x199   : > { %5442 = vst [vmem:[#allocation58_spill] sm:$0xff] %v4235_v39  ;;  %1883 = vperm.xlu0 %2830, %v4235_v39   ;;  %1848 = vperm.xlu1 %2831, %v4237_v11   ;;  %2914 = vrsqrt.f32 %v1350_v19  ;;  %v4245_v30 = vmul.f32 %v2903_v60, %v1280_v35  ;;  %v1291_v11 = vld [vmem:[%s4099_s22 + $0x158] sm:$0xff]  ;;  %v1284_v39 = vld [vmem:[%s4099_s22 + $0x120] sm:$0xff] }
 0x19a   : > { %v2905_v52 = vpop.eup %2904  ;;  %v1357_v7 = vadd.f32 1e-05, %v1229_v20  ;;  %v1358_v16 = vadd.f32 1e-05, %v1230_v17 }
 0x19b   : > { %v1119_v38 = vpop.xlane.xlu1 %1118  ;;  %v1123_v10 = vpop.xlane.xlu0 %1122  ;;  %v4243_v4 = vmul.f32 %v2905_v52, %v1287_v62  ;;  %5445 = vst [vmem:[#allocation61_spill] sm:$0xff] %v4245_v30 }
 0x19c   : > { %v2907_v46 = vpop.eup %2906  ;;  %2916 = vrsqrt.f32 %v1357_v7  ;;  %v1231_v57 = vmul.f32 0.0051020407, %v1119_v38  ;;  %v1232_v22 = vmul.f32 0.0051020407, %v1123_v10 }
 0x19d   : > { %5444 = vst [vmem:[#allocation60_spill] sm:$0xff] %v4243_v4  ;;  %1893 = vperm.xlu0 %2830, %v4243_v4   ;;  %1858 = vperm.xlu1 %2831, %v4245_v30   ;;  %2918 = vrsqrt.f32 %v1352_v14  ;;  %v4253_v60 = vmul.f32 %v2907_v46, %v1282_v61  ;;  %v1293_v30 = vld [vmem:[%s4099_s22 + $0x168] sm:$0xff]  ;;  %v1286_v4 = vld [vmem:[%s4099_s22 + $0x130] sm:$0xff] }
 0x19e   : > { %v2909_v19 = vpop.eup %2908  ;;  %v1359_v20 = vadd.f32 1e-05, %v1231_v57  ;;  %v1360_v10 = vadd.f32 1e-05, %v1232_v22 }
 0x19f   : > { %v1127_v62 = vpop.xlane.xlu1 %1126  ;;  %v1131_v52 = vpop.xlane.xlu0 %1130  ;;  %v4251_v35 = vmul.f32 %v2909_v19, %v1289_v36  ;;  %5446 = vst [vmem:[#allocation62_spill] sm:$0xff] %v4253_v60 }
 0x1a0   : > { %v2911_v7 = vpop.eup %2910  ;;  %2920 = vrsqrt.f32 %v1359_v20  ;;  %v1233_v38 = vmul.f32 0.0051020407, %v1127_v62  ;;  %v1234_v17 = vmul.f32 0.0051020407, %v1131_v52 }
 0x1a1   : > { %1903 = vperm.xlu0 %2830, %v4251_v35   ;;  %1868 = vperm.xlu1 %2831, %v4253_v60   ;;  %2922 = vrsqrt.f32 %v1354_v53  ;;  %v4261_v46 = vmul.f32 %v2911_v7, %v1284_v39  ;;  %v1295_v60 = vld [vmem:[%s4099_s22 + $0x178] sm:$0xff] }
 0x1a2   : > { %v2913_v14 = vpop.eup %2912  ;;  %v1361_v57 = vadd.f32 1e-05, %v1233_v38  ;;  %v1362_v52 = vadd.f32 1e-05, %v1234_v17 }
 0x1a3   : > { %v1135_v36 = vpop.xlane.xlu1 %1134  ;;  %v1139_v19 = vpop.xlane.xlu0 %1138  ;;  %v4259_v61 = vmul.f32 %v2913_v14, %v1291_v11  ;;  %5448 = vst [vmem:[#allocation64_spill] sm:$0xff] %v4261_v46 }
 0x1a4   : > { %v2915_v20 = vpop.eup %2914  ;;  %2924 = vrsqrt.f32 %v1361_v57  ;;  %v1235_v62 = vmul.f32 0.0051020407, %v1135_v36  ;;  %v1236_v22 = vmul.f32 0.0051020407, %v1139_v19 }
 0x1a5   : > { %5447 = vst [vmem:[#allocation63_spill] sm:$0xff] %v4259_v61  ;;  %1913 = vperm.xlu0 %2830, %v4259_v61   ;;  %1878 = vperm.xlu1 %2831, %v4261_v46   ;;  %2926 = vrsqrt.f32 %v1356_v23  ;;  %v4269_v7 = vmul.f32 %v2915_v20, %v1286_v4  ;;  %v1288_v61 = vld [vmem:[%s4099_s22 + $0x140] sm:$0xff]  ;;  %v1290_v46 = vld [vmem:[%s4099_s22 + $0x150] sm:$0xff] }
 0x1a6   : > { %v2917_v53 = vpop.eup %2916  ;;  %v1363_v38 = vadd.f32 1e-05, %v1235_v62  ;;  %v1364_v19 = vadd.f32 1e-05, %v1236_v22 }
 0x1a7   : > { %v1143_v11 = vpop.xlane.xlu1 %1142  ;;  %v1147_v14 = vpop.xlane.xlu0 %1146  ;;  %v4267_v39 = vmul.f32 %v2917_v53, %v1293_v30  ;;  %5450 = vst [vmem:[#allocation66_spill] sm:$0xff] %v4269_v7 }
 0x1a8   : > { %v2919_v57 = vpop.eup %2918  ;;  %2928 = vrsqrt.f32 %v1363_v38  ;;  %v1237_v36 = vmul.f32 0.0051020407, %v1143_v11  ;;  %v1297_v11 = vld [vmem:[%s4099_s22 + $0x188] sm:$0xff]  ;;  %v1238_v17 = vmul.f32 0.0051020407, %v1147_v14 }
 0x1a9   : > { %5449 = vst [vmem:[#allocation65_spill] sm:$0xff] %v4267_v39  ;;  %1923 = vperm.xlu0 %2830, %v4267_v39   ;;  %1888 = vperm.xlu1 %2831, %v4269_v7   ;;  %2930 = vrsqrt.f32 %v1358_v16  ;;  %v4277_v4 = vmul.f32 %v2919_v57, %v1288_v61  ;;  %v1292_v7 = vld [vmem:[%s4099_s22 + $0x160] sm:$0xff] }
 0x1aa   : > { %v2921_v23 = vpop.eup %2920  ;;  %v1365_v62 = vadd.f32 1e-05, %v1237_v36  ;;  %v1366_v14 = vadd.f32 1e-05, %v1238_v17 }
 0x1ab   : > { %v1151_v30 = vpop.xlane.xlu1 %1150  ;;  %v4275_v53 = vmul.f32 %v2921_v23, %v1295_v60  ;;  %5451 = vst [vmem:[#allocation67_spill] sm:$0xff] %v4277_v4  ;;  %v2923_v20 = vpop.eup %2922 }
 0x1ac   : > { %2932 = vrsqrt.f32 %v1365_v62  ;;  %v1239_v38 = vmul.f32 0.0051020407, %v1151_v30  ;;  %v1155_v39 = vpop.xlane.xlu0 %1154  ;;  %v4285_v57 = vmul.f32 %v2923_v20, %v1290_v46  ;;  %v1299_v30 = vld [vmem:[%s4099_s22 + $0x198] sm:$0xff] }
 0x1ad   : > { %1933 = vperm.xlu0 %2830, %v4275_v53   ;;  %1898 = vperm.xlu1 %2831, %v4277_v4   ;;  %2934 = vrsqrt.f32 %v1360_v10  ;;  %v1301_v4 = vld [vmem:[%s4099_s22 + $0x1a8] sm:$0xff]  ;;  %v1240_v22 = vmul.f32 0.0051020407, %v1155_v39 }
 0x1ae   : > { %v2925_v16 = vpop.eup %2924  ;;  %v1367_v60 = vadd.f32 1e-05, %v1239_v38  ;;  %5453 = vst [vmem:[#allocation69_spill] sm:$0xff] %v4285_v57 }
 0x1af   : > { %v1159_v36 = vpop.xlane.xlu1 %1158  ;;  %v4283_v61 = vmul.f32 %v2925_v16, %v1297_v11  ;;  %v2927_v23 = vpop.eup %2926  ;;  %v1368_v39 = vadd.f32 1e-05, %v1240_v22 }
 0x1b0   : > { %2936 = vrsqrt.f32 %v1367_v60  ;;  %v1241_v62 = vmul.f32 0.0051020407, %v1159_v36  ;;  %v1163_v11 = vpop.xlane.xlu0 %1162  ;;  %v4293_v20 = vmul.f32 %v2927_v23, %v1292_v7 }
 0x1b1   : > { %5452 = vst [vmem:[#allocation68_spill] sm:$0xff] %v4283_v61  ;;  %1943 = vperm.xlu0 %2830, %v4283_v61   ;;  %1908 = vperm.xlu1 %2831, %v4285_v57   ;;  %2938 = vrsqrt.f32 %v1362_v52  ;;  %v1294_v61 = vld [vmem:[%s4099_s22 + $0x170] sm:$0xff]  ;;  %v1296_v57 = vld [vmem:[%s4099_s22 + $0x180] sm:$0xff]  ;;  %v1242_v17 = vmul.f32 0.0051020407, %v1163_v11 }
 0x1b2   : > { %v2929_v10 = vpop.eup %2928  ;;  %v1369_v38 = vadd.f32 1e-05, %v1241_v62  ;;  %5455 = vst [vmem:[#allocation71_spill] sm:$0xff] %v4293_v20 }
 0x1b3   : > { %v1167_v16 = vpop.xlane.xlu1 %1166  ;;  %v4291_v46 = vmul.f32 %v2929_v10, %v1299_v30  ;;  %v2931_v60 = vpop.eup %2930  ;;  %v1370_v11 = vadd.f32 1e-05, %v1242_v17 }
 0x1b4   : > { %2940 = vrsqrt.f32 %v1369_v38  ;;  %v1243_v36 = vmul.f32 0.0051020407, %v1167_v16  ;;  %v4301_v7 = vmul.f32 %v2931_v60, %v1294_v61  ;;  %v1303_v16 = vld [vmem:[%s4099_s22 + $0x1b8] sm:$0xff] }
 0x1b5   : > { %5454 = vst [vmem:[#allocation70_spill] sm:$0xff] %v4291_v46  ;;  %1953 = vperm.xlu0 %2830, %v4291_v46   ;;  %1918 = vperm.xlu1 %2831, %v4293_v20   ;;  %2942 = vrsqrt.f32 %v1364_v19  ;;  %v1171_v46 = vpop.xlane.xlu0 %1170  ;;  %v1298_v20 = vld [vmem:[%s4099_s22 + $0x190] sm:$0xff] }
 0x1b6   : > { %v2933_v52 = vpop.eup %2932  ;;  %v1371_v62 = vadd.f32 1e-05, %v1243_v36  ;;  %v1244_v22 = vmul.f32 0.0051020407, %v1171_v46 }
 0x1b7   : > { %v1175_v30 = vpop.xlane.xlu1 %1174  ;;  %v4299_v10 = vmul.f32 %v2933_v52, %v1301_v4  ;;  %v2935_v23 = vpop.eup %2934 }
 0x1b8   : > { %2944 = vrsqrt.f32 %v1371_v62  ;;  %v1245_v38 = vmul.f32 0.0051020407, %v1175_v30  ;;  %v4309_v60 = vmul.f32 %v2935_v23, %v1296_v57  ;;  %v1305_v30 = vld [vmem:[%s4099_s22 + $0x1c8] sm:$0xff]  ;;  %v1372_v46 = vadd.f32 1e-05, %v1244_v22 }
 0x1b9   : > { %1963 = vperm.xlu0 %2830, %v4299_v10   ;;  %1928 = vperm.xlu1 %2831, %v4301_v7   ;;  %2946 = vrsqrt.f32 %v1366_v14 }
 0x1ba   : > { %v2937_v19 = vpop.eup %2936  ;;  %v1373_v4 = vadd.f32 1e-05, %v1245_v38  ;;  %5456 = vst [vmem:[#allocation72_spill] sm:$0xff] %v4309_v60 }
 0x1bb   : > { %v1183_v36 = vpop.xlane.xlu1 %1182  ;;  %v4307_v61 = vmul.f32 %v2937_v19, %v1303_v16  ;;  %v2939_v52 = vpop.eup %2938 }
 0x1bc   : > { %2948 = vrsqrt.f32 %v1373_v4  ;;  %v1247_v62 = vmul.f32 0.0051020407, %v1183_v36  ;;  %v1179_v16 = vpop.xlane.xlu0 %1178  ;;  %v4317_v23 = vmul.f32 %v2939_v52, %v1298_v20  ;;  %v1307_v4 = vld [vmem:[%s4099_s22 + $0x1d8] sm:$0xff]  ;;  %v1300_v36 = vld [vmem:[%s4099_s22 + $0x1a0] sm:$0xff]  ;;  %v1309_v52 = vld [vmem:[%s4099_s22 + $0x1e8] sm:$0xff] }
 0x1bd   : > { %1973 = vperm.xlu0 %2830, %v4307_v61   ;;  %1938 = vperm.xlu1 %2831, %v4309_v60   ;;  %2950 = vrsqrt.f32 %v1368_v39  ;;  %v1246_v39 = vmul.f32 0.0051020407, %v1179_v16  ;;  %v1311_v16 = vld [vmem:[%s4099_s22 + $0x1f8] sm:$0xff] }
 0x1be   : > { %v2941_v14 = vpop.eup %2940  ;;  %v1375_v38 = vadd.f32 1e-05, %v1247_v62 }
 0x1bf   : > { %v4315_v57 = vmul.f32 %v2941_v14, %v1305_v30  ;;  %v2943_v19 = vpop.eup %2942  ;;  %v1302_v30 = vld [vmem:[%s4099_s22 + $0x1b0] sm:$0xff] }
 0x1c0   : > { %2952 = vrsqrt.f32 %v1375_v38  ;;  %v4325_v62 = vmul.f32 %v2943_v19, %v1300_v36  ;;  %v1374_v38 = vadd.f32 1e-05, %v1246_v39  ;;  %v1304_v19 = vld [vmem:[%s4099_s22 + $0x1c0] sm:$0xff] }
 0x1c1   : > { %1983 = vperm.xlu0 %2830, %v4315_v57   ;;  %1948 = vperm.xlu1 %2831, %v4317_v23   ;;  %2954 = vrsqrt.f32 %v1370_v11 }
 0x1c2   : > { %v2945_v60 = vpop.eup %2944  ;;  %5457 = vst [vmem:[#allocation73_spill] sm:$0xff] %v4325_v62  ;;  %2956 = vrsqrt.f32 %v1372_v46  ;;  %v1569_v46 = vmul.f32 %v4106_v31, %v3657_v21  ;;  %v1308_v21 = vld [vmem:[%s4099_s22 + $0x1e0] sm:$0xff] }
 0x1c3   : > { %v4323_v17 = vmul.f32 %v2945_v60, %v1307_v4  ;;  %v2947_v20 = vpop.eup %2946  ;;  %2958 = vrsqrt.f32 %v1374_v38  ;;  %v1571_v38 = vmul.f32 %v4114_v43, %v3659_v41  ;;  %v1509_v41 = vld [vmem:[%s4348_s25 + $0x28] sm:$0xff]  ;;  %v1310_v43 = vld [vmem:[%s4099_s22 + $0x1f0] sm:$0xff] }
 0x1c4   : > { %v4333_v22 = vmul.f32 %v2947_v20, %v1302_v30  ;;  %v1505_v20 = vld [vmem:[%s4348_s25 + $0x8] sm:$0xff] }
 0x1c5   : > { %1993 = vperm.xlu0 %2830, %v4323_v17   ;;  %1958 = vperm.xlu1 %2831, %v4325_v62   ;;  %v1633_v30 = vsub.f32 %v1505_v20, %v1569_v46  ;;  %v1573_v46 = vmul.f32 %v4125_v27, %v3673_v5  ;;  %v1511_v27 = vld [vmem:[%s4348_s25 + $0x38] sm:$0xff] }
 0x1c6   : > { %v2949_v14 = vpop.eup %2948 }
 0x1c7   : > { %v4331_v11 = vmul.f32 %v2949_v14, %v1309_v52  ;;  %v2951_v60 = vpop.eup %2950  ;;  %v1306_v52 = vld [vmem:[%s4099_s22 + $0x1d0] sm:$0xff] }
 0x1c8   : > { %v4341_v62 = vmul.f32 %v2951_v60, %v1304_v19  ;;  %v1507_v19 = vld [vmem:[%s4348_s25 + $0x18] sm:$0xff] }
 0x1c9   : > { %2003 = vperm.xlu0 %2830, %v4331_v11   ;;  %1968 = vperm.xlu1 %2831, %v4333_v22   ;;  %v1635_v31 = vsub.f32 %v1507_v19, %v1571_v38  ;;  %v1575_v38 = vmul.f32 %v4141_v51, %v3687_v18  ;;  %v1504_v19 = vld [vmem:[%s4348_s25] sm:$0xff]  ;;  %v1513_v51 = vld [vmem:[%s4348_s25 + $0x48] sm:$0xff] }
 0x1ca   : > { %v2953_v4 = vpop.eup %2952 }
 0x1cb   : > { %v4339_v36 = vmul.f32 %v2953_v4, %v1311_v16  ;;  %v2955_v39 = vpop.eup %2954 }
 0x1cc   : > { %v4356_v14 = vmul.f32 %v2955_v39, %v1306_v52  ;;  %v2957_v60 = vpop.eup %2956  ;;  %v1637_v52 = vsub.f32 %v1509_v41, %v1573_v46  ;;  %v1577_v46 = vmul.f32 %v4123_v9, %v3701_v26 }
 0x1cd   : > { %2013 = vperm.xlu0 %2830, %v4339_v36   ;;  %1978 = vperm.xlu1 %2831, %v4341_v62   ;;  %v4365_v4 = vmul.f32 %v2957_v60, %v1308_v21  ;;  %v2959_v39 = vpop.eup %2958  ;;  %v1568_v60 = vmul.f32 %v4102_v15, %v3645_v13  ;;  %v1639_v21 = vsub.f32 %v1511_v27, %v1575_v38  ;;  %v1506_v15 = vld [vmem:[%s4348_s25 + $0x10] sm:$0xff]  ;;  %v1515_v38 = vld [vmem:[%s4348_s25 + $0x58] sm:$0xff] }
 0x1ce   : > { %v1570_v13 = vmul.f32 %v4110_v59, %v3647_v29  ;;  %v1641_v41 = vsub.f32 %v1513_v51, %v1577_v46  ;;  %v1508_v29 = vld [vmem:[%s4348_s25 + $0x20] sm:$0xff]  ;;  %v1581_v27 = vmul.f32 %v4139_v33, %v3729_v42  ;;  %v1583_v46 = vmul.f32 %v4147_v47, %v3743_v50 }
 0x1d0   : > { %v4360_v16 = vpop.permute.xlu1 %1703  ;;  %v1634_v9 = vsub.f32 %v1506_v15, %v1570_v13  ;;  %v1519_v13 = vld [vmem:[%s4348_s25 + $0x78] sm:$0xff]  ;;  %v1576_v15 = vmul.f32 %v4149_v2, %v3699_v6  ;;  %v1514_v6 = vld [vmem:[%s4348_s25 + $0x50] sm:$0xff] }
 0x1d1   : > { %2151 = vperm.xlu0 %2830, %v1633_v30   ;;  %1988 = vperm.xlu1 %2831, %v4356_v14   ;;  %v4374_v30 = vmul.f32 %v2959_v39, %v1310_v43  ;;  %v4387_v39 = vpop.permute.xlu0 %1698  ;;  %v1579_v43 = vmul.f32 %v4131_v49, %v3715_v34 }
 0x1d3   : > { %v1643_v59 = vsub.f32 %v1515_v38, %v1579_v43  ;;  %v1578_v38 = vmul.f32 %v4157_v55, %v3713_v45  ;;  %v1516_v45 = vld [vmem:[%s4348_s25 + $0x60] sm:$0xff] }
 0x1d4   : > { %v4369_v20 = vpop.permute.xlu1 %1708 }
 0x1d5   : > { %2161 = vperm.xlu0 %2830, %v1635_v31   ;;  %1998 = vperm.xlu1 %2831, %v4365_v4   ;;  %v1632_v31 = vsub.f32 %v1504_v19, %v1568_v60  ;;  %v1572_v60 = vmul.f32 %v4118_v56, %v3671_v3  ;;  %v1510_v3 = vld [vmem:[%s4348_s25 + $0x30] sm:$0xff] }
 0x1d7   : > { %v1636_v49 = vsub.f32 %v1508_v29, %v1572_v60  ;;  %v1587_v60 = vmul.f32 %v4163_v63, %v3771_v8 }
 0x1d8   : > { %v4380_v5 = vpop.permute.xlu1 %1713 }
 0x1d9   : > { %2171 = vperm.xlu0 %2830, %v1637_v52   ;;  %2008 = vperm.xlu1 %2831, %v4374_v30  }
 0x1dc   : > { %v4389_v18 = vpop.permute.xlu1 %1718 }
 0x1dd   : > { %2181 = vperm.xlu0 %2830, %v1639_v21   ;;  %2146 = vperm.xlu1 %2831, %v1632_v31   ;;  %v1517_v21 = vld [vmem:[%s4348_s25 + $0x68] sm:$0xff]  ;;  %v1574_v31 = vmul.f32 %v4133_v37, %v3685_v0  ;;  %v1512_v0 = vld [vmem:[%s4348_s25 + $0x40] sm:$0xff]  ;;  %v1647_v37 = vsub.f32 %v1519_v13, %v1583_v46  ;;  %v5458_v13 = vld [vmem:[#allocation44_spill] sm:$0xff] }
 0x1de   : > { %v1645_v56 = vsub.f32 %v1517_v21, %v1581_v27  ;;  %v1640_v47 = vsub.f32 %v1512_v0, %v1576_v15  ;;  %v1580_v27 = vmul.f32 %v4165_v28, %v3727_v48  ;;  %v1518_v48 = vld [vmem:[%s4348_s25 + $0x70] sm:$0xff]  ;;  %v1584_v15 = vmul.f32 %v5458_v13, %v3755_v25  ;;  %v5459_v0 = vld [vmem:[#allocation2_spill] sm:$0xff] }
 0x1df   : > { %v1638_v33 = vsub.f32 %v1510_v3, %v1574_v31  ;;  %v1525_v31 = vld [vmem:[%s4348_s25 + $0xa8] sm:$0xff]  ;;  %v1582_v3 = vmul.f32 %v4173_v44, %v3741_v1  ;;  %v1520_v1 = vld [vmem:[%s4348_s25 + $0x80] sm:$0xff]  ;;  %v1522_v25 = vld [vmem:[%s4348_s25 + $0x90] sm:$0xff] }
 0x1e0   : > { %v4397_v52 = vpop.permute.xlu1 %1723  ;;  %v4399_v26 = vpop.permute.xlu0 %1743  ;;  %v1644_v63 = vsub.f32 %v1516_v45, %v1580_v27 }
 0x1e1   : > { %2191 = vperm.xlu0 %2830, %v1641_v41   ;;  %2156 = vperm.xlu1 %2831, %v1634_v9   ;;  %v1585_v41 = vmul.f32 %v4155_v40, %v3757_v58  ;;  %v1521_v9 = vld [vmem:[%s4348_s25 + $0x88] sm:$0xff]  ;;  %v1642_v40 = vsub.f32 %v1514_v6, %v1578_v38  ;;  %v5461_v38 = vld [vmem:[#allocation53_spill] sm:$0xff] }
 0x1e2   : > { %v5462_v6 = vld [vmem:[#allocation45_spill] sm:$0xff] }
 0x1e3   : > { %v1649_v2 = vsub.f32 %v1521_v9, %v1585_v41  ;;  %v1529_v9 = vld [vmem:[%s4348_s25 + $0xc8] sm:$0xff] }
 0x1e4   : > { %v4407_v19 = vpop.permute.xlu1 %1728  ;;  %v4409_v34 = vpop.permute.xlu0 %1753 }
 0x1e5   : > { %2201 = vperm.xlu0 %2830, %v1643_v59   ;;  %2166 = vperm.xlu1 %2831, %v1636_v49   ;;  %v1523_v59 = vld [vmem:[%s4348_s25 + $0x98] sm:$0xff]  ;;  %v1589_v49 = vmul.f32 %v4171_v54, %v3785_v24  ;;  %v1646_v54 = vsub.f32 %v1518_v48, %v1582_v3  ;;  %v5466_v3 = vld [vmem:[#allocation48_spill] sm:$0xff] }
 0x1e6   : > { %v1651_v55 = vsub.f32 %v1523_v59, %v1587_v60  ;;  %v5464_v59 = vld [vmem:[#allocation43_spill] sm:$0xff] }
 0x1e7   : > { %v1653_v28 = vsub.f32 %v1525_v31, %v1589_v49  ;;  %v5465_v31 = vld [vmem:[#allocation54_spill] sm:$0xff] }
 0x1e8   : > { %v4417_v51 = vpop.permute.xlu1 %1733  ;;  %v4419_v42 = vpop.permute.xlu0 %1763  ;;  %v1588_v48 = vmul.f32 %v5466_v3, %v5465_v31  ;;  %v1528_v3 = vld [vmem:[%s4348_s25 + $0xc0] sm:$0xff] }
 0x1e9   : > { %2211 = vperm.xlu0 %2830, %v1645_v56   ;;  %2176 = vperm.xlu1 %2831, %v1638_v33   ;;  %v1591_v56 = vmul.f32 %v4179_v12, %v3799_v32  ;;  %v1527_v33 = vld [vmem:[%s4348_s25 + $0xb8] sm:$0xff]  ;;  %v1648_v12 = vsub.f32 %v1520_v1, %v1584_v15 }
 0x1eb   : > { %v1655_v44 = vsub.f32 %v1527_v33, %v1591_v56  ;;  %v5468_v33 = vld [vmem:[#allocation46_spill] sm:$0xff] }
 0x1ec   : > { %v4427_v43 = vpop.permute.xlu1 %1738  ;;  %v4429_v50 = vpop.permute.xlu0 %1773 }
 0x1ed   : > { %2221 = vperm.xlu0 %2830, %v1647_v37   ;;  %2186 = vperm.xlu1 %2831, %v1640_v47   ;;  %v5460_v37 = vld [vmem:[#allocation42_spill] sm:$0xff] }
 0x1ee   : > { %v1593_v41 = vmul.f32 %v5460_v37, %v5459_v0  ;;  %v1533_v0 = vld [vmem:[%s4348_s25 + $0xe8] sm:$0xff] }
 0x1ef   : > { %v5469_v37 = vld [vmem:[#allocation55_spill] sm:$0xff] }
 0x1f0   : > { %v4437_v29 = vpop.permute.xlu1 %1748  ;;  %v4439_v58 = vpop.permute.xlu0 %1783  ;;  %v1657_v60 = vsub.f32 %v1529_v9, %v1593_v41  ;;  %v5470_v41 = vld [vmem:[#allocation49_spill] sm:$0xff]  ;;  %v1526_v9 = vld [vmem:[%s4348_s25 + $0xb0] sm:$0xff] }
 0x1f1   : > { %2231 = vperm.xlu0 %2830, %v1649_v2   ;;  %2196 = vperm.xlu1 %2831, %v1642_v40   ;;  %v1586_v2 = vmul.f32 %v5462_v6, %v5461_v38  ;;  %v5463_v40 = vld [vmem:[#allocation3_spill] sm:$0xff] }
 0x1f2   : > { %v1595_v27 = vmul.f32 %v5464_v59, %v5463_v40  ;;  %v5471_v6 = vld [vmem:[#allocation7_spill] sm:$0xff] }
 0x1f3   : > { %v1650_v49 = vsub.f32 %v1522_v25, %v1586_v2  ;;  %v5472_v2 = vld [vmem:[#allocation47_spill] sm:$0xff] }
 0x1f4   : > { %v4447_v21 = vpop.permute.xlu1 %1758  ;;  %v4449_v8 = vpop.permute.xlu0 %1793  ;;  %v1599_v25 = vmul.f32 %v5472_v2, %v5471_v6  ;;  %v5479_v6 = vld [vmem:[#allocation11_spill] sm:$0xff]  ;;  %v5480_v2 = vld [vmem:[#allocation56_spill] sm:$0xff] }
 0x1f5   : > { %2241 = vperm.xlu0 %2830, %v1651_v55   ;;  %2206 = vperm.xlu1 %2831, %v1644_v63   ;;  %v1531_v63 = vld [vmem:[%s4348_s25 + $0xd8] sm:$0xff] }
 0x1f6   : > { %v1659_v56 = vsub.f32 %v1531_v63, %v1595_v27  ;;  %v1535_v27 = vld [vmem:[%s4348_s25 + $0xf8] sm:$0xff]  ;;  %v5474_v63 = vld [vmem:[#allocation51_spill] sm:$0xff] }
 0x1f8   : > { %v4457_v46 = vpop.permute.xlu1 %1768  ;;  %v4459_v24 = vpop.permute.xlu0 %1803 }
 0x1f9   : > { %2251 = vperm.xlu0 %2830, %v1653_v28   ;;  %2216 = vperm.xlu1 %2831, %v1646_v54   ;;  %v1524_v28 = vld [vmem:[%s4348_s25 + $0xa0] sm:$0xff] }
 0x1fa   : > { %v5467_v54 = vld [vmem:[#allocation6_spill] sm:$0xff] }
 0x1fb   : > { %v1597_v13 = vmul.f32 %v5468_v33, %v5467_v54 }
 0x1fc   : > { %v4467_v47 = vpop.permute.xlu1 %1778  ;;  %v4469_v32 = vpop.permute.xlu0 %1813 }
 0x1fd   : > { %2261 = vperm.xlu0 %2830, %v1655_v44   ;;  %2226 = vperm.xlu1 %2831, %v1648_v12   ;;  %v1652_v44 = vsub.f32 %v1524_v28, %v1588_v48  ;;  %v1590_v12 = vmul.f32 %v5470_v41, %v5469_v37  ;;  %v1661_v38 = vsub.f32 %v1533_v0, %v1597_v13  ;;  %v5475_v28 = vld [vmem:[#allocation10_spill] sm:$0xff]  ;;  %v1537_v0 = vld [vmem:[%s4348_s25 + $0x108] sm:$0xff]  ;;  %v5477_v37 = vld [vmem:[#allocation5_spill] sm:$0xff] }
 0x1fe   : > { %v1663_v48 = vsub.f32 %v1535_v27, %v1599_v25  ;;  %v5478_v41 = vld [vmem:[#allocation52_spill] sm:$0xff]  ;;  %v1603_v25 = vmul.f32 %v5480_v2, %v5479_v6  ;;  %v1541_v2 = vld [vmem:[%s4348_s25 + $0x128] sm:$0xff] }
 0x1ff   : > { %v1654_v59 = vsub.f32 %v1526_v9, %v1590_v12  ;;  %v1594_v12 = vmul.f32 %v5478_v41, %v5477_v37  ;;  %v1530_v9 = vld [vmem:[%s4348_s25 + $0xd0] sm:$0xff]  ;;  %v5485_v37 = vld [vmem:[#allocation58_spill] sm:$0xff] }
 0x200   : > { %v4477_v45 = vpop.permute.xlu1 %1788  ;;  %v4479_v55 = vpop.permute.xlu0 %1823 }
 0x201   : > { %2271 = vperm.xlu0 %2830, %v1657_v60   ;;  %2236 = vperm.xlu1 %2831, %v1650_v49   ;;  %v5473_v49 = vld [vmem:[#allocation4_spill] sm:$0xff] }
 0x202   : > { %v1592_v31 = vmul.f32 %v5474_v63, %v5473_v49  ;;  %v1658_v49 = vsub.f32 %v1530_v9, %v1594_v12  ;;  %v1539_v63 = vld [vmem:[%s4348_s25 + $0x118] sm:$0xff]  ;;  %v5489_v9 = vld [vmem:[#allocation59_spill] sm:$0xff] }
 0x203   : > { %v5488_v12 = vld [vmem:[#allocation9_spill] sm:$0xff] }
 0x204   : > { %v4487_v15 = vpop.permute.xlu1 %1798  ;;  %v4489_v1 = vpop.permute.xlu0 %1833 }
 0x205   : > { %2281 = vperm.xlu0 %2830, %v1659_v56   ;;  %2246 = vperm.xlu1 %2831, %v1652_v44   ;;  %v5476_v56 = vld [vmem:[#allocation50_spill] sm:$0xff]  ;;  %v1656_v44 = vsub.f32 %v1528_v3, %v1592_v31  ;;  %v5482_v31 = vld [vmem:[#allocation8_spill] sm:$0xff]  ;;  %v5483_v3 = vld [vmem:[#allocation57_spill] sm:$0xff] }
 0x206   : > { %v1601_v54 = vmul.f32 %v5476_v56, %v5475_v28  ;;  %v1596_v28 = vmul.f32 %v5483_v3, %v5482_v31  ;;  %v1532_v56 = vld [vmem:[%s4348_s25 + $0xe0] sm:$0xff]  ;;  %v1534_v31 = vld [vmem:[%s4348_s25 + $0xf0] sm:$0xff] }
 0x208   : > { %v4497_v60 = vpop.permute.xlu1 %1808  ;;  %v4499_v40 = vpop.permute.xlu0 %1843  ;;  %v1660_v6 = vsub.f32 %v1532_v56, %v1596_v28  ;;  %v5494_v28 = vld [vmem:[#allocation61_spill] sm:$0xff] }
 0x209   : > { %2291 = vperm.xlu0 %2830, %v1661_v38   ;;  %2256 = vperm.xlu1 %2831, %v1654_v59   ;;  %v1665_v38 = vsub.f32 %v1537_v0, %v1601_v54 }
 0x20c   : > { %v4507_v33 = vpop.permute.xlu1 %1818  ;;  %v4509_v13 = vpop.permute.xlu0 %1853 }
 0x20d   : > { %2301 = vperm.xlu0 %2830, %v1663_v48   ;;  %2266 = vperm.xlu1 %2831, %v1656_v44   ;;  %v1667_v48 = vsub.f32 %v1539_v63, %v1603_v25  ;;  %v5484_v44 = vld [vmem:[#allocation14_spill] sm:$0xff]  ;;  %v5491_v25 = vld [vmem:[#allocation60_spill] sm:$0xff] }
 0x20e   : > { %v1605_v54 = vmul.f32 %v5485_v37, %v5484_v44 }
 0x210   : > { %v4517_v59 = vpop.permute.xlu1 %1828  ;;  %v4519_v27 = vpop.permute.xlu0 %1863 }
 0x211   : > { %5481 = vst [vmem:[#allocation44_spill] sm:$0xff] %v4517_v59  ;;  %2311 = vperm.xlu0 %2830, %v1665_v38   ;;  %2276 = vperm.xlu1 %2831, %v1658_v49   ;;  %v1598_v59 = vmul.f32 %v5489_v9, %v5488_v12  ;;  %v1669_v38 = vsub.f32 %v1541_v2, %v1605_v54  ;;  %v5490_v49 = vld [vmem:[#allocation15_spill] sm:$0xff]  ;;  %v1536_v12 = vld [vmem:[%s4348_s25 + $0x100] sm:$0xff] }
 0x212   : > { %v1607_v63 = vmul.f32 %v5491_v25, %v5490_v49  ;;  %v5498_v25 = vld [vmem:[#allocation13_spill] sm:$0xff] }
 0x213   : > { %v1662_v37 = vsub.f32 %v1534_v31, %v1598_v59  ;;  %v5499_v59 = vld [vmem:[#allocation62_spill] sm:$0xff] }
 0x214   : > { %v4527_v0 = vpop.permute.xlu1 %1838  ;;  %v4529_v41 = vpop.permute.xlu0 %1873  ;;  %v1602_v31 = vmul.f32 %v5499_v59, %v5498_v25  ;;  %v1540_v25 = vld [vmem:[%s4348_s25 + $0x120] sm:$0xff] }
 0x215   : > { %5486 = vst [vmem:[#allocation2_spill] sm:$0xff] %v4527_v0  ;;  %5487 = vst [vmem:[#allocation42_spill] sm:$0xff] %v4529_v41  ;;  %2321 = vperm.xlu0 %2830, %v1667_v48   ;;  %2286 = vperm.xlu1 %2831, %v1660_v6   ;;  %v5493_v0 = vld [vmem:[#allocation12_spill] sm:$0xff]  ;;  %v1543_v41 = vld [vmem:[%s4348_s25 + $0x138] sm:$0xff] }
 0x216   : > { %v1600_v56 = vmul.f32 %v5494_v28, %v5493_v0  ;;  %v1671_v48 = vsub.f32 %v1543_v41, %v1607_v63  ;;  %v5495_v6 = vld [vmem:[#allocation18_spill] sm:$0xff]  ;;  %v1538_v0 = vld [vmem:[%s4348_s25 + $0x110] sm:$0xff]  ;;  %v5501_v41 = vld [vmem:[#allocation63_spill] sm:$0xff] }
 0x217   : > { %v1609_v54 = vmul.f32 %v4251_v35, %v5495_v6  ;;  %v1666_v6 = vsub.f32 %v1538_v0, %v1602_v31  ;;  %v5510_v31 = vld [vmem:[#allocation66_spill] sm:$0xff] }
 0x218   : > { %v4537_v3 = vpop.permute.xlu1 %1848  ;;  %v4539_v44 = vpop.permute.xlu0 %1883  ;;  %v1664_v49 = vsub.f32 %v1536_v12, %v1600_v56  ;;  %v5505_v56 = vld [vmem:[#allocation64_spill] sm:$0xff] }
 0x219   : > { %5492 = vst [vmem:[#allocation53_spill] sm:$0xff] %v4537_v3  ;;  %2331 = vperm.xlu0 %2830, %v1669_v38   ;;  %2296 = vperm.xlu1 %2831, %v1662_v37   ;;  %v1545_v3 = vld [vmem:[%s4348_s25 + $0x148] sm:$0xff] }
 0x21a   : > { %v1673_v38 = vsub.f32 %v1545_v3, %v1609_v54  ;;  %v5500_v37 = vld [vmem:[#allocation19_spill] sm:$0xff]  ;;  %v5507_v3 = vld [vmem:[#allocation65_spill] sm:$0xff] }
 0x21b   : > { %v1611_v63 = vmul.f32 %v5501_v41, %v5500_v37 }
 0x21c   : > { %v4547_v2 = vpop.permute.xlu1 %1858  ;;  %v4549_v9 = vpop.permute.xlu0 %1893 }
 0x21d   : > { %5496 = vst [vmem:[#allocation45_spill] sm:$0xff] %v4547_v2  ;;  %5497 = vst [vmem:[#allocation3_spill] sm:$0xff] %v4549_v9  ;;  %2341 = vperm.xlu0 %2830, %v1671_v48   ;;  %2306 = vperm.xlu1 %2831, %v1664_v49   ;;  %v5504_v2 = vld [vmem:[#allocation16_spill] sm:$0xff]  ;;  %v1547_v9 = vld [vmem:[%s4348_s25 + $0x158] sm:$0xff] }
 0x21e   : > { %v1604_v12 = vmul.f32 %v5505_v56, %v5504_v2  ;;  %v1675_v48 = vsub.f32 %v1547_v9, %v1611_v63  ;;  %v5506_v49 = vld [vmem:[#allocation22_spill] sm:$0xff]  ;;  %v1542_v2 = vld [vmem:[%s4348_s25 + $0x130] sm:$0xff] }
 0x21f   : > { %v1613_v54 = vmul.f32 %v5507_v3, %v5506_v49  ;;  %v5514_v3 = vld [vmem:[#allocation20_spill] sm:$0xff] }
 0x220   : > { %v4557_v28 = vpop.permute.xlu1 %1868  ;;  %v4559_v35 = vpop.permute.xlu0 %1903  ;;  %v1668_v41 = vsub.f32 %v1540_v25, %v1604_v12  ;;  %v5515_v12 = vld [vmem:[#allocation67_spill] sm:$0xff] }
 0x221   : > { %5502 = vst [vmem:[#allocation43_spill] sm:$0xff] %v4557_v28  ;;  %5503 = vst [vmem:[#allocation54_spill] sm:$0xff] %v4559_v35  ;;  %2351 = vperm.xlu0 %2830, %v1673_v38   ;;  %2316 = vperm.xlu1 %2831, %v1666_v6   ;;  %v5509_v28 = vld [vmem:[#allocation17_spill] sm:$0xff]  ;;  %v1549_v35 = vld [vmem:[%s4348_s25 + $0x168] sm:$0xff]  ;;  %v1608_v25 = vmul.f32 %v5515_v12, %v5514_v3 }
 0x222   : > { %v1606_v0 = vmul.f32 %v5510_v31, %v5509_v28  ;;  %v1677_v38 = vsub.f32 %v1549_v35, %v1613_v54  ;;  %v5511_v6 = vld [vmem:[#allocation23_spill] sm:$0xff]  ;;  %v1544_v28 = vld [vmem:[%s4348_s25 + $0x140] sm:$0xff]  ;;  %v5517_v35 = vld [vmem:[#allocation68_spill] sm:$0xff] }
 0x223   : > { %v1615_v9 = vmul.f32 %v4275_v53, %v5511_v6  ;;  %v1672_v6 = vsub.f32 %v1544_v28, %v1608_v25  ;;  %v1546_v3 = vld [vmem:[%s4348_s25 + $0x150] sm:$0xff]  ;;  %v5525_v25 = vld [vmem:[#allocation71_spill] sm:$0xff] }
 0x224   : > { %v4567_v59 = vpop.permute.xlu1 %1878  ;;  %v4569_v37 = vpop.permute.xlu0 %1913  ;;  %v1670_v49 = vsub.f32 %v1542_v2, %v1606_v0  ;;  %v5521_v0 = vld [vmem:[#allocation69_spill] sm:$0xff] }
 0x225   : > { %5508 = vst [vmem:[#allocation48_spill] sm:$0xff] %v4567_v59  ;;  %2361 = vperm.xlu0 %2830, %v1675_v48   ;;  %2326 = vperm.xlu1 %2831, %v1668_v41   ;;  %v1551_v59 = vld [vmem:[%s4348_s25 + $0x178] sm:$0xff]  ;;  %v5516_v41 = vld [vmem:[#allocation26_spill] sm:$0xff] }
 0x226   : > { %v1679_v48 = vsub.f32 %v1551_v59, %v1615_v9  ;;  %v1617_v54 = vmul.f32 %v5517_v35, %v5516_v41  ;;  %v5523_v59 = vld [vmem:[#allocation70_spill] sm:$0xff] }
 0x228   : > { %v4577_v63 = vpop.permute.xlu1 %1888  ;;  %v4579_v56 = vpop.permute.xlu0 %1923 }
 0x229   : > { %5512 = vst [vmem:[#allocation6_spill] sm:$0xff] %v4577_v63  ;;  %5513 = vst [vmem:[#allocation46_spill] sm:$0xff] %v4579_v56  ;;  %2371 = vperm.xlu0 %2830, %v1677_v38   ;;  %2336 = vperm.xlu1 %2831, %v1670_v49   ;;  %v5520_v63 = vld [vmem:[#allocation21_spill] sm:$0xff]  ;;  %v1553_v56 = vld [vmem:[%s4348_s25 + $0x188] sm:$0xff] }
 0x22a   : > { %v1610_v2 = vmul.f32 %v5521_v0, %v5520_v63  ;;  %v1681_v38 = vsub.f32 %v1553_v56, %v1617_v54  ;;  %v5522_v49 = vld [vmem:[#allocation27_spill] sm:$0xff]  ;;  %v1548_v63 = vld [vmem:[%s4348_s25 + $0x160] sm:$0xff] }
 0x22b   : > { %v1619_v9 = vmul.f32 %v5523_v59, %v5522_v49  ;;  %v5528_v59 = vld [vmem:[#allocation25_spill] sm:$0xff] }
 0x22c   : > { %v4587_v31 = vpop.permute.xlu1 %1898  ;;  %v4589_v53 = vpop.permute.xlu0 %1933  ;;  %v1674_v35 = vsub.f32 %v1546_v3, %v1610_v2  ;;  %v1614_v2 = vmul.f32 %v4301_v7, %v5528_v59  ;;  %v1557_v3 = vld [vmem:[%s4348_s25 + $0x1a8] sm:$0xff]  ;;  %v1552_v7 = vld [vmem:[%s4348_s25 + $0x180] sm:$0xff] }
 0x22d   : > { %5518 = vst [vmem:[#allocation55_spill] sm:$0xff] %v4587_v31  ;;  %5519 = vst [vmem:[#allocation49_spill] sm:$0xff] %v4589_v53  ;;  %2381 = vperm.xlu0 %2830, %v1679_v48   ;;  %2346 = vperm.xlu1 %2831, %v1672_v6   ;;  %v5524_v31 = vld [vmem:[#allocation24_spill] sm:$0xff]  ;;  %v1555_v53 = vld [vmem:[%s4348_s25 + $0x198] sm:$0xff] }
 0x22e   : > { %v1612_v28 = vmul.f32 %v5525_v25, %v5524_v31  ;;  %v1683_v48 = vsub.f32 %v1555_v53, %v1619_v9  ;;  %v5526_v6 = vld [vmem:[#allocation30_spill] sm:$0xff]  ;;  %v1550_v31 = vld [vmem:[%s4348_s25 + $0x170] sm:$0xff] }
 0x22f   : > { %v1621_v56 = vmul.f32 %v4299_v10, %v5526_v6  ;;  %v1678_v25 = vsub.f32 %v1550_v31, %v1614_v2  ;;  %v5530_v6 = vld [vmem:[#allocation28_spill] sm:$0xff]  ;;  %v1561_v31 = vld [vmem:[%s4348_s25 + $0x1c8] sm:$0xff] }
 0x230   : > { %v4597_v12 = vpop.permute.xlu1 %1908  ;;  %v4599_v41 = vpop.permute.xlu0 %1943  ;;  %v1676_v49 = vsub.f32 %v1548_v63, %v1612_v28  ;;  %v5531_v28 = vld [vmem:[#allocation72_spill] sm:$0xff] }
 0x231   : > { %2391 = vperm.xlu0 %2830, %v1681_v38   ;;  %2356 = vperm.xlu1 %2831, %v1674_v35   ;;  %v1685_v38 = vsub.f32 %v1557_v3, %v1621_v56  ;;  %v5529_v35 = vld [vmem:[#allocation31_spill] sm:$0xff]  ;;  %v1616_v63 = vmul.f32 %v5531_v28, %v5530_v6  ;;  %v1554_v6 = vld [vmem:[%s4348_s25 + $0x190] sm:$0xff] }
 0x232   : > { %v1623_v53 = vmul.f32 %v4307_v61, %v5529_v35  ;;  %v5534_v35 = vld [vmem:[#allocation29_spill] sm:$0xff] }
 0x233   : > { %v1680_v3 = vsub.f32 %v1552_v7, %v1616_v63  ;;  %v1618_v2 = vmul.f32 %v4317_v23, %v5534_v35  ;;  %v5537_v63 = vld [vmem:[#allocation73_spill] sm:$0xff]  ;;  %v1556_v23 = vld [vmem:[%s4348_s25 + $0x1a0] sm:$0xff] }
 0x234   : > { %v4607_v54 = vpop.permute.xlu1 %1918  ;;  %v4609_v0 = vpop.permute.xlu0 %1953 }
 0x235   : > { %5527 = vst [vmem:[#allocation7_spill] sm:$0xff] %v4607_v54  ;;  %2401 = vperm.xlu0 %2830, %v1683_v48   ;;  %2366 = vperm.xlu1 %2831, %v1676_v49   ;;  %v1559_v54 = vld [vmem:[%s4348_s25 + $0x1b8] sm:$0xff]  ;;  %v5532_v49 = vld [vmem:[#allocation34_spill] sm:$0xff]  ;;  %v1682_v28 = vsub.f32 %v1554_v6, %v1618_v2  ;;  %v1565_v6 = vld [vmem:[%s4348_s25 + $0x1e8] sm:$0xff] }
 0x236   : > { %v1687_v48 = vsub.f32 %v1559_v54, %v1623_v53  ;;  %v1625_v56 = vmul.f32 %v4315_v57, %v5532_v49  ;;  %v5536_v49 = vld [vmem:[#allocation32_spill] sm:$0xff] }
 0x237   : > { %v1620_v7 = vmul.f32 %v5537_v63, %v5536_v49  ;;  %v1558_v49 = vld [vmem:[%s4348_s25 + $0x1b0] sm:$0xff] }
 0x238   : > { %v4617_v9 = vpop.permute.xlu1 %1928  ;;  %v4619_v10 = vpop.permute.xlu0 %1963 }
 0x239   : > { %2411 = vperm.xlu0 %2830, %v1685_v38   ;;  %2376 = vperm.xlu1 %2831, %v1678_v25   ;;  %v1689_v38 = vsub.f32 %v1561_v31, %v1625_v56  ;;  %v5535_v25 = vld [vmem:[#allocation35_spill] sm:$0xff]  ;;  %v1684_v31 = vsub.f32 %v1556_v23, %v1620_v7  ;;  %v1560_v23 = vld [vmem:[%s4348_s25 + $0x1c0] sm:$0xff] }
 0x23a   : > { %v1627_v54 = vmul.f32 %v4323_v17, %v5535_v25  ;;  %v5539_v25 = vld [vmem:[#allocation33_spill] sm:$0xff] }
 0x23b   : > { %v1622_v2 = vmul.f32 %v4333_v22, %v5539_v25  ;;  %v1567_v22 = vld [vmem:[%s4348_s25 + $0x1f8] sm:$0xff] }
 0x23c   : > { %v4627_v59 = vpop.permute.xlu1 %1938  ;;  %v4629_v61 = vpop.permute.xlu0 %1973  ;;  %v5542_v25 = vld [vmem:[#allocation37_spill] sm:$0xff] }
 0x23d   : > { %5533 = vst [vmem:[#allocation47_spill] sm:$0xff] %v4627_v59  ;;  %2421 = vperm.xlu0 %2830, %v1687_v48   ;;  %2386 = vperm.xlu1 %2831, %v1680_v3   ;;  %v1563_v59 = vld [vmem:[%s4348_s25 + $0x1d8] sm:$0xff]  ;;  %v5538_v3 = vld [vmem:[#allocation38_spill] sm:$0xff]  ;;  %v1686_v63 = vsub.f32 %v1558_v49, %v1622_v2  ;;  %v1562_v2 = vld [vmem:[%s4348_s25 + $0x1d0] sm:$0xff] }
 0x23e   : > { %v1691_v48 = vsub.f32 %v1563_v59, %v1627_v54  ;;  %v1629_v56 = vmul.f32 %v4331_v11, %v5538_v3  ;;  %v5541_v3 = vld [vmem:[#allocation36_spill] sm:$0xff] }
 0x23f   : > { %v1624_v7 = vmul.f32 %v4341_v62, %v5541_v3  ;;  %v2993_v62 = vld [vmem:[%s3166_s18 + $0x10] sm:$0xff] }
 0x240   : > { %v4637_v53 = vpop.permute.xlu1 %1948  ;;  %v4639_v57 = vpop.permute.xlu0 %1983  ;;  %v2018_v49 = vmul.f32 %v2993_v62, %v4360_v16  ;;  %v5543_v3 = vld [vmem:[#allocation40_spill] sm:$0xff] }
 0x241   : > { %2431 = vperm.xlu0 %2830, %v1689_v38   ;;  %2396 = vperm.xlu1 %2831, %v1682_v28   ;;  %v1693_v38 = vsub.f32 %v1565_v6, %v1629_v56  ;;  %v5540_v28 = vld [vmem:[#allocation39_spill] sm:$0xff]  ;;  %v1626_v6 = vmul.f32 %v4356_v14, %v5542_v25  ;;  %v2996_v25 = vld [vmem:[%s3166_s18 + $0x38] sm:$0xff] }
 0x242   : > { %v1631_v59 = vmul.f32 %v4339_v36, %v5540_v28  ;;  %v1688_v36 = vsub.f32 %v1560_v23, %v1624_v7  ;;  %v1628_v7 = vmul.f32 %v4365_v4, %v5543_v3  ;;  %v2023_v62 = vmul.f32 %v2996_v25, %v4380_v5  ;;  %v2997_v3 = vld [vmem:[%s3166_s18 + $0x50] sm:$0xff]  ;;  %v2999_v25 = vld [vmem:[%s3166_s18] sm:$0xff] }
 0x244   : > { %v4647_v35 = vpop.permute.xlu1 %1958  ;;  %v4649_v17 = vpop.permute.xlu0 %1993 }
 0x245   : > { %2441 = vperm.xlu0 %2830, %v1691_v48   ;;  %2406 = vperm.xlu1 %2831, %v1684_v31   ;;  %v1695_v48 = vsub.f32 %v1567_v22, %v1631_v59 }
 0x248   : > { %v4657_v54 = vpop.permute.xlu1 %1968  ;;  %v4659_v11 = vpop.permute.xlu0 %2003 }
 0x249   : > { %2451 = vperm.xlu0 %2830, %v1693_v38   ;;  %2416 = vperm.xlu1 %2831, %v1686_v63   ;;  %v2994_v38 = vld [vmem:[%s3166_s18 + $0x18] sm:$0xff]  ;;  %v1690_v63 = vsub.f32 %v1562_v2, %v1626_v6 }
 0x24a   : > { %v2019_v28 = vmul.f32 %v2994_v38, %v4360_v16  ;;  %v2995_v16 = vld [vmem:[%s3166_s18 + $0x30] sm:$0xff] }
 0x24c   : > { %v4665_v56 = vpop.permute.xlu1 %1978  ;;  %v4667_v31 = vpop.permute.xlu0 %2013 }
 0x24d   : > { %2461 = vperm.xlu0 %2830, %v1695_v48   ;;  %2426 = vperm.xlu1 %2831, %v1688_v36   ;;  %v1564_v48 = vld [vmem:[%s4348_s25 + $0x1e0] sm:$0xff]  ;;  %v2022_v36 = vmul.f32 %v2995_v16, %v4380_v5  ;;  %v2026_v5 = vmul.f32 %v2997_v3, %v4397_v52 }
 0x24e   : > { %v1692_v2 = vsub.f32 %v1564_v48, %v1628_v7 }
 0x250   : > { %v4676_v59 = vpop.permute.xlu1 %1988  ;;  %v2152_v14 = vpop.permute.xlu0 %2151 }
 0x251   : > { %v2466_v22 = vadd.f32 %v2152_v14, %v2018_v49  ;;  %v2467_v23 = vadd.f32 %v2152_v14, %v2019_v28  ;;  %2436 = vperm.xlu1 %2831, %v1690_v63   ;;  %v5544_v49 = vld [vmem:[#allocation41_spill] sm:$0xff]  ;;  %v1566_v63 = vld [vmem:[%s4348_s25 + $0x1f0] sm:$0xff] }
 0x252   : > { %v1630_v38 = vmul.f32 %v4374_v30, %v5544_v49 }
 0x253   : > { %2594 = vst [vmem:[%s4683_s28 + $0x10] sm:$0xff] %v2466_v22  ;;  %2595 = vst.msk [vmem:[%s4683_s28 + $0x18] sm:$0xff] %vm351_vm0, %v2467_v23  ;;  %v2998_v22 = vld [vmem:[%s3166_s18 + $0x58] sm:$0xff] }
 0x254   : > { %v4695_v6 = vpop.permute.xlu1 %1998  ;;  %v2162_v4 = vpop.permute.xlu0 %2161  ;;  %v2027_v23 = vmul.f32 %v2998_v22, %v4397_v52  ;;  %v1694_v48 = vsub.f32 %v1566_v63, %v1630_v38 }
 0x255   : > { %v2470_v28 = vadd.f32 %v2162_v4, %v2022_v36  ;;  %v2471_v14 = vadd.f32 %v2162_v4, %v2023_v62  ;;  %2446 = vperm.xlu1 %2831, %v1692_v2   ;;  %v2016_v62 = vmul.f32 %v2999_v25, %v4387_v39  ;;  %v3000_v4 = vld [vmem:[%s3166_s18 + $0x8] sm:$0xff]  ;;  %v3001_v2 = vld [vmem:[%s3166_s18 + $0x70] sm:$0xff] }
 0x256   : > { %v2017_v52 = vmul.f32 %v3000_v4, %v4387_v39  ;;  %v2030_v49 = vmul.f32 %v3001_v2, %v4417_v51 }
 0x257   : > { %2598 = vst [vmem:[%s4683_s28 + $0x30] sm:$0xff] %v2470_v28  ;;  %2599 = vst.msk [vmem:[%s4683_s28 + $0x38] sm:$0xff] %vm351_vm0, %v2471_v14  ;;  %v3002_v28 = vld [vmem:[%s3166_s18 + $0x78] sm:$0xff] }
 0x258   : > { %v4707_v30 = vpop.permute.xlu1 %2008  ;;  %v2172_v7 = vpop.permute.xlu0 %2171  ;;  %v2031_v38 = vmul.f32 %v3002_v28, %v4417_v51  ;;  %v3005_v51 = vld [vmem:[%s3166_s18 + $0x20] sm:$0xff] }
 0x259   : > { %v2474_v16 = vadd.f32 %v2172_v7, %v2026_v5  ;;  %v2475_v36 = vadd.f32 %v2172_v7, %v2027_v23  ;;  %2456 = vperm.xlu1 %2831, %v1694_v48   ;;  %v3003_v23 = vld [vmem:[%s3166_s18 + $0x90] sm:$0xff]  ;;  %v3004_v48 = vld [vmem:[%s3166_s18 + $0x98] sm:$0xff] }
 0x25a   : > { %v2034_v7 = vmul.f32 %v3003_v23, %v4399_v26  ;;  %v2035_v25 = vmul.f32 %v3004_v48, %v4399_v26 }
 0x25b   : > { %2602 = vst [vmem:[%s4683_s28 + $0x50] sm:$0xff] %v2474_v16  ;;  %2603 = vst.msk [vmem:[%s4683_s28 + $0x58] sm:$0xff] %vm351_vm0, %v2475_v36  ;;  %v2020_v16 = vmul.f32 %v3005_v51, %v4369_v20  ;;  %v3006_v36 = vld [vmem:[%s3166_s18 + $0x28] sm:$0xff] }
 0x25c   : > { %v2147_v14 = vpop.permute.xlu1 %2146  ;;  %v2182_v63 = vpop.permute.xlu0 %2181 }
 0x25d   : > { %v2464_v3 = vadd.f32 %v2147_v14, %v2016_v62  ;;  %v2465_v5 = vadd.f32 %v2147_v14, %v2017_v52  ;;  %v2478_v39 = vadd.f32 %v2182_v63, %v2030_v49  ;;  %v2479_v22 = vadd.f32 %v2182_v63, %v2031_v38  ;;  %v3007_v38 = vld [vmem:[%s3166_s18 + $0xb0] sm:$0xff]  ;;  %v3008_v63 = vld [vmem:[%s3166_s18 + $0xb8] sm:$0xff] }
 0x25e   : > { %v2021_v62 = vmul.f32 %v3006_v36, %v4369_v20  ;;  %v2038_v14 = vmul.f32 %v3007_v38, %v4409_v34  ;;  %v3009_v20 = vld [vmem:[%s3166_s18 + $0x40] sm:$0xff] }
 0x25f   : > { %2592 = vst [vmem:[%s4683_s28] sm:$0xff] %v2464_v3  ;;  %2593 = vst.msk [vmem:[%s4683_s28 + $0x8] sm:$0xff] %vm351_vm0, %v2465_v5  ;;  %v2039_v3 = vmul.f32 %v3008_v63, %v4409_v34  ;;  %v2024_v5 = vmul.f32 %v3009_v20, %v4389_v18 }
 0x260   : > { %2606 = vst [vmem:[%s4683_s28 + $0x70] sm:$0xff] %v2478_v39  ;;  %2607 = vst.msk [vmem:[%s4683_s28 + $0x78] sm:$0xff] %vm351_vm0, %v2479_v22  ;;  %v2192_v4 = vpop.permute.xlu0 %2191  ;;  %v2157_v26 = vpop.permute.xlu1 %2156  ;;  %v3010_v39 = vld [vmem:[%s3166_s18 + $0x48] sm:$0xff] }
 0x261   : > { %v2482_v52 = vadd.f32 %v2192_v4, %v2034_v7  ;;  %v2483_v2 = vadd.f32 %v2192_v4, %v2035_v25  ;;  %v2468_v49 = vadd.f32 %v2157_v26, %v2020_v16  ;;  %v2469_v28 = vadd.f32 %v2157_v26, %v2021_v62  ;;  %v3011_v16 = vld [vmem:[%s3166_s18 + $0xd0] sm:$0xff]  ;;  %v3012_v62 = vld [vmem:[%s3166_s18 + $0xd8] sm:$0xff] }
 0x262   : > { %v2025_v22 = vmul.f32 %v3010_v39, %v4389_v18  ;;  %v2042_v36 = vmul.f32 %v3011_v16, %v4419_v42  ;;  %v2043_v4 = vmul.f32 %v3012_v62, %v4419_v42  ;;  %v3013_v18 = vld [vmem:[%s3166_s18 + $0x60] sm:$0xff] }
 0x263   : > { %2610 = vst [vmem:[%s4683_s28 + $0x90] sm:$0xff] %v2482_v52  ;;  %2611 = vst.msk [vmem:[%s4683_s28 + $0x98] sm:$0xff] %vm351_vm0, %v2483_v2  ;;  %v2028_v26 = vmul.f32 %v3013_v18, %v4407_v19  ;;  %v3014_v52 = vld [vmem:[%s3166_s18 + $0x68] sm:$0xff] }
 0x264   : > { %2596 = vst [vmem:[%s4683_s28 + $0x20] sm:$0xff] %v2468_v49  ;;  %2597 = vst.msk [vmem:[%s4683_s28 + $0x28] sm:$0xff] %vm351_vm0, %v2469_v28  ;;  %v2202_v23 = vpop.permute.xlu0 %2201  ;;  %v2167_v34 = vpop.permute.xlu1 %2166  ;;  %v2029_v2 = vmul.f32 %v3014_v52, %v4407_v19  ;;  %v3017_v19 = vld [vmem:[%s3166_s18 + $0x80] sm:$0xff]  ;;  %v3022_v52 = vld [vmem:[%s3166_s18 + $0xa8] sm:$0xff] }
 0x265   : > { %v2486_v7 = vadd.f32 %v2202_v23, %v2038_v14  ;;  %v2487_v48 = vadd.f32 %v2202_v23, %v2039_v3  ;;  %v2472_v25 = vadd.f32 %v2167_v34, %v2024_v5  ;;  %v2473_v51 = vadd.f32 %v2167_v34, %v2025_v22  ;;  %v3015_v3 = vld [vmem:[%s3166_s18 + $0xf0] sm:$0xff]  ;;  %v3016_v5 = vld [vmem:[%s3166_s18 + $0xf8] sm:$0xff]  ;;  %v3018_v23 = vld [vmem:[%s3166_s18 + $0x88] sm:$0xff] }
 0x266   : > { %v2046_v20 = vmul.f32 %v3015_v3, %v4429_v50  ;;  %v2047_v39 = vmul.f32 %v3016_v5, %v4429_v50  ;;  %v2032_v22 = vmul.f32 %v3017_v19, %v4427_v43  ;;  %v2033_v34 = vmul.f32 %v3018_v23, %v4427_v43  ;;  %v3021_v43 = vld [vmem:[%s3166_s18 + $0xa0] sm:$0xff]  ;;  %v3026_v19 = vld [vmem:[%s3166_s18 + $0xc8] sm:$0xff] }
 0x267   : > { %2614 = vst [vmem:[%s4683_s28 + $0xb0] sm:$0xff] %v2486_v7  ;;  %2615 = vst.msk [vmem:[%s4683_s28 + $0xb8] sm:$0xff] %vm351_vm0, %v2487_v48 }
 0x268   : > { %2600 = vst [vmem:[%s4683_s28 + $0x40] sm:$0xff] %v2472_v25  ;;  %2601 = vst.msk [vmem:[%s4683_s28 + $0x48] sm:$0xff] %vm351_vm0, %v2473_v51  ;;  %v2212_v49 = vpop.permute.xlu0 %2211  ;;  %v2177_v42 = vpop.permute.xlu1 %2176 }
 0x269   : > { %v2490_v28 = vadd.f32 %v2212_v49, %v2042_v36  ;;  %v2491_v38 = vadd.f32 %v2212_v49, %v2043_v4  ;;  %v2476_v14 = vadd.f32 %v2177_v42, %v2028_v26  ;;  %v2477_v63 = vadd.f32 %v2177_v42, %v2029_v2  ;;  %v3019_v36 = vld [vmem:[%s3166_s18 + $0x110] sm:$0xff]  ;;  %v3020_v4 = vld [vmem:[%s3166_s18 + $0x118] sm:$0xff] }
 0x26a   : > { %v2050_v62 = vmul.f32 %v3019_v36, %v4439_v58  ;;  %v2051_v18 = vmul.f32 %v3020_v4, %v4439_v58  ;;  %v2036_v26 = vmul.f32 %v3021_v43, %v4437_v29  ;;  %v2037_v2 = vmul.f32 %v3022_v52, %v4437_v29  ;;  %v3025_v29 = vld [vmem:[%s3166_s18 + $0xc0] sm:$0xff]  ;;  %v3030_v4 = vld [vmem:[%s3166_s18 + $0xe8] sm:$0xff] }
 0x26b   : > { %2618 = vst [vmem:[%s4683_s28 + $0xd0] sm:$0xff] %v2490_v28  ;;  %2619 = vst.msk [vmem:[%s4683_s28 + $0xd8] sm:$0xff] %vm351_vm0, %v2491_v38 }
 0x26c   : > { %2604 = vst [vmem:[%s4683_s28 + $0x60] sm:$0xff] %v2476_v14  ;;  %2605 = vst.msk [vmem:[%s4683_s28 + $0x68] sm:$0xff] %vm351_vm0, %v2477_v63  ;;  %v2222_v7 = vpop.permute.xlu0 %2221  ;;  %v2187_v50 = vpop.permute.xlu1 %2186  ;;  %v3023_v63 = vld [vmem:[%s3166_s18 + $0x130] sm:$0xff] }
 0x26d   : > { %v2494_v48 = vadd.f32 %v2222_v7, %v2046_v20  ;;  %v2495_v25 = vadd.f32 %v2222_v7, %v2047_v39  ;;  %v2480_v51 = vadd.f32 %v2187_v50, %v2032_v22  ;;  %v2481_v16 = vadd.f32 %v2187_v50, %v2033_v34  ;;  %v3024_v20 = vld [vmem:[%s3166_s18 + $0x138] sm:$0xff] }
 0x26e   : > { %v2054_v3 = vmul.f32 %v3023_v63, %v4449_v8  ;;  %v2055_v5 = vmul.f32 %v3024_v20, %v4449_v8  ;;  %v2040_v39 = vmul.f32 %v3025_v29, %v4447_v21  ;;  %v2041_v22 = vmul.f32 %v3026_v19, %v4447_v21  ;;  %v3029_v21 = vld [vmem:[%s3166_s18 + $0xe0] sm:$0xff]  ;;  %v3034_v63 = vld [vmem:[%s3166_s18 + $0x108] sm:$0xff] }
 0x26f   : > { %2622 = vst [vmem:[%s4683_s28 + $0xf0] sm:$0xff] %v2494_v48  ;;  %2623 = vst.msk [vmem:[%s4683_s28 + $0xf8] sm:$0xff] %vm351_vm0, %v2495_v25  ;;  %v3027_v25 = vld [vmem:[%s3166_s18 + $0x150] sm:$0xff] }
 0x270   : > { %2608 = vst [vmem:[%s4683_s28 + $0x80] sm:$0xff] %v2480_v51  ;;  %2609 = vst.msk [vmem:[%s4683_s28 + $0x88] sm:$0xff] %vm351_vm0, %v2481_v16  ;;  %v2232_v49 = vpop.permute.xlu0 %2231  ;;  %v2197_v58 = vpop.permute.xlu1 %2196  ;;  %v2058_v51 = vmul.f32 %v3027_v25, %v4459_v24  ;;  %v3028_v16 = vld [vmem:[%s3166_s18 + $0x158] sm:$0xff] }
 0x271   : > { %v2498_v42 = vadd.f32 %v2232_v49, %v2050_v62  ;;  %v2499_v28 = vadd.f32 %v2232_v49, %v2051_v18  ;;  %v2484_v38 = vadd.f32 %v2197_v58, %v2036_v26  ;;  %v2485_v14 = vadd.f32 %v2197_v58, %v2037_v2  ;;  %v3031_v58 = vld [vmem:[%s3166_s18 + $0x170] sm:$0xff] }
 0x272   : > { %v2059_v36 = vmul.f32 %v3028_v16, %v4459_v24  ;;  %v2044_v62 = vmul.f32 %v3029_v21, %v4457_v46  ;;  %v2045_v18 = vmul.f32 %v3030_v4, %v4457_v46  ;;  %v3033_v46 = vld [vmem:[%s3166_s18 + $0x100] sm:$0xff] }
 0x273   : > { %2626 = vst [vmem:[%s4683_s28 + $0x110] sm:$0xff] %v2498_v42  ;;  %2627 = vst.msk [vmem:[%s4683_s28 + $0x118] sm:$0xff] %vm351_vm0, %v2499_v28  ;;  %v2062_v42 = vmul.f32 %v3031_v58, %v4469_v32  ;;  %v3032_v28 = vld [vmem:[%s3166_s18 + $0x178] sm:$0xff] }
 0x274   : > { %2612 = vst [vmem:[%s4683_s28 + $0xa0] sm:$0xff] %v2484_v38  ;;  %2613 = vst.msk [vmem:[%s4683_s28 + $0xa8] sm:$0xff] %vm351_vm0, %v2485_v14  ;;  %v2242_v23 = vpop.permute.xlu0 %2241  ;;  %v2207_v8 = vpop.permute.xlu1 %2206  ;;  %v2063_v38 = vmul.f32 %v3032_v28, %v4469_v32  ;;  %v2048_v14 = vmul.f32 %v3033_v46, %v4467_v47 }
 0x275   : > { %v2502_v34 = vadd.f32 %v2242_v23, %v2054_v3  ;;  %v2503_v7 = vadd.f32 %v2242_v23, %v2055_v5  ;;  %v2488_v50 = vadd.f32 %v2207_v8, %v2040_v39  ;;  %v2489_v48 = vadd.f32 %v2207_v8, %v2041_v22  ;;  %v3035_v22 = vld [vmem:[%s3166_s18 + $0x190] sm:$0xff]  ;;  %v3036_v8 = vld [vmem:[%s3166_s18 + $0x198] sm:$0xff] }
 0x276   : > { %v2049_v3 = vmul.f32 %v3034_v63, %v4467_v47  ;;  %v2066_v23 = vmul.f32 %v3035_v22, %v4479_v55  ;;  %v3037_v47 = vld [vmem:[%s3166_s18 + $0x120] sm:$0xff] }
 0x277   : > { %2630 = vst [vmem:[%s4683_s28 + $0x130] sm:$0xff] %v2502_v34  ;;  %2631 = vst.msk [vmem:[%s4683_s28 + $0x138] sm:$0xff] %vm351_vm0, %v2503_v7  ;;  %v2067_v34 = vmul.f32 %v3036_v8, %v4479_v55  ;;  %v2052_v7 = vmul.f32 %v3037_v47, %v4477_v45 }
 0x278   : > { %2616 = vst [vmem:[%s4683_s28 + $0xc0] sm:$0xff] %v2488_v50  ;;  %2617 = vst.msk [vmem:[%s4683_s28 + $0xc8] sm:$0xff] %vm351_vm0, %v2489_v48  ;;  %v2252_v43 = vpop.permute.xlu0 %2251  ;;  %v2217_v24 = vpop.permute.xlu1 %2216  ;;  %v3038_v50 = vld [vmem:[%s3166_s18 + $0x128] sm:$0xff] }
 0x279   : > { %v2506_v26 = vadd.f32 %v2252_v43, %v2058_v51  ;;  %v2507_v52 = vadd.f32 %v2252_v43, %v2059_v36  ;;  %v2492_v2 = vadd.f32 %v2217_v24, %v2044_v62  ;;  %v2493_v49 = vadd.f32 %v2217_v24, %v2045_v18  ;;  %v3039_v62 = vld [vmem:[%s3166_s18 + $0x1b0] sm:$0xff]  ;;  %v3040_v18 = vld [vmem:[%s3166_s18 + $0x1b8] sm:$0xff] }
 0x27a   : > { %v2053_v48 = vmul.f32 %v3038_v50, %v4477_v45  ;;  %v2070_v4 = vmul.f32 %v3039_v62, %v4489_v1  ;;  %v2071_v43 = vmul.f32 %v3040_v18, %v4489_v1  ;;  %v3041_v45 = vld [vmem:[%s3166_s18 + $0x140] sm:$0xff]  ;;  %v3050_v50 = vld [vmem:[%s3166_s18 + $0x188] sm:$0xff] }
 0x27b   : > { %2634 = vst [vmem:[%s4683_s28 + $0x150] sm:$0xff] %v2506_v26  ;;  %2635 = vst.msk [vmem:[%s4683_s28 + $0x158] sm:$0xff] %vm351_vm0, %v2507_v52  ;;  %v2056_v24 = vmul.f32 %v3041_v45, %v4487_v15  ;;  %v3042_v26 = vld [vmem:[%s3166_s18 + $0x148] sm:$0xff] }
 0x27c   : > { %2620 = vst [vmem:[%s4683_s28 + $0xe0] sm:$0xff] %v2492_v2  ;;  %2621 = vst.msk [vmem:[%s4683_s28 + $0xe8] sm:$0xff] %vm351_vm0, %v2493_v49  ;;  %v2262_v20 = vpop.permute.xlu0 %2261  ;;  %v2227_v32 = vpop.permute.xlu1 %2226  ;;  %v2057_v52 = vmul.f32 %v3042_v26, %v4487_v15  ;;  %v3045_v15 = vld [vmem:[%s3166_s18 + $0x160] sm:$0xff] }
 0x27d   : > { %v2510_v5 = vadd.f32 %v2262_v20, %v2062_v42  ;;  %v2511_v29 = vadd.f32 %v2262_v20, %v2063_v38  ;;  %v2496_v39 = vadd.f32 %v2227_v32, %v2048_v14  ;;  %v2497_v19 = vadd.f32 %v2227_v32, %v2049_v3  ;;  %v3043_v38 = vld [vmem:[%s3166_s18 + $0x1d0] sm:$0xff]  ;;  %v3044_v14 = vld [vmem:[%s3166_s18 + $0x1d8] sm:$0xff]  ;;  %v3046_v20 = vld [vmem:[%s3166_s18 + $0x168] sm:$0xff] }
 0x27e   : > { %v2074_v46 = vmul.f32 %v3043_v38, %v4499_v40  ;;  %v2075_v63 = vmul.f32 %v3044_v14, %v4499_v40  ;;  %v2060_v3 = vmul.f32 %v3045_v15, %v4497_v60  ;;  %v2061_v32 = vmul.f32 %v3046_v20, %v4497_v60  ;;  %v3049_v60 = vld [vmem:[%s3166_s18 + $0x180] sm:$0xff]  ;;  %v3058_v20 = vld [vmem:[%s3166_s18 + $0x1c8] sm:$0xff] }
 0x27f   : > { %2638 = vst [vmem:[%s4683_s28 + $0x170] sm:$0xff] %v2510_v5  ;;  %2639 = vst.msk [vmem:[%s4683_s28 + $0x178] sm:$0xff] %vm351_vm0, %v2511_v29  ;;  %v5547_v15 = vld [vmem:[#allocation2_spill] sm:$0xff] }
 0x280   : > { %2624 = vst [vmem:[%s4683_s28 + $0x100] sm:$0xff] %v2496_v39  ;;  %2625 = vst.msk [vmem:[%s4683_s28 + $0x108] sm:$0xff] %vm351_vm0, %v2497_v19  ;;  %v2272_v25 = vpop.permute.xlu0 %2271  ;;  %v2237_v55 = vpop.permute.xlu1 %2236 }
 0x281   : > { %v2514_v51 = vadd.f32 %v2272_v25, %v2066_v23  ;;  %v2515_v16 = vadd.f32 %v2272_v25, %v2067_v34  ;;  %v2500_v36 = vadd.f32 %v2237_v55, %v2052_v7  ;;  %v2501_v21 = vadd.f32 %v2237_v55, %v2053_v48  ;;  %v3047_v23 = vld [vmem:[%s3166_s18 + $0x1f0] sm:$0xff]  ;;  %v3048_v34 = vld [vmem:[%s3166_s18 + $0x1f8] sm:$0xff] }
 0x282   : > { %v2078_v8 = vmul.f32 %v3047_v23, %v4509_v13  ;;  %v2079_v47 = vmul.f32 %v3048_v34, %v4509_v13  ;;  %v2064_v7 = vmul.f32 %v3049_v60, %v4507_v33  ;;  %v2065_v48 = vmul.f32 %v3050_v50, %v4507_v33  ;;  %v3053_v33 = vld [vmem:[%s3166_s18 + $0x1a0] sm:$0xff]  ;;  %v3059_v23 = vld [vmem:[%s3166_s18 + $0x250] sm:$0xff]  ;;  %v3060_v34 = vld [vmem:[%s3166_s18 + $0x258] sm:$0xff] }
 0x283   : > { %2642 = vst [vmem:[%s4683_s28 + $0x190] sm:$0xff] %v2514_v51  ;;  %2643 = vst.msk [vmem:[%s4683_s28 + $0x198] sm:$0xff] %vm351_vm0, %v2515_v16  ;;  %v3061_v60 = vld [vmem:[%s3166_s18 + $0x1e0] sm:$0xff] }
 0x284   : > { %2628 = vst [vmem:[%s4683_s28 + $0x120] sm:$0xff] %v2500_v36  ;;  %2629 = vst.msk [vmem:[%s4683_s28 + $0x128] sm:$0xff] %vm351_vm0, %v2501_v21  ;;  %v2282_v2 = vpop.permute.xlu0 %2281  ;;  %v2247_v1 = vpop.permute.xlu1 %2246  ;;  %v3051_v21 = vld [vmem:[%s3166_s18 + $0x210] sm:$0xff] }
 0x285   : > { %v2518_v49 = vadd.f32 %v2282_v2, %v2070_v4  ;;  %v2519_v58 = vadd.f32 %v2282_v2, %v2071_v43  ;;  %v2504_v42 = vadd.f32 %v2247_v1, %v2056_v24  ;;  %v2505_v28 = vadd.f32 %v2247_v1, %v2057_v52  ;;  %v3052_v4 = vld [vmem:[%s3166_s18 + $0x218] sm:$0xff]  ;;  %v5545_v43 = vld [vmem:[#allocation44_spill] sm:$0xff]  ;;  %v3054_v24 = vld [vmem:[%s3166_s18 + $0x1a8] sm:$0xff] }
 0x286   : > { %v2082_v62 = vmul.f32 %v3051_v21, %v4519_v27  ;;  %v2083_v18 = vmul.f32 %v3052_v4, %v4519_v27  ;;  %v2068_v45 = vmul.f32 %v3053_v33, %v5545_v43  ;;  %v2069_v26 = vmul.f32 %v3054_v24, %v5545_v43  ;;  %v3063_v21 = vld [vmem:[%s3166_s18 + $0x270] sm:$0xff]  ;;  %v3065_v43 = vld [vmem:[%s3166_s18 + $0x200] sm:$0xff] }
 0x287   : > { %2646 = vst [vmem:[%s4683_s28 + $0x1b0] sm:$0xff] %v2518_v49  ;;  %2647 = vst.msk [vmem:[%s4683_s28 + $0x1b8] sm:$0xff] %vm351_vm0, %v2519_v58 }
 0x288   : > { %2632 = vst [vmem:[%s4683_s28 + $0x140] sm:$0xff] %v2504_v42  ;;  %2633 = vst.msk [vmem:[%s4683_s28 + $0x148] sm:$0xff] %vm351_vm0, %v2505_v28  ;;  %v2292_v5 = vpop.permute.xlu0 %2291  ;;  %v2257_v40 = vpop.permute.xlu1 %2256  ;;  %v3055_v42 = vld [vmem:[%s3166_s18 + $0x230] sm:$0xff]  ;;  %v5546_v28 = vld [vmem:[#allocation42_spill] sm:$0xff] }
 0x289   : > { %v2522_v29 = vadd.f32 %v2292_v5, %v2074_v46  ;;  %v2523_v39 = vadd.f32 %v2292_v5, %v2075_v63  ;;  %v2508_v19 = vadd.f32 %v2257_v40, %v2060_v3  ;;  %v2509_v22 = vadd.f32 %v2257_v40, %v2061_v32  ;;  %v3056_v46 = vld [vmem:[%s3166_s18 + $0x238] sm:$0xff]  ;;  %v3057_v63 = vld [vmem:[%s3166_s18 + $0x1c0] sm:$0xff] }
 0x28a   : > { %v2086_v38 = vmul.f32 %v3055_v42, %v5546_v28  ;;  %v2087_v14 = vmul.f32 %v3056_v46, %v5546_v28  ;;  %v2072_v3 = vmul.f32 %v3057_v63, %v5547_v15  ;;  %v2073_v32 = vmul.f32 %v3058_v20, %v5547_v15  ;;  %v3067_v28 = vld [vmem:[%s3166_s18 + $0x290] sm:$0xff]  ;;  %v3069_v15 = vld [vmem:[%s3166_s18 + $0x220] sm:$0xff] }
 0x28b   : > { %2650 = vst [vmem:[%s4683_s28 + $0x1d0] sm:$0xff] %v2522_v29  ;;  %2651 = vst.msk [vmem:[%s4683_s28 + $0x1d8] sm:$0xff] %vm351_vm0, %v2523_v39 }
 0x28c   : > { %2636 = vst [vmem:[%s4683_s28 + $0x160] sm:$0xff] %v2508_v19  ;;  %2637 = vst.msk [vmem:[%s4683_s28 + $0x168] sm:$0xff] %vm351_vm0, %v2509_v22  ;;  %v2302_v25 = vpop.permute.xlu0 %2301  ;;  %v2267_v13 = vpop.permute.xlu1 %2266 }
 0x28d   : > { %v2526_v55 = vadd.f32 %v2302_v25, %v2078_v8  ;;  %v2527_v51 = vadd.f32 %v2302_v25, %v2079_v47  ;;  %v2512_v16 = vadd.f32 %v2267_v13, %v2064_v7  ;;  %v2513_v36 = vadd.f32 %v2267_v13, %v2065_v48  ;;  %v5548_v7 = vld [vmem:[#allocation53_spill] sm:$0xff]  ;;  %v3062_v48 = vld [vmem:[%s3166_s18 + $0x1e8] sm:$0xff] }
 0x28e   : > { %v2090_v8 = vmul.f32 %v3059_v23, %v4539_v44  ;;  %v2091_v47 = vmul.f32 %v3060_v34, %v4539_v44  ;;  %v2076_v50 = vmul.f32 %v3061_v60, %v5548_v7  ;;  %v2077_v25 = vmul.f32 %v3062_v48, %v5548_v7  ;;  %v3073_v7 = vld [vmem:[%s3166_s18 + $0x240] sm:$0xff] }
 0x28f   : > { %2654 = vst [vmem:[%s4683_s28 + $0x1f0] sm:$0xff] %v2526_v55  ;;  %2655 = vst.msk [vmem:[%s4683_s28 + $0x1f8] sm:$0xff] %vm351_vm0, %v2527_v51 }
 0x290   : > { %2640 = vst [vmem:[%s4683_s28 + $0x180] sm:$0xff] %v2512_v16  ;;  %2641 = vst.msk [vmem:[%s4683_s28 + $0x188] sm:$0xff] %vm351_vm0, %v2513_v36  ;;  %v2312_v52 = vpop.permute.xlu0 %2311  ;;  %v2277_v27 = vpop.permute.xlu1 %2276 }
 0x291   : > { %v2530_v2 = vadd.f32 %v2312_v52, %v2082_v62  ;;  %v2531_v1 = vadd.f32 %v2312_v52, %v2083_v18  ;;  %v2516_v49 = vadd.f32 %v2277_v27, %v2068_v45  ;;  %v2517_v58 = vadd.f32 %v2277_v27, %v2069_v26  ;;  %v5549_v62 = vld [vmem:[#allocation3_spill] sm:$0xff]  ;;  %v3064_v18 = vld [vmem:[%s3166_s18 + $0x278] sm:$0xff] }
 0x292   : > { %v2094_v4 = vmul.f32 %v3063_v21, %v5549_v62  ;;  %v2095_v33 = vmul.f32 %v3064_v18, %v5549_v62  ;;  %v5550_v45 = vld [vmem:[#allocation45_spill] sm:$0xff]  ;;  %v3066_v26 = vld [vmem:[%s3166_s18 + $0x208] sm:$0xff]  ;;  %v3075_v21 = vld [vmem:[%s3166_s18 + $0x2d0] sm:$0xff] }
 0x293   : > { %2658 = vst [vmem:[%s4683_s28 + $0x210] sm:$0xff] %v2530_v2  ;;  %2659 = vst.msk [vmem:[%s4683_s28 + $0x218] sm:$0xff] %vm351_vm0, %v2531_v1  ;;  %v2080_v24 = vmul.f32 %v3065_v43, %v5550_v45  ;;  %v2081_v52 = vmul.f32 %v3066_v26, %v5550_v45  ;;  %v5554_v62 = vld [vmem:[#allocation46_spill] sm:$0xff]  ;;  %v3076_v18 = vld [vmem:[%s3166_s18 + $0x2d8] sm:$0xff] }
 0x294   : > { %2644 = vst [vmem:[%s4683_s28 + $0x1a0] sm:$0xff] %v2516_v49  ;;  %2645 = vst.msk [vmem:[%s4683_s28 + $0x1a8] sm:$0xff] %vm351_vm0, %v2517_v58  ;;  %v2322_v5 = vpop.permute.xlu0 %2321  ;;  %v2287_v40 = vpop.permute.xlu1 %2286  ;;  %v3077_v43 = vld [vmem:[%s3166_s18 + $0x260] sm:$0xff]  ;;  %v3078_v26 = vld [vmem:[%s3166_s18 + $0x268] sm:$0xff] }
 0x295   : > { %v2534_v29 = vadd.f32 %v2322_v5, %v2086_v38  ;;  %v2535_v39 = vadd.f32 %v2322_v5, %v2087_v14  ;;  %v2520_v19 = vadd.f32 %v2287_v40, %v2072_v3  ;;  %v2521_v22 = vadd.f32 %v2287_v40, %v2073_v32  ;;  %v5551_v38 = vld [vmem:[#allocation54_spill] sm:$0xff]  ;;  %v3068_v14 = vld [vmem:[%s3166_s18 + $0x298] sm:$0xff]  ;;  %v5552_v3 = vld [vmem:[#allocation43_spill] sm:$0xff] }
 0x296   : > { %v2098_v46 = vmul.f32 %v3067_v28, %v5551_v38  ;;  %v2099_v63 = vmul.f32 %v3068_v14, %v5551_v38  ;;  %v2084_v20 = vmul.f32 %v3069_v15, %v5552_v3  ;;  %v3070_v32 = vld [vmem:[%s3166_s18 + $0x228] sm:$0xff]  ;;  %v5555_v45 = vld [vmem:[#allocation6_spill] sm:$0xff]  ;;  %v3079_v28 = vld [vmem:[%s3166_s18 + $0x2f0] sm:$0xff] }
 0x297   : > { %2662 = vst [vmem:[%s4683_s28 + $0x230] sm:$0xff] %v2534_v29  ;;  %2663 = vst.msk [vmem:[%s4683_s28 + $0x238] sm:$0xff] %vm351_vm0, %v2535_v39  ;;  %v2085_v5 = vmul.f32 %v3070_v32, %v5552_v3  ;;  %v5556_v38 = vld [vmem:[#allocation49_spill] sm:$0xff]  ;;  %v3081_v15 = vld [vmem:[%s3166_s18 + $0x280] sm:$0xff] }
 0x298   : > { %2648 = vst [vmem:[%s4683_s28 + $0x1c0] sm:$0xff] %v2520_v19  ;;  %2649 = vst.msk [vmem:[%s4683_s28 + $0x1c8] sm:$0xff] %vm351_vm0, %v2521_v22  ;;  %v2332_v13 = vpop.permute.xlu0 %2331  ;;  %v2297_v44 = vpop.permute.xlu1 %2296  ;;  %v3080_v14 = vld [vmem:[%s3166_s18 + $0x2f8] sm:$0xff]  ;;  %v5557_v3 = vld [vmem:[#allocation55_spill] sm:$0xff] }
 0x299   : > { %v2538_v55 = vadd.f32 %v2332_v13, %v2090_v8  ;;  %v2539_v51 = vadd.f32 %v2332_v13, %v2091_v47  ;;  %v2524_v16 = vadd.f32 %v2297_v44, %v2076_v50  ;;  %v2525_v36 = vadd.f32 %v2297_v44, %v2077_v25  ;;  %v3071_v8 = vld [vmem:[%s3166_s18 + $0x2b0] sm:$0xff]  ;;  %v3072_v47 = vld [vmem:[%s3166_s18 + $0x2b8] sm:$0xff]  ;;  %v3074_v25 = vld [vmem:[%s3166_s18 + $0x248] sm:$0xff] }
 0x29a   : > { %v2102_v34 = vmul.f32 %v3071_v8, %v4569_v37  ;;  %v2103_v60 = vmul.f32 %v3072_v47, %v4569_v37  ;;  %v5553_v50 = vld [vmem:[#allocation48_spill] sm:$0xff]  ;;  %v3082_v32 = vld [vmem:[%s3166_s18 + $0x288] sm:$0xff]  ;;  %v3084_v47 = vld [vmem:[%s3166_s18 + $0x318] sm:$0xff] }
 0x29b   : > { %2666 = vst [vmem:[%s4683_s28 + $0x250] sm:$0xff] %v2538_v55  ;;  %2667 = vst.msk [vmem:[%s4683_s28 + $0x258] sm:$0xff] %vm351_vm0, %v2539_v51  ;;  %v2088_v48 = vmul.f32 %v3073_v7, %v5553_v50  ;;  %v2089_v13 = vmul.f32 %v3074_v25, %v5553_v50  ;;  %v3083_v8 = vld [vmem:[%s3166_s18 + $0x310] sm:$0xff]  ;;  %v3085_v7 = vld [vmem:[%s3166_s18 + $0x2a0] sm:$0xff] }
 0x29c   : > { %2652 = vst [vmem:[%s4683_s28 + $0x1e0] sm:$0xff] %v2524_v16  ;;  %2653 = vst.msk [vmem:[%s4683_s28 + $0x1e8] sm:$0xff] %vm351_vm0, %v2525_v36  ;;  %v2342_v27 = vpop.permute.xlu0 %2341  ;;  %v2307_v2 = vpop.permute.xlu1 %2306  ;;  %v2100_v50 = vmul.f32 %v3085_v7, %v4597_v12 }
 0x29d   : > { %v2542_v1 = vadd.f32 %v2342_v27, %v2094_v4  ;;  %v2543_v49 = vadd.f32 %v2342_v27, %v2095_v33  ;;  %v2528_v58 = vadd.f32 %v2307_v2, %v2080_v24  ;;  %v2529_v42 = vadd.f32 %v2307_v2, %v2081_v52 }
 0x29e   : > { %v2106_v4 = vmul.f32 %v3075_v21, %v5554_v62  ;;  %v2107_v33 = vmul.f32 %v3076_v18, %v5554_v62  ;;  %v2092_v24 = vmul.f32 %v3077_v43, %v5555_v45  ;;  %v2093_v52 = vmul.f32 %v3078_v26, %v5555_v45  ;;  %v3088_v21 = vld [vmem:[%s3166_s18 + $0x338] sm:$0xff] }
 0x29f   : > { %2670 = vst [vmem:[%s4683_s28 + $0x270] sm:$0xff] %v2542_v1  ;;  %2671 = vst.msk [vmem:[%s4683_s28 + $0x278] sm:$0xff] %vm351_vm0, %v2543_v49  ;;  %v2119_v62 = vmul.f32 %v3088_v21, %v4609_v0 }
 0x2a0   : > { %2656 = vst [vmem:[%s4683_s28 + $0x200] sm:$0xff] %v2528_v58  ;;  %2657 = vst.msk [vmem:[%s4683_s28 + $0x208] sm:$0xff] %vm351_vm0, %v2529_v42  ;;  %v2352_v40 = vpop.permute.xlu0 %2351  ;;  %v2317_v29 = vpop.permute.xlu1 %2316 }
 0x2a1   : > { %v2546_v39 = vadd.f32 %v2352_v40, %v2098_v46  ;;  %v2547_v19 = vadd.f32 %v2352_v40, %v2099_v63  ;;  %v2532_v22 = vadd.f32 %v2317_v29, %v2084_v20  ;;  %v2533_v23 = vadd.f32 %v2317_v29, %v2085_v5 }
 0x2a2   : > { %v2110_v46 = vmul.f32 %v3079_v28, %v5556_v38  ;;  %v2111_v63 = vmul.f32 %v3080_v14, %v5556_v38  ;;  %v2096_v20 = vmul.f32 %v3081_v15, %v5557_v3  ;;  %v2097_v5 = vmul.f32 %v3082_v32, %v5557_v3  ;;  %v3094_v38 = vld [vmem:[%s3166_s18 + $0x2e8] sm:$0xff]  ;;  %v3095_v32 = vld [vmem:[%s3166_s18 + $0x370] sm:$0xff] }
 0x2a3   : > { %2674 = vst [vmem:[%s4683_s28 + $0x290] sm:$0xff] %v2546_v39  ;;  %2675 = vst.msk [vmem:[%s4683_s28 + $0x298] sm:$0xff] %vm351_vm0, %v2547_v19 }
 0x2a4   : > { %2660 = vst [vmem:[%s4683_s28 + $0x220] sm:$0xff] %v2532_v22  ;;  %2661 = vst.msk [vmem:[%s4683_s28 + $0x228] sm:$0xff] %vm351_vm0, %v2533_v23  ;;  %v2362_v44 = vpop.permute.xlu0 %2361  ;;  %v2327_v37 = vpop.permute.xlu1 %2326 }
 0x2a5   : > { %v2550_v55 = vadd.f32 %v2362_v44, %v2102_v34  ;;  %v2551_v51 = vadd.f32 %v2362_v44, %v2103_v60  ;;  %v2536_v16 = vadd.f32 %v2327_v37, %v2088_v48  ;;  %v2537_v36 = vadd.f32 %v2327_v37, %v2089_v13  ;;  %v3086_v48 = vld [vmem:[%s3166_s18 + $0x2a8] sm:$0xff] }
 0x2a6   : > { %v2114_v34 = vmul.f32 %v3083_v8, %v4599_v41  ;;  %v2115_v60 = vmul.f32 %v3084_v47, %v4599_v41  ;;  %v2101_v25 = vmul.f32 %v3086_v48, %v4597_v12  ;;  %v3089_v12 = vld [vmem:[%s3166_s18 + $0x2c0] sm:$0xff] }
 0x2a7   : > { %2678 = vst [vmem:[%s4683_s28 + $0x2b0] sm:$0xff] %v2550_v55  ;;  %2679 = vst.msk [vmem:[%s4683_s28 + $0x2b8] sm:$0xff] %vm351_vm0, %v2551_v51 }
 0x2a8   : > { %2664 = vst [vmem:[%s4683_s28 + $0x240] sm:$0xff] %v2536_v16  ;;  %2665 = vst.msk [vmem:[%s4683_s28 + $0x248] sm:$0xff] %vm351_vm0, %v2537_v36  ;;  %v2372_v27 = vpop.permute.xlu0 %2371  ;;  %v2337_v2 = vpop.permute.xlu1 %2336  ;;  %v3087_v16 = vld [vmem:[%s3166_s18 + $0x330] sm:$0xff] }
 0x2a9   : > { %v2554_v1 = vadd.f32 %v2372_v27, %v2106_v4  ;;  %v2555_v49 = vadd.f32 %v2372_v27, %v2107_v33  ;;  %v2540_v58 = vadd.f32 %v2337_v2, %v2092_v24  ;;  %v2541_v42 = vadd.f32 %v2337_v2, %v2093_v52  ;;  %v5558_v4 = vld [vmem:[#allocation7_spill] sm:$0xff]  ;;  %v3091_v2 = vld [vmem:[%s3166_s18 + $0x350] sm:$0xff] }
 0x2aa   : > { %v2118_v36 = vmul.f32 %v3087_v16, %v4609_v0  ;;  %v2104_v18 = vmul.f32 %v3089_v12, %v5558_v4  ;;  %v3090_v33 = vld [vmem:[%s3166_s18 + $0x2c8] sm:$0xff]  ;;  %v3103_v12 = vld [vmem:[%s3166_s18 + $0x3b0] sm:$0xff] }
 0x2ab   : > { %2682 = vst [vmem:[%s4683_s28 + $0x2d0] sm:$0xff] %v2554_v1  ;;  %2683 = vst.msk [vmem:[%s4683_s28 + $0x2d8] sm:$0xff] %vm351_vm0, %v2555_v49  ;;  %v2105_v43 = vmul.f32 %v3090_v33, %v5558_v4  ;;  %v2122_v1 = vmul.f32 %v3091_v2, %v4619_v10  ;;  %v3092_v49 = vld [vmem:[%s3166_s18 + $0x358] sm:$0xff]  ;;  %v2134_v4 = vmul.f32 %v3103_v12, %v4649_v17 }
 0x2ac   : > { %2668 = vst [vmem:[%s4683_s28 + $0x260] sm:$0xff] %v2540_v58  ;;  %2669 = vst.msk [vmem:[%s4683_s28 + $0x268] sm:$0xff] %vm351_vm0, %v2541_v42  ;;  %v2382_v40 = vpop.permute.xlu0 %2381  ;;  %v2347_v29 = vpop.permute.xlu1 %2346  ;;  %v2123_v58 = vmul.f32 %v3092_v49, %v4619_v10  ;;  %v3093_v42 = vld [vmem:[%s3166_s18 + $0x2e0] sm:$0xff] }
 0x2ad   : > { %v2558_v39 = vadd.f32 %v2382_v40, %v2110_v46  ;;  %v2559_v19 = vadd.f32 %v2382_v40, %v2111_v63  ;;  %v2544_v22 = vadd.f32 %v2347_v29, %v2096_v20  ;;  %v2545_v23 = vadd.f32 %v2347_v29, %v2097_v5  ;;  %v3096_v40 = vld [vmem:[%s3166_s18 + $0x378] sm:$0xff] }
 0x2ae   : > { %v2108_v28 = vmul.f32 %v3093_v42, %v4617_v9  ;;  %v2109_v46 = vmul.f32 %v3094_v38, %v4617_v9  ;;  %v2126_v5 = vmul.f32 %v3095_v32, %v4629_v61  ;;  %v2127_v29 = vmul.f32 %v3096_v40, %v4629_v61  ;;  %v3097_v9 = vld [vmem:[%s3166_s18 + $0x300] sm:$0xff]  ;;  %v3110_v38 = vld [vmem:[%s3166_s18 + $0x368] sm:$0xff] }
 0x2af   : > { %2686 = vst [vmem:[%s4683_s28 + $0x2f0] sm:$0xff] %v2558_v39  ;;  %2687 = vst.msk [vmem:[%s4683_s28 + $0x2f8] sm:$0xff] %vm351_vm0, %v2559_v19  ;;  %v5559_v39 = vld [vmem:[#allocation47_spill] sm:$0xff] }
 0x2b0   : > { %2672 = vst [vmem:[%s4683_s28 + $0x280] sm:$0xff] %v2544_v22  ;;  %2673 = vst.msk [vmem:[%s4683_s28 + $0x288] sm:$0xff] %vm351_vm0, %v2545_v23  ;;  %v2392_v13 = vpop.permute.xlu0 %2391  ;;  %v2357_v41 = vpop.permute.xlu1 %2356  ;;  %v2112_v19 = vmul.f32 %v3097_v9, %v5559_v39  ;;  %v3098_v22 = vld [vmem:[%s3166_s18 + $0x308] sm:$0xff] }
 0x2b1   : > { %v2562_v44 = vadd.f32 %v2392_v13, %v2114_v34  ;;  %v2563_v37 = vadd.f32 %v2392_v13, %v2115_v60  ;;  %v2548_v55 = vadd.f32 %v2357_v41, %v2100_v50  ;;  %v2549_v51 = vadd.f32 %v2357_v41, %v2101_v25  ;;  %v3099_v50 = vld [vmem:[%s3166_s18 + $0x390] sm:$0xff]  ;;  %v3100_v25 = vld [vmem:[%s3166_s18 + $0x398] sm:$0xff]  ;;  %v3101_v41 = vld [vmem:[%s3166_s18 + $0x320] sm:$0xff] }
 0x2b2   : > { %v2113_v23 = vmul.f32 %v3098_v22, %v5559_v39  ;;  %v2130_v48 = vmul.f32 %v3099_v50, %v4639_v57  ;;  %v2131_v13 = vmul.f32 %v3100_v25, %v4639_v57  ;;  %v3114_v9 = vld [vmem:[%s3166_s18 + $0x388] sm:$0xff]  ;;  %v3117_v25 = vld [vmem:[%s3166_s18 + $0x3c0] sm:$0xff] }
 0x2b3   : > { %2690 = vst [vmem:[%s4683_s28 + $0x310] sm:$0xff] %v2562_v44  ;;  %2691 = vst.msk [vmem:[%s4683_s28 + $0x318] sm:$0xff] %vm351_vm0, %v2563_v37  ;;  %v2116_v44 = vmul.f32 %v3101_v41, %v4637_v53  ;;  %v3102_v37 = vld [vmem:[%s3166_s18 + $0x328] sm:$0xff]  ;;  %v2129_v39 = vmul.f32 %v3114_v9, %v4665_v56 }
 0x2b4   : > { %2676 = vst [vmem:[%s4683_s28 + $0x2a0] sm:$0xff] %v2548_v55  ;;  %2677 = vst.msk [vmem:[%s4683_s28 + $0x2a8] sm:$0xff] %vm351_vm0, %v2549_v51  ;;  %v2402_v45 = vpop.permute.xlu0 %2401  ;;  %v2367_v0 = vpop.permute.xlu1 %2366  ;;  %v2117_v55 = vmul.f32 %v3102_v37, %v4637_v53  ;;  %v3105_v53 = vld [vmem:[%s3166_s18 + $0x340] sm:$0xff]  ;;  %v3118_v41 = vld [vmem:[%s3166_s18 + $0x3c8] sm:$0xff] }
 0x2b5   : > { %v2566_v24 = vadd.f32 %v2402_v45, %v2118_v36  ;;  %v2567_v26 = vadd.f32 %v2402_v45, %v2119_v62  ;;  %v2552_v52 = vadd.f32 %v2367_v0, %v2104_v18  ;;  %v2553_v27 = vadd.f32 %v2367_v0, %v2105_v43  ;;  %v3104_v18 = vld [vmem:[%s3166_s18 + $0x3b8] sm:$0xff]  ;;  %v3106_v45 = vld [vmem:[%s3166_s18 + $0x348] sm:$0xff] }
 0x2b6   : > { %v2135_v33 = vmul.f32 %v3104_v18, %v4649_v17  ;;  %v2120_v43 = vmul.f32 %v3105_v53, %v4647_v35  ;;  %v2121_v0 = vmul.f32 %v3106_v45, %v4647_v35  ;;  %v3109_v35 = vld [vmem:[%s3166_s18 + $0x360] sm:$0xff] }
 0x2b7   : > { %2694 = vst [vmem:[%s4683_s28 + $0x330] sm:$0xff] %v2566_v24  ;;  %2695 = vst.msk [vmem:[%s4683_s28 + $0x338] sm:$0xff] %vm351_vm0, %v2567_v26 }
 0x2b8   : > { %2680 = vst [vmem:[%s4683_s28 + $0x2c0] sm:$0xff] %v2552_v52  ;;  %2681 = vst.msk [vmem:[%s4683_s28 + $0x2c8] sm:$0xff] %vm351_vm0, %v2553_v27  ;;  %v2412_v14 = vpop.permute.xlu0 %2411  ;;  %v2377_v10 = vpop.permute.xlu1 %2376 }
 0x2b9   : > { %v2570_v63 = vadd.f32 %v2412_v14, %v2122_v1  ;;  %v2571_v15 = vadd.f32 %v2412_v14, %v2123_v58  ;;  %v2556_v3 = vadd.f32 %v2377_v10, %v2108_v28  ;;  %v2557_v20 = vadd.f32 %v2377_v10, %v2109_v46  ;;  %v3107_v1 = vld [vmem:[%s3166_s18 + $0x3d0] sm:$0xff]  ;;  %v3108_v58 = vld [vmem:[%s3166_s18 + $0x3d8] sm:$0xff] }
 0x2ba   : > { %v2138_v49 = vmul.f32 %v3107_v1, %v4659_v11  ;;  %v2139_v42 = vmul.f32 %v3108_v58, %v4659_v11  ;;  %v2124_v28 = vmul.f32 %v3109_v35, %v4657_v54  ;;  %v2125_v46 = vmul.f32 %v3110_v38, %v4657_v54  ;;  %v3113_v54 = vld [vmem:[%s3166_s18 + $0x380] sm:$0xff] }
 0x2bb   : > { %2698 = vst [vmem:[%s4683_s28 + $0x350] sm:$0xff] %v2570_v63  ;;  %2699 = vst.msk [vmem:[%s4683_s28 + $0x358] sm:$0xff] %vm351_vm0, %v2571_v15 }
 0x2bc   : > { %2684 = vst [vmem:[%s4683_s28 + $0x2e0] sm:$0xff] %v2556_v3  ;;  %2685 = vst.msk [vmem:[%s4683_s28 + $0x2e8] sm:$0xff] %vm351_vm0, %v2557_v20  ;;  %v2422_v8 = vpop.permute.xlu0 %2421  ;;  %v2387_v61 = vpop.permute.xlu1 %2386  ;;  %v3111_v20 = vld [vmem:[%s3166_s18 + $0x3f0] sm:$0xff] }
 0x2bd   : > { %v2574_v34 = vadd.f32 %v2422_v8, %v2126_v5  ;;  %v2575_v47 = vadd.f32 %v2422_v8, %v2127_v29  ;;  %v2560_v60 = vadd.f32 %v2387_v61, %v2112_v19  ;;  %v2561_v7 = vadd.f32 %v2387_v61, %v2113_v23  ;;  %v3112_v5 = vld [vmem:[%s3166_s18 + $0x3f8] sm:$0xff] }
 0x2be   : > { %v2142_v32 = vmul.f32 %v3111_v20, %v4667_v31  ;;  %v2143_v40 = vmul.f32 %v3112_v5, %v4667_v31  ;;  %v2128_v29 = vmul.f32 %v3113_v54, %v4665_v56 }
 0x2bf   : > { %2702 = vst [vmem:[%s4683_s28 + $0x370] sm:$0xff] %v2574_v34  ;;  %2703 = vst.msk [vmem:[%s4683_s28 + $0x378] sm:$0xff] %vm351_vm0, %v2575_v47  ;;  %v3115_v34 = vld [vmem:[%s3166_s18 + $0x3a0] sm:$0xff]  ;;  %v3116_v47 = vld [vmem:[%s3166_s18 + $0x3a8] sm:$0xff] }
 0x2c0   : > { %2688 = vst [vmem:[%s4683_s28 + $0x300] sm:$0xff] %v2560_v60  ;;  %2689 = vst.msk [vmem:[%s4683_s28 + $0x308] sm:$0xff] %vm351_vm0, %v2561_v7  ;;  %v2432_v51 = vpop.permute.xlu0 %2431  ;;  %v2397_v57 = vpop.permute.xlu1 %2396  ;;  %v2132_v56 = vmul.f32 %v3115_v34, %v4676_v59  ;;  %v2133_v60 = vmul.f32 %v3116_v47, %v4676_v59 }
 0x2c1   : > { %v2578_v16 = vadd.f32 %v2432_v51, %v2130_v48  ;;  %v2579_v36 = vadd.f32 %v2432_v51, %v2131_v13  ;;  %v2564_v21 = vadd.f32 %v2397_v57, %v2116_v44  ;;  %v2565_v62 = vadd.f32 %v2397_v57, %v2117_v55  ;;  %v3119_v51 = vld [vmem:[%s3166_s18 + $0x3e0] sm:$0xff] }
 0x2c2   : > { %v2136_v13 = vmul.f32 %v3117_v25, %v4695_v6  ;;  %v2137_v44 = vmul.f32 %v3118_v41, %v4695_v6  ;;  %v2140_v57 = vmul.f32 %v3119_v51, %v4707_v30 }
 0x2c3   : > { %2706 = vst [vmem:[%s4683_s28 + $0x390] sm:$0xff] %v2578_v16  ;;  %2707 = vst.msk [vmem:[%s4683_s28 + $0x398] sm:$0xff] %vm351_vm0, %v2579_v36  ;;  %v3120_v16 = vld [vmem:[%s3166_s18 + $0x3e8] sm:$0xff] }
 0x2c4   : > { %2692 = vst [vmem:[%s4683_s28 + $0x320] sm:$0xff] %v2564_v21  ;;  %2693 = vst.msk [vmem:[%s4683_s28 + $0x328] sm:$0xff] %vm351_vm0, %v2565_v62  ;;  %v2442_v24 = vpop.permute.xlu0 %2441  ;;  %v2407_v17 = vpop.permute.xlu1 %2406  ;;  %v2141_v36 = vmul.f32 %v3120_v16, %v4707_v30 }
 0x2c5   : > { %v2582_v26 = vadd.f32 %v2442_v24, %v2134_v4  ;;  %v2583_v52 = vadd.f32 %v2442_v24, %v2135_v33  ;;  %v2568_v27 = vadd.f32 %v2407_v17, %v2120_v43  ;;  %v2569_v2 = vadd.f32 %v2407_v17, %v2121_v0 }
 0x2c7   : > { %2710 = vst [vmem:[%s4683_s28 + $0x3b0] sm:$0xff] %v2582_v26  ;;  %2711 = vst.msk [vmem:[%s4683_s28 + $0x3b8] sm:$0xff] %vm351_vm0, %v2583_v52 }
 0x2c8   : > { %2696 = vst [vmem:[%s4683_s28 + $0x340] sm:$0xff] %v2568_v27  ;;  %2697 = vst.msk [vmem:[%s4683_s28 + $0x348] sm:$0xff] %vm351_vm0, %v2569_v2  ;;  %v2452_v14 = vpop.permute.xlu0 %2451  ;;  %v2417_v11 = vpop.permute.xlu1 %2416 }
 0x2c9   : > { %v2586_v10 = vadd.f32 %v2452_v14, %v2138_v49  ;;  %v2587_v63 = vadd.f32 %v2452_v14, %v2139_v42  ;;  %v2572_v15 = vadd.f32 %v2417_v11, %v2124_v28  ;;  %v2573_v3 = vadd.f32 %v2417_v11, %v2125_v46 }
 0x2cb   : > { %2714 = vst [vmem:[%s4683_s28 + $0x3d0] sm:$0xff] %v2586_v10  ;;  %2715 = vst.msk [vmem:[%s4683_s28 + $0x3d8] sm:$0xff] %vm351_vm0, %v2587_v63 }
 0x2cc   : > { %2700 = vst [vmem:[%s4683_s28 + $0x360] sm:$0xff] %v2572_v15  ;;  %2701 = vst.msk [vmem:[%s4683_s28 + $0x368] sm:$0xff] %vm351_vm0, %v2573_v3  ;;  %v2462_v19 = vpop.permute.xlu0 %2461  ;;  %v2427_v22 = vpop.permute.xlu1 %2426 }
 0x2cd   : > { %v2590_v31 = vadd.f32 %v2462_v19, %v2142_v32  ;;  %v2591_v23 = vadd.f32 %v2462_v19, %v2143_v40  ;;  %v2576_v8 = vadd.f32 %v2427_v22, %v2128_v29  ;;  %v2577_v61 = vadd.f32 %v2427_v22, %v2129_v39 }
 0x2cf   : > { %2718 = vst [vmem:[%s4683_s28 + $0x3f0] sm:$0xff] %v2590_v31  ;;  %2719 = vst.msk [vmem:[%s4683_s28 + $0x3f8] sm:$0xff] %vm351_vm0, %v2591_v23 }
 0x2d0   : > { %2704 = vst [vmem:[%s4683_s28 + $0x380] sm:$0xff] %v2576_v8  ;;  %2705 = vst.msk [vmem:[%s4683_s28 + $0x388] sm:$0xff] %vm351_vm0, %v2577_v61  ;;  %v2437_v7 = vpop.permute.xlu1 %2436 }
 0x2d1   : > { %v2580_v50 = vadd.f32 %v2437_v7, %v2132_v56  ;;  %v2581_v48 = vadd.f32 %v2437_v7, %v2133_v60 }
 0x2d3   : > { %2708 = vst [vmem:[%s4683_s28 + $0x3a0] sm:$0xff] %v2580_v50  ;;  %2709 = vst.msk [vmem:[%s4683_s28 + $0x3a8] sm:$0xff] %vm351_vm0, %v2581_v48 }
 0x2d4   : > { %v2447_v59 = vpop.permute.xlu1 %2446 }
 0x2d5   : > { %v2584_v37 = vadd.f32 %v2447_v59, %v2136_v13  ;;  %v2585_v55 = vadd.f32 %v2447_v59, %v2137_v44 }
 0x2d7   : > { %2712 = vst [vmem:[%s4683_s28 + $0x3c0] sm:$0xff] %v2584_v37  ;;  %2713 = vst.msk [vmem:[%s4683_s28 + $0x3c8] sm:$0xff] %vm351_vm0, %v2585_v55 }
 0x2d8   : > { %v2457_v21 = vpop.permute.xlu1 %2456 }
 0x2d9   : > { %v2588_v62 = vadd.f32 %v2457_v21, %v2140_v57  ;;  %v2589_v12 = vadd.f32 %v2457_v21, %v2141_v36 }
 0x2db   : > { %2716 = vst [vmem:[%s4683_s28 + $0x3e0] sm:$0xff] %v2588_v62  ;;  %2717 = vst.msk [vmem:[%s4683_s28 + $0x3e8] sm:$0xff] %vm351_vm0, %v2589_v12 }
 0x2dc PF: > { %s13_s12 = sadd.s32 1, %s3127_s12  }
 0x2dd   : > { %p10_p4 = scmp.ge.s32.totalorder %s13_s12, 4  }
 0x2df   :  { %12 = sbr.rel (!%p10_p4) target bundleno = 1 (0x1), region = 68 }

</bundles_post_ra>
